<compile_context>
chip_gen: v7x
topology: tpu7x:2x2x1
jax: 0.10.0
libtpu: 0.0.40
codegen_flags: <defaults>
</compile_context>

<pallas_src>
import functools

import jax
import jax.numpy as jnp
from jax.experimental import pallas as pl
from jax.experimental.pallas import tpu as pltpu


def _round_up(x, m):
    return ((x + m - 1) // m) * m


def _device_kind():
    try:
        return jax.devices()[0].device_kind.lower()
    except Exception:
        return ""


_KIND = _device_kind()
_IS_V5E = ("v5e" in _KIND) or ("v5 lite" in _KIND) or ("v5litepod" in _KIND)
_IS_V7 = "v7" in _KIND

# Scoped-VMEM limit declared per pallas_call (physical: v5e/v6e 128 MiB/TC,
# v7x 64 MiB/TC with a 32 MiB scoped default).
_VMEM_LIMIT_BYTES = (32 << 20) if _IS_V7 else (64 << 20)
# Soft budget for the per-step working set used by the tile chooser
# (multi-buffered A/B/out tiles + f32 accumulator).
_TILE_VMEM_BUDGET = (10 << 20) if _IS_V5E else (18 << 20)


# ----------------------------------------------------------------------------
# Pallas kernel: tiled (patches @ weight) matmul, f32 accumulation,
# LeakyReLU(0.2) fused in the epilogue.
# ----------------------------------------------------------------------------
def _matmul_act_kernel(a_ref, b_ref, o_ref, acc_ref, *, apply_act):
    @pl.when(pl.program_id(2) == 0)
    def _init():
        acc_ref[...] = jnp.zeros_like(acc_ref)

    acc_ref[...] += jnp.dot(a_ref[...], b_ref[...],
                            preferred_element_type=jnp.float32)

    @pl.when(pl.program_id(2) == pl.num_programs(2) - 1)
    def _store():
        acc = acc_ref[...]
        if apply_act:
            acc = jnp.where(acc >= 0, acc, jnp.float32(0.2) * acc)
        o_ref[...] = acc.astype(o_ref.dtype)


# ----------------------------------------------------------------------------
# Static tile selection (runs at trace time, pure Python ints)
# ----------------------------------------------------------------------------
def _mult_divisors(total, unit, limit):
    """Divisors of `total` that are multiples of `unit` and <= limit (desc)."""
    out = []
    d = unit
    cap = min(total, limit)
    while d <= cap:
        if total % d == 0:
            out.append(d)
        d += unit
    return sorted(out, reverse=True)


def _vmem_bytes(tm, tk, tn, a_bufs):
    a = a_bufs * tm * tk * 2     # bf16 A tile, multi-buffered
    b = 2 * tk * tn * 2          # bf16 B tile, double-buffered
    o = 2 * tm * tn * 2          # bf16 out tile, double-buffered
    acc = tm * tn * 4            # f32 accumulator scratch
    return a + b + o + acc


def _choose_tiles(M, K, N, a_bufs):
    """Pick (tm, tk, tn): whole-K contraction and weight-resident N when the
    VMEM budget allows, minimizing total grid steps (~0.35us overhead each)."""
    m_full = _round_up(M, 8)
    tm_cands = sorted({min(t, m_full)
                       for t in (1024, 512, 256, 128, 64, 32, 16, 8)},
                      reverse=True)
    tk_cands = [K] + _mult_divisors(K, 128, K - 1)
    tn_cands = _mult_divisors(N, 128, 512) or [N]

    best = None
    for tm in tm_cands:
        for tk in tk_cands:
            for tn in tn_cands:
                if _vmem_bytes(tm, tk, tn, a_bufs) > _TILE_VMEM_BUDGET:
                    continue
                par_blocks = pl.cdiv(M, tm) * (N // tn)
                steps = par_blocks * (K // tk)
                # v7x has 2 TensorCores/chip: prefer >=2 parallel blocks so
                # dimension_semantics("parallel", ...) can use both.
                penalty = 1 if (_IS_V7 and par_blocks < 2) else 0
                key = (penalty, steps, -tm, -tk, -tn)
                if best is None or key < best[0]:
                    best = (key, (tm, tk, tn))
    if best is None:   # shapes our config never produces; smallest tiles
        return tm_cands[-1], tk_cands[-1], tn_cands[-1]
    return best[1]


def conv_matmul(a, b, apply_act):
    """a: (M, K) bf16, b: (K, N) bf16 -> (M, N) bf16.  N must be 128-aligned."""
    M, K = a.shape
    K2, N = b.shape
    assert K == K2
    assert N % 128 == 0, "pad output channels to a multiple of 128"

    small_k = K <= 256
    a_bufs = 3 if small_k else 2
    tm, tk, tn = _choose_tiles(M, K, N, a_bufs)
    grid = (pl.cdiv(M, tm), N // tn, K // tk)
    total_steps = grid[0] * grid[1] * grid[2]

    # Deeper buffering on the streaming A operand only pays off for the
    # small-K (HBM/store-bound) layer-1 shape, and only with enough steps.
    if small_k and total_steps >= 4:
        a_spec = pl.BlockSpec((tm, tk), lambda i, j, k: (i, k),
                              pipeline_mode=pl.Buffered(3))
    else:
        a_spec = pl.BlockSpec((tm, tk), lambda i, j, k: (i, k))

    cost = pl.CostEstimate(
        flops=2 * M * N * K,
        transcendentals=0,
        bytes_accessed=(M * K + K * N + M * N) * 2,
    )

    return pl.pallas_call(
        functools.partial(_matmul_act_kernel, apply_act=apply_act),
        out_shape=jax.ShapeDtypeStruct((M, N), jnp.bfloat16),
        grid_spec=pltpu.PrefetchScalarGridSpec(
            num_scalar_prefetch=0,
            grid=grid,
            in_specs=[
                a_spec,
                pl.BlockSpec((tk, tn), lambda i, j, k: (k, j)),
            ],
            out_specs=pl.BlockSpec((tm, tn), lambda i, j, k: (i, j)),
            scratch_shapes=[pltpu.VMEM((tm, tn), jnp.float32)],
        ),
        compiler_params=pltpu.CompilerParams(
            dimension_semantics=("parallel", "parallel", "arbitrary"),
            vmem_limit_bytes=_VMEM_LIMIT_BYTES),
        cost_estimate=cost,
    )(a, b)


# ----------------------------------------------------------------------------
# Glue: im2col patch extraction (NHWC), spectral norm, weight reshaping/padding
# ----------------------------------------------------------------------------
def im2col(x, kh, kw, stride, pad):
    """x: (N, H, W, C) -> (N*OH*OW, KH*KW*C), feature order (kh, kw, c)."""
    n, h, w, c = x.shape
    xp = jnp.pad(x, ((0, 0), (pad, pad), (pad, pad), (0, 0)))
    oh = (h + 2 * pad - kh) // stride + 1
    ow = (w + 2 * pad - kw) // stride + 1
    cols = []
    for i in range(kh):
        for j in range(kw):
            cols.append(
                xp[:, i:i + stride * oh:stride, j:j + stride * ow:stride, :])
    patches = jnp.stack(cols, axis=3)           # (N, OH, OW, KH*KW, C)
    return patches.reshape(n * oh * ow, kh * kw * c), oh, ow


def spectral_norm(w, u, eps=1e-12):
    """One power iteration like nn.utils.spectral_norm (training step).

    Note: PyTorch's F.normalize divides by max(||v||, eps) whereas we use
    ||v|| + eps; the difference is ~1e-12 and numerically irrelevant here.
    w: (OC, IC, KH, KW) f32, u: (OC,) f32. Returns (w / sigma, u_new).
    """
    wm = w.reshape(w.shape[0], -1)
    v = wm.T @ u
    v = v / (jnp.linalg.norm(v) + eps)
    u_new = wm @ v
    u_new = u_new / (jnp.linalg.norm(u_new) + eps)
    sigma = u_new @ (wm @ v)
    return w / sigma, u_new


def weight_to_matmul(w, cin_pad, cout_pad):
    """(OC, IC, KH, KW) -> (KH*KW*cin_pad, cout_pad), matching im2col order.

    Zero-pads the OC axis for lane-dense 128-aligned output stores (IC is not
    padded anymore: the caller slices the activation back to the true cin).
    """
    oc, ic, kh, kw = w.shape
    wt = jnp.transpose(w, (2, 3, 1, 0))                       # (KH, KW, IC, OC)
    wt = jnp.pad(wt, ((0, 0), (0, 0), (0, cin_pad - ic), (0, cout_pad - oc)))
    return wt.reshape(kh * kw * cin_pad, cout_pad)


# ----------------------------------------------------------------------------
# Jitted functional forward
# ----------------------------------------------------------------------------
@functools.partial(jax.jit, static_argnums=(3,))
def _forward(weights, us, x_nchw, cfg):
    # layout: accept NCHW (PyTorch convention); compute NHWC, bf16 activations.
    x = jnp.transpose(x_nchw, (0, 2, 3, 1)).astype(jnp.bfloat16)
    n = x.shape[0]
    num_layers = len(cfg)
    new_us = []
    for idx, (w, u, (cin, cout, k, s, p, act)) in enumerate(
            zip(weights, us, cfg)):
        w_sn, u_new = spectral_norm(w, u)
        new_us.append(u_new)

        # Slice off the previous layer's lane-padding channels before patch
        # extraction (fuses into the im2col gather); keeps K at the true value
        # instead of contracting over exact zeros.
        x_in = x[..., :cin]
        patches, oh, ow = im2col(x_in, k, k, s, p)  # (N*OH*OW, k*k*cin) bf16

        if idx < num_layers - 1:
            cout_pad = _round_up(cout, 128)
            wm = weight_to_matmul(w_sn, cin, cout_pad).astype(jnp.bfloat16)
            y = conv_matmul(patches, wm, apply_act=act)        # Pallas hot path
            x = y.reshape(n, oh, ow, cout_pad)
        else:
            # Degenerate final conv (cout=1 => N=1): keep off the MXU, plain dot.
            wm = weight_to_matmul(w_sn, cin, cout).astype(jnp.bfloat16)
            y = jnp.dot(patches, wm, preferred_element_type=jnp.float32)
            if act:
                y = jnp.where(y >= 0, y, 0.2 * y)
            x = y.reshape(n, oh, ow, cout)

    # final feature map (N, 1, 1, 1)  ->  .view(-1, 1).squeeze(1) -> (N,)
    return x.reshape(-1), tuple(new_us)


# ----------------------------------------------------------------------------
# Full module
# ----------------------------------------------------------------------------
class SpectralNormDiscriminator:
    """Forward-pass equivalent of the PyTorch SpectralNormDiscriminator."""

    # (in_ch, out_ch, kernel, stride, pad, leaky_relu?)
    def __init__(self, nc=3, ndf=64, key=jax.random.PRNGKey(42)):
        self.cfg = [
            (nc,        ndf,     4, 2, 1, True),
            (ndf,       ndf * 2, 4, 2, 1, True),
            (ndf * 2,   ndf * 4, 4, 2, 1, True),
            (ndf * 4,   ndf * 8, 4, 2, 1, True),
            (ndf * 8,   1,       4, 1, 0, False),
        ]
        self.weights = []
        self.us = []
        for (cin, cout, k, s, p, _) in self.cfg:
            key, wk, uk = jax.random.split(key, 3)
            w = 0.02 * jax.random.normal(wk, (cout, cin, k, k), jnp.float32)
            u = jax.random.normal(uk, (cout,), jnp.float32)
            u = u / (jnp.linalg.norm(u) + 1e-12)
            self.weights.append(w)
            self.us.append(u)

    def __call__(self, x_nchw):
        out, new_us = _forward(tuple(self.weights), tuple(self.us),
                               x_nchw, tuple(self.cfg))
        # Persist the power-iteration state, like PyTorch's spectral_norm buffer.
        self.us = list(new_us)
        return out


# ----------------------------------------------------------------------------
# Pure-JAX reference (lax conv) mirroring the same bf16 storage chain
# ----------------------------------------------------------------------------
def _reference_forward(weights, us, cfg, x_nchw):
    x = x_nchw.astype(jnp.float32)
    num = len(cfg)
    for idx, (w, u, (cin, cout, k, s, p, act)) in enumerate(
            zip(weights, us, cfg)):
        w_sn, _ = spectral_norm(w, u)
        lhs = x.astype(jnp.bfloat16).astype(jnp.float32)
        rhs = w_sn.astype(jnp.bfloat16).astype(jnp.float32)
        y = jax.lax.conv_general_dilated(
            lhs, rhs, window_strides=(s, s), padding=[(p, p), (p, p)],
            dimension_numbers=("NCHW", "OIHW", "NCHW"))
        if act:
            y = jnp.where(y >= 0, y, 0.2 * y)
        if idx < num - 1:
            x = y.astype(jnp.bfloat16).astype(jnp.float32)   # bf16 activations
        else:
            x = y
    return x.reshape(-1)


if __name__ == "__main__":
    # The 5-layer stack needs 64x64 spatial input to reach a 1x1 final map.
    # Keep it small: batch=2, nc=3, ndf=16.
    key = jax.random.PRNGKey(0)
    x = jax.random.normal(key, (2, 3, 64, 64), jnp.float32)

    model = SpectralNormDiscriminator(nc=3, ndf=16)
    us0 = list(model.us)                 # reference uses pre-update u buffers

    out = jax.block_until_ready(model(x))
    ref = jax.block_until_ready(
        _reference_forward(model.weights, us0, model.cfg, x))

    assert out.shape == (2,), out.shape
    assert jnp.allclose(out, ref, atol=1e-2, rtol=2e-2), (out, ref)
    print("KERNEL_OK")
</pallas_src>

<mosaic_0001>
module attributes {stable_mosaic.version = 11 : i64} {
  func.func @_matmul_act_kernel(%arg0: i32, %arg1: i32, %arg2: i32, %arg3: memref<1024x48xbf16, #tpu.memory_space<vmem>>, %arg4: memref<48x128xbf16, #tpu.memory_space<vmem>>, %arg5: memref<1024x128xbf16, #tpu.memory_space<vmem>>, %arg6: memref<1024x128xf32, #tpu.memory_space<vmem>>) attributes {dimension_semantics = [#tpu.dimension_semantics<parallel>, #tpu.dimension_semantics<parallel>, #tpu.dimension_semantics<arbitrary>], iteration_bounds = array<i64: 2, 1, 1>, scalar_prefetch = 0 : i64, scratch_operands = 1 : i64, tpu.core_type = #tpu.core_type<tc>, window_params = [{transform_indices = @transform_0, window_bounds = array<i64: 1024, 48>}, {transform_indices = @transform_1, window_bounds = array<i64: 48, 128>}, {transform_indices = @transform_2, window_bounds = array<i64: 1024, 128>}]} {
    %c0_i32 = arith.constant 0 : i32
    %0 = arith.cmpi eq, %arg2, %c0_i32 : i32
    %1 = arith.extui %0 : i1 to i32
    %c0_i32_0 = arith.constant 0 : i32
    %2 = arith.cmpi ne, %1, %c0_i32_0 : i32
    scf.if %2 {
      %cst_10 = arith.constant 0.000000e+00 : f32
      %12 = vector.broadcast %cst_10 : f32 to vector<1024x128xf32>
      %c0_11 = arith.constant 0 : index
      %c0_12 = arith.constant 0 : index
      %13 = vector.load %arg6[%c0_11, %c0_12] : memref<1024x128xf32, #tpu.memory_space<vmem>>, vector<1024x128xf32>
      tpu.vector_store %arg6[%c0_11, %c0_12], %12 {strides = array<i32>} : memref<1024x128xf32, #tpu.memory_space<vmem>>, vector<1024x128xf32>,
    } else {
    }
    %c0 = arith.constant 0 : index
    %c0_1 = arith.constant 0 : index
    %3 = vector.load %arg6[%c0, %c0_1] : memref<1024x128xf32, #tpu.memory_space<vmem>>, vector<1024x128xf32>
    %c0_2 = arith.constant 0 : index
    %c0_3 = arith.constant 0 : index
    %4 = vector.load %arg3[%c0_2, %c0_3] : memref<1024x48xbf16, #tpu.memory_space<vmem>>, vector<1024x48xbf16>
    %c0_4 = arith.constant 0 : index
    %c0_5 = arith.constant 0 : index
    %5 = vector.load %arg4[%c0_4, %c0_5] : memref<48x128xbf16, #tpu.memory_space<vmem>>, vector<48x128xbf16>
    %cst = arith.constant dense<0.000000e+00> : vector<1024x128xf32>
    %6 = tpu.matmul %4, %5, %cst {dimension_numbers = #tpu.dot_dimension_numbers<[1], [0], [0], [1], [0, 0, 1, 1], [], []>} : vector<1024x48xbf16>, vector<48x128xbf16>, vector<1024x128xf32> -> vector<1024x128xf32>
    %7 = arith.addf %3, %6 : vector<1024x128xf32>
    %c0_6 = arith.constant 0 : index
    %c0_7 = arith.constant 0 : index
    %8 = vector.load %arg6[%c0_6, %c0_7] : memref<1024x128xf32, #tpu.memory_space<vmem>>, vector<1024x128xf32>
    tpu.vector_store %arg6[%c0_6, %c0_7], %7 {strides = array<i32>} : memref<1024x128xf32, #tpu.memory_space<vmem>>, vector<1024x128xf32>,
    %c0_i32_8 = arith.constant 0 : i32
    %9 = arith.cmpi eq, %arg2, %c0_i32_8 : i32
    %10 = arith.extui %9 : i1 to i32
    %c0_i32_9 = arith.constant 0 : i32
    %11 = arith.cmpi ne, %10, %c0_i32_9 : i32
    scf.if %11 {
      %c0_10 = arith.constant 0 : index
      %c0_11 = arith.constant 0 : index
      %12 = vector.load %arg6[%c0_10, %c0_11] : memref<1024x128xf32, #tpu.memory_space<vmem>>, vector<1024x128xf32>
      %cst_12 = arith.constant 0.000000e+00 : f32
      %13 = vector.broadcast %cst_12 : f32 to vector<1024x128xf32>
      %14 = arith.cmpf oge, %12, %13 : vector<1024x128xf32>
      %cst_13 = arith.constant 2.000000e-01 : f32
      %15 = vector.broadcast %cst_13 : f32 to vector<1024x128xf32>
      %16 = arith.mulf %15, %12 : vector<1024x128xf32>
      %17 = arith.select %14, %12, %16 : vector<1024x128xi1>, vector<1024x128xf32>
      %18 = arith.truncf %17 : vector<1024x128xf32> to vector<1024x128xbf16>
      %c0_14 = arith.constant 0 : index
      %c0_15 = arith.constant 0 : index
      %19 = vector.load %arg5[%c0_14, %c0_15] : memref<1024x128xbf16, #tpu.memory_space<vmem>>, vector<1024x128xbf16>
      tpu.vector_store %arg5[%c0_14, %c0_15], %18 {strides = array<i32>} : memref<1024x128xbf16, #tpu.memory_space<vmem>>, vector<1024x128xbf16>,
    } else {
    }
    return
  }
  func.func @transform_0(%arg0: i32, %arg1: i32, %arg2: i32) -> (i32, i32) {
    %c0_i32 = arith.constant 0 : i32
    return %arg0, %arg2 : i32, i32
  }
  func.func @transform_1(%arg0: i32, %arg1: i32, %arg2: i32) -> (i32, i32) {
    %c0_i32 = arith.constant 0 : i32
    return %arg2, %arg1 : i32, i32
  }
  func.func @transform_2(%arg0: i32, %arg1: i32, %arg2: i32) -> (i32, i32) {
    %c0_i32 = arith.constant 0 : i32
    return %arg0, %arg1 : i32, i32
  }
}

module attributes {stable_mosaic.version = 11 : i64} {
  func.func @_matmul_act_kernel(%arg0: i32, %arg1: i32, %arg2: i32, %arg3: memref<512x256xbf16, #tpu.memory_space<vmem>>, %arg4: memref<256x128xbf16, #tpu.memory_space<vmem>>, %arg5: memref<512x128xbf16, #tpu.memory_space<vmem>>, %arg6: memref<512x128xf32, #tpu.memory_space<vmem>>) attributes {dimension_semantics = [#tpu.dimension_semantics<parallel>, #tpu.dimension_semantics<parallel>, #tpu.dimension_semantics<arbitrary>], iteration_bounds = array<i64: 1, 1, 1>, scalar_prefetch = 0 : i64, scratch_operands = 1 : i64, tpu.core_type = #tpu.core_type<tc>, window_params = [{transform_indices = @transform_0, window_bounds = array<i64: 512, 256>}, {transform_indices = @transform_1, window_bounds = array<i64: 256, 128>}, {transform_indices = @transform_2, window_bounds = array<i64: 512, 128>}]} {
    %c0_i32 = arith.constant 0 : i32
    %0 = arith.cmpi eq, %arg2, %c0_i32 : i32
    %1 = arith.extui %0 : i1 to i32
    %c0_i32_0 = arith.constant 0 : i32
    %2 = arith.cmpi ne, %1, %c0_i32_0 : i32
    scf.if %2 {
      %cst_10 = arith.constant 0.000000e+00 : f32
      %12 = vector.broadcast %cst_10 : f32 to vector<512x128xf32>
      %c0_11 = arith.constant 0 : index
      %c0_12 = arith.constant 0 : index
      %13 = vector.load %arg6[%c0_11, %c0_12] : memref<512x128xf32, #tpu.memory_space<vmem>>, vector<512x128xf32>
      tpu.vector_store %arg6[%c0_11, %c0_12], %12 {strides = array<i32>} : memref<512x128xf32, #tpu.memory_space<vmem>>, vector<512x128xf32>,
    } else {
    }
    %c0 = arith.constant 0 : index
    %c0_1 = arith.constant 0 : index
    %3 = vector.load %arg6[%c0, %c0_1] : memref<512x128xf32, #tpu.memory_space<vmem>>, vector<512x128xf32>
    %c0_2 = arith.constant 0 : index
    %c0_3 = arith.constant 0 : index
    %4 = vector.load %arg3[%c0_2, %c0_3] : memref<512x256xbf16, #tpu.memory_space<vmem>>, vector<512x256xbf16>
    %c0_4 = arith.constant 0 : index
    %c0_5 = arith.constant 0 : index
    %5 = vector.load %arg4[%c0_4, %c0_5] : memref<256x128xbf16, #tpu.memory_space<vmem>>, vector<256x128xbf16>
    %cst = arith.constant dense<0.000000e+00> : vector<512x128xf32>
    %6 = tpu.matmul %4, %5, %cst {dimension_numbers = #tpu.dot_dimension_numbers<[1], [0], [0], [1], [0, 0, 1, 1], [], []>} : vector<512x256xbf16>, vector<256x128xbf16>, vector<512x128xf32> -> vector<512x128xf32>
    %7 = arith.addf %3, %6 : vector<512x128xf32>
    %c0_6 = arith.constant 0 : index
    %c0_7 = arith.constant 0 : index
    %8 = vector.load %arg6[%c0_6, %c0_7] : memref<512x128xf32, #tpu.memory_space<vmem>>, vector<512x128xf32>
    tpu.vector_store %arg6[%c0_6, %c0_7], %7 {strides = array<i32>} : memref<512x128xf32, #tpu.memory_space<vmem>>, vector<512x128xf32>,
    %c0_i32_8 = arith.constant 0 : i32
    %9 = arith.cmpi eq, %arg2, %c0_i32_8 : i32
    %10 = arith.extui %9 : i1 to i32
    %c0_i32_9 = arith.constant 0 : i32
    %11 = arith.cmpi ne, %10, %c0_i32_9 : i32
    scf.if %11 {
      %c0_10 = arith.constant 0 : index
      %c0_11 = arith.constant 0 : index
      %12 = vector.load %arg6[%c0_10, %c0_11] : memref<512x128xf32, #tpu.memory_space<vmem>>, vector<512x128xf32>
      %cst_12 = arith.constant 0.000000e+00 : f32
      %13 = vector.broadcast %cst_12 : f32 to vector<512x128xf32>
      %14 = arith.cmpf oge, %12, %13 : vector<512x128xf32>
      %cst_13 = arith.constant 2.000000e-01 : f32
      %15 = vector.broadcast %cst_13 : f32 to vector<512x128xf32>
      %16 = arith.mulf %15, %12 : vector<512x128xf32>
      %17 = arith.select %14, %12, %16 : vector<512x128xi1>, vector<512x128xf32>
      %18 = arith.truncf %17 : vector<512x128xf32> to vector<512x128xbf16>
      %c0_14 = arith.constant 0 : index
      %c0_15 = arith.constant 0 : index
      %19 = vector.load %arg5[%c0_14, %c0_15] : memref<512x128xbf16, #tpu.memory_space<vmem>>, vector<512x128xbf16>
      tpu.vector_store %arg5[%c0_14, %c0_15], %18 {strides = array<i32>} : memref<512x128xbf16, #tpu.memory_space<vmem>>, vector<512x128xbf16>,
    } else {
    }
    return
  }
  func.func @transform_0(%arg0: i32, %arg1: i32, %arg2: i32) -> (i32, i32) {
    %c0_i32 = arith.constant 0 : i32
    return %arg0, %arg2 : i32, i32
  }
  func.func @transform_1(%arg0: i32, %arg1: i32, %arg2: i32) -> (i32, i32) {
    %c0_i32 = arith.constant 0 : i32
    return %arg2, %arg1 : i32, i32
  }
  func.func @transform_2(%arg0: i32, %arg1: i32, %arg2: i32) -> (i32, i32) {
    %c0_i32 = arith.constant 0 : i32
    return %arg0, %arg1 : i32, i32
  }
}

module attributes {stable_mosaic.version = 11 : i64} {
  func.func @_matmul_act_kernel(%arg0: i32, %arg1: i32, %arg2: i32, %arg3: memref<128x512xbf16, #tpu.memory_space<vmem>>, %arg4: memref<512x128xbf16, #tpu.memory_space<vmem>>, %arg5: memref<128x128xbf16, #tpu.memory_space<vmem>>, %arg6: memref<128x128xf32, #tpu.memory_space<vmem>>) attributes {dimension_semantics = [#tpu.dimension_semantics<parallel>, #tpu.dimension_semantics<parallel>, #tpu.dimension_semantics<arbitrary>], iteration_bounds = array<i64: 1, 1, 1>, scalar_prefetch = 0 : i64, scratch_operands = 1 : i64, tpu.core_type = #tpu.core_type<tc>, window_params = [{transform_indices = @transform_0, window_bounds = array<i64: 128, 512>}, {transform_indices = @transform_1, window_bounds = array<i64: 512, 128>}, {transform_indices = @transform_2, window_bounds = array<i64: 128, 128>}]} {
    %c0_i32 = arith.constant 0 : i32
    %0 = arith.cmpi eq, %arg2, %c0_i32 : i32
    %1 = arith.extui %0 : i1 to i32
    %c0_i32_0 = arith.constant 0 : i32
    %2 = arith.cmpi ne, %1, %c0_i32_0 : i32
    scf.if %2 {
      %cst_10 = arith.constant 0.000000e+00 : f32
      %12 = vector.broadcast %cst_10 : f32 to vector<128x128xf32>
      %c0_11 = arith.constant 0 : index
      %c0_12 = arith.constant 0 : index
      %13 = vector.load %arg6[%c0_11, %c0_12] : memref<128x128xf32, #tpu.memory_space<vmem>>, vector<128x128xf32>
      tpu.vector_store %arg6[%c0_11, %c0_12], %12 {strides = array<i32>} : memref<128x128xf32, #tpu.memory_space<vmem>>, vector<128x128xf32>,
    } else {
    }
    %c0 = arith.constant 0 : index
    %c0_1 = arith.constant 0 : index
    %3 = vector.load %arg6[%c0, %c0_1] : memref<128x128xf32, #tpu.memory_space<vmem>>, vector<128x128xf32>
    %c0_2 = arith.constant 0 : index
    %c0_3 = arith.constant 0 : index
    %4 = vector.load %arg3[%c0_2, %c0_3] : memref<128x512xbf16, #tpu.memory_space<vmem>>, vector<128x512xbf16>
    %c0_4 = arith.constant 0 : index
    %c0_5 = arith.constant 0 : index
    %5 = vector.load %arg4[%c0_4, %c0_5] : memref<512x128xbf16, #tpu.memory_space<vmem>>, vector<512x128xbf16>
    %cst = arith.constant dense<0.000000e+00> : vector<128x128xf32>
    %6 = tpu.matmul %4, %5, %cst {dimension_numbers = #tpu.dot_dimension_numbers<[1], [0], [0], [1], [0, 0, 1, 1], [], []>} : vector<128x512xbf16>, vector<512x128xbf16>, vector<128x128xf32> -> vector<128x128xf32>
    %7 = arith.addf %3, %6 : vector<128x128xf32>
    %c0_6 = arith.constant 0 : index
    %c0_7 = arith.constant 0 : index
    %8 = vector.load %arg6[%c0_6, %c0_7] : memref<128x128xf32, #tpu.memory_space<vmem>>, vector<128x128xf32>
    tpu.vector_store %arg6[%c0_6, %c0_7], %7 {strides = array<i32>} : memref<128x128xf32, #tpu.memory_space<vmem>>, vector<128x128xf32>,
    %c0_i32_8 = arith.constant 0 : i32
    %9 = arith.cmpi eq, %arg2, %c0_i32_8 : i32
    %10 = arith.extui %9 : i1 to i32
    %c0_i32_9 = arith.constant 0 : i32
    %11 = arith.cmpi ne, %10, %c0_i32_9 : i32
    scf.if %11 {
      %c0_10 = arith.constant 0 : index
      %c0_11 = arith.constant 0 : index
      %12 = vector.load %arg6[%c0_10, %c0_11] : memref<128x128xf32, #tpu.memory_space<vmem>>, vector<128x128xf32>
      %cst_12 = arith.constant 0.000000e+00 : f32
      %13 = vector.broadcast %cst_12 : f32 to vector<128x128xf32>
      %14 = arith.cmpf oge, %12, %13 : vector<128x128xf32>
      %cst_13 = arith.constant 2.000000e-01 : f32
      %15 = vector.broadcast %cst_13 : f32 to vector<128x128xf32>
      %16 = arith.mulf %15, %12 : vector<128x128xf32>
      %17 = arith.select %14, %12, %16 : vector<128x128xi1>, vector<128x128xf32>
      %18 = arith.truncf %17 : vector<128x128xf32> to vector<128x128xbf16>
      %c0_14 = arith.constant 0 : index
      %c0_15 = arith.constant 0 : index
      %19 = vector.load %arg5[%c0_14, %c0_15] : memref<128x128xbf16, #tpu.memory_space<vmem>>, vector<128x128xbf16>
      tpu.vector_store %arg5[%c0_14, %c0_15], %18 {strides = array<i32>} : memref<128x128xbf16, #tpu.memory_space<vmem>>, vector<128x128xbf16>,
    } else {
    }
    return
  }
  func.func @transform_0(%arg0: i32, %arg1: i32, %arg2: i32) -> (i32, i32) {
    %c0_i32 = arith.constant 0 : i32
    return %arg0, %arg2 : i32, i32
  }
  func.func @transform_1(%arg0: i32, %arg1: i32, %arg2: i32) -> (i32, i32) {
    %c0_i32 = arith.constant 0 : i32
    return %arg2, %arg1 : i32, i32
  }
  func.func @transform_2(%arg0: i32, %arg1: i32, %arg2: i32) -> (i32, i32) {
    %c0_i32 = arith.constant 0 : i32
    return %arg0, %arg1 : i32, i32
  }
}

module attributes {stable_mosaic.version = 11 : i64} {
  func.func @_matmul_act_kernel(%arg0: i32, %arg1: i32, %arg2: i32, %arg3: memref<32x1024xbf16, #tpu.memory_space<vmem>>, %arg4: memref<1024x128xbf16, #tpu.memory_space<vmem>>, %arg5: memref<32x128xbf16, #tpu.memory_space<vmem>>, %arg6: memref<32x128xf32, #tpu.memory_space<vmem>>) attributes {dimension_semantics = [#tpu.dimension_semantics<parallel>, #tpu.dimension_semantics<parallel>, #tpu.dimension_semantics<arbitrary>], iteration_bounds = array<i64: 1, 1, 1>, scalar_prefetch = 0 : i64, scratch_operands = 1 : i64, tpu.core_type = #tpu.core_type<tc>, window_params = [{transform_indices = @transform_0, window_bounds = array<i64: 32, 1024>}, {transform_indices = @transform_1, window_bounds = array<i64: 1024, 128>}, {transform_indices = @transform_2, window_bounds = array<i64: 32, 128>}]} {
    %c0_i32 = arith.constant 0 : i32
    %0 = arith.cmpi eq, %arg2, %c0_i32 : i32
    %1 = arith.extui %0 : i1 to i32
    %c0_i32_0 = arith.constant 0 : i32
    %2 = arith.cmpi ne, %1, %c0_i32_0 : i32
    scf.if %2 {
      %cst_10 = arith.constant 0.000000e+00 : f32
      %12 = vector.broadcast %cst_10 : f32 to vector<32x128xf32>
      %c0_11 = arith.constant 0 : index
      %c0_12 = arith.constant 0 : index
      %13 = vector.load %arg6[%c0_11, %c0_12] : memref<32x128xf32, #tpu.memory_space<vmem>>, vector<32x128xf32>
      tpu.vector_store %arg6[%c0_11, %c0_12], %12 {strides = array<i32>} : memref<32x128xf32, #tpu.memory_space<vmem>>, vector<32x128xf32>,
    } else {
    }
    %c0 = arith.constant 0 : index
    %c0_1 = arith.constant 0 : index
    %3 = vector.load %arg6[%c0, %c0_1] : memref<32x128xf32, #tpu.memory_space<vmem>>, vector<32x128xf32>
    %c0_2 = arith.constant 0 : index
    %c0_3 = arith.constant 0 : index
    %4 = vector.load %arg3[%c0_2, %c0_3] : memref<32x1024xbf16, #tpu.memory_space<vmem>>, vector<32x1024xbf16>
    %c0_4 = arith.constant 0 : index
    %c0_5 = arith.constant 0 : index
    %5 = vector.load %arg4[%c0_4, %c0_5] : memref<1024x128xbf16, #tpu.memory_space<vmem>>, vector<1024x128xbf16>
    %cst = arith.constant dense<0.000000e+00> : vector<32x128xf32>
    %6 = tpu.matmul %4, %5, %cst {dimension_numbers = #tpu.dot_dimension_numbers<[1], [0], [0], [1], [0, 0, 1, 1], [], []>} : vector<32x1024xbf16>, vector<1024x128xbf16>, vector<32x128xf32> -> vector<32x128xf32>
    %7 = arith.addf %3, %6 : vector<32x128xf32>
    %c0_6 = arith.constant 0 : index
    %c0_7 = arith.constant 0 : index
    %8 = vector.load %arg6[%c0_6, %c0_7] : memref<32x128xf32, #tpu.memory_space<vmem>>, vector<32x128xf32>
    tpu.vector_store %arg6[%c0_6, %c0_7], %7 {strides = array<i32>} : memref<32x128xf32, #tpu.memory_space<vmem>>, vector<32x128xf32>,
    %c0_i32_8 = arith.constant 0 : i32
    %9 = arith.cmpi eq, %arg2, %c0_i32_8 : i32
    %10 = arith.extui %9 : i1 to i32
    %c0_i32_9 = arith.constant 0 : i32
    %11 = arith.cmpi ne, %10, %c0_i32_9 : i32
    scf.if %11 {
      %c0_10 = arith.constant 0 : index
      %c0_11 = arith.constant 0 : index
      %12 = vector.load %arg6[%c0_10, %c0_11] : memref<32x128xf32, #tpu.memory_space<vmem>>, vector<32x128xf32>
      %cst_12 = arith.constant 0.000000e+00 : f32
      %13 = vector.broadcast %cst_12 : f32 to vector<32x128xf32>
      %14 = arith.cmpf oge, %12, %13 : vector<32x128xf32>
      %cst_13 = arith.constant 2.000000e-01 : f32
      %15 = vector.broadcast %cst_13 : f32 to vector<32x128xf32>
      %16 = arith.mulf %15, %12 : vector<32x128xf32>
      %17 = arith.select %14, %12, %16 : vector<32x128xi1>, vector<32x128xf32>
      %18 = arith.truncf %17 : vector<32x128xf32> to vector<32x128xbf16>
      %c0_14 = arith.constant 0 : index
      %c0_15 = arith.constant 0 : index
      %19 = vector.load %arg5[%c0_14, %c0_15] : memref<32x128xbf16, #tpu.memory_space<vmem>>, vector<32x128xbf16>
      tpu.vector_store %arg5[%c0_14, %c0_15], %18 {strides = array<i32>} : memref<32x128xbf16, #tpu.memory_space<vmem>>, vector<32x128xbf16>,
    } else {
    }
    return
  }
  func.func @transform_0(%arg0: i32, %arg1: i32, %arg2: i32) -> (i32, i32) {
    %c0_i32 = arith.constant 0 : i32
    return %arg0, %arg2 : i32, i32
  }
  func.func @transform_1(%arg0: i32, %arg1: i32, %arg2: i32) -> (i32, i32) {
    %c0_i32 = arith.constant 0 : i32
    return %arg2, %arg1 : i32, i32
  }
  func.func @transform_2(%arg0: i32, %arg1: i32, %arg2: i32) -> (i32, i32) {
    %c0_i32 = arith.constant 0 : i32
    return %arg0, %arg1 : i32, i32
  }
}

</mosaic_0001>

<bundles_post_ra>
// kernel: _forward.4
= control target key start
LH: loop header
LB: loop body
LE: loop exit
PB: predicated region body
PF: predicated region fallthrough
CT: control target
= control target key end

     0   :  { %7 = vsyncpa [#allocation4], 0  ;;  %s4965_s0 = inlined_call_operand.hbm [shape: bf16[2048,48], index: 0, kind: input, shape index: {}]   ;;  %s4966_s1 = inlined_call_operand.hbm [shape: bf16[48,128], index: 1, kind: input, shape index: {}]   ;;  %s4967_s2 = inlined_call_operand.hbm [shape: bf16[2048,128], index: 2, kind: output, shape index: {}]  }
   0x1   :  { %9 = vsyncpa [#allocation4 + $0x1], 0 }
   0x2   :  { %10 = vsyncpa [#allocation7], 0 }
   0x3   :  { %11 = vsyncpa [#allocation5], 0 }
   0x4   :  { %13 = vsyncpa [#allocation5 + $0x1], 0  ;;  %s4522_s9 = smov 0   ;;  %s4524_s10 = smov 0  }
   0x5   :  { %s4526_s11 = smov 0   ;;  %s4528_s12 = smov 0  }
   0x6   :  { %s4530_s13 = smov 0   ;;  %s4532_s14 = smov 0  }
   0x7 LB: > { %s3214_s15 = sadd.s32 4294967295, %s4498_s14   ;;  %s3215_s16 = sadd.s32 4294967294, %s4498_s14   ;;  %s4498_s14 = sphi %s4532_s14, %s19_s14   ;;  %s4494_s13 = sphi %s4530_s13, %s4991_s13   ;;  %s4490_s12 = sphi %s4528_s12, %s4990_s12   ;;  %s4486_s11 = sphi %s4526_s11, %s4989_s11   ;;  %s4482_s10 = sphi %s4524_s10, %s4988_s10   ;;  %s4478_s9 = sphi %s4522_s9, %s4987_s9  }
   0x8   : > { %p60_p0 = scmp.ne.s32.totalorder %s4482_s10, %s4478_s9  ;;  %p4556_p1 = scmp.eq.s32.totalorder %s3214_s15, 0 }
   0x9   : > { %p4560_p2 = scmp.eq.s32.totalorder %s3214_s15, 1  ;;  %p120_p3 = scmp.eq.s32.totalorder %s3215_s16, 1 }
   0xa   : > { %s4972_s17 = scalar_select %p4556_p1, 1, 0 }
   0xb   : > { %s4973_s18 = scalar_select %p4560_p2, 1, 0 }
   0xc   : > { %p4566_p4 = por %p4556_p1, %p60_p0  ;;  %p3216_p5 = scmp.ge.s32.totalorder %s4498_s14, 1 }
   0xd   : > { %p4571_p6 = por %p120_p3, %p60_p0  ;;  %p127_p7 = scmp.lt.s32.totalorder %s4498_s14, 3 }
   0xe   : > { %s4974_s19 = scalar_select %p4566_p4, 1, 0 }
   0xf   : > { %s4975_s20 = scalar_select %p4571_p6, 1, 0 }
  0x10   : > { %p4576_p8 = pnand %p3216_p5, %p127_p7  ;;  %s4500_s22 = smov [#allocation6]  }
  0x11   : > { %s143_s23 = sshll.u32 %s4500_s22, 4  ;;  %s38_s25 = sadd.s32 1, %s4494_s13  ;;  %s144_s23 = int_to_ptr.vmem [resolvable:$true] %s143_s23 }
  0x12   : > { %s4976_s21 = scalar_select %p4576_p8, 1, 0 }
  0x13   : > { %p4218_p9 = pneg %p4576_p8  ;;  %s4354_s28 = scalar_lea.hbm %s4966_s1, 384 }
  0x14   : > { %p4355_p12 = scmp.ne.s32.totalorder %s4966_s1, %s4354_s28  ;;  %p4361_p5 = scmp.lt.u32.totalorder %s4354_s28, %s4966_s1 }
  0x15   : > { %p4585_p11 = pnand %p4218_p9, %p4556_p1 }
  0x17   : > { %p4356_p13 = pneg %p4585_p11 }
  0x19   : > { %p4357_p0 = pnand %p4356_p13, %p4355_p12 }
  0x1b   : > { %p4358_p3 = pneg %p4357_p0 }
  0x1d   : > { %p4363_p7 = pnand %p4361_p5, %p4358_p3 }
  0x1f   : > { %4366 = shalt.err (!%p4363_p7)
}
  0x20   : > { %s4367_s5 = scalar_lea.vmem %s144_s23, 384  ;;  %p4375_p1 = scmp.lt.s32.totalorder %s144_s23, %s144_s23 }
  0x21   : > { %p4368_p9 = scmp.ne.s32.totalorder %s144_s23, %s4367_s5  ;;  %p4376_p4 = scmp.lt.s32.totalorder %s4367_s5, %s4367_s5 }
  0x23   : > { %p4370_p10 = pnand %p4368_p9, %p4356_p13  ;;  %p4377_p8 = por %p4376_p4, %p4375_p1 }
  0x25   : > { %p4371_p6 = pneg %p4370_p10 }
  0x27   : > { %p4378_p2 = pnand %p4377_p8, %p4371_p6 }
  0x29   : > { %4381 = shalt.err (!%p4378_p2)
}
  0x2a   : > { %s4501_s6 = smov 64   ;;  %s4502_s7 = smov 4  }
  0x2b   : > { %4221 = dma.hbm_to_vmem [thread:$0]  (!%p4585_p11), %s4966_s1, 384, %s144_s23, [#allocation7], %s4501_s6, %s4501_s6, %s4502_s7  }
  0x2c   : > { %p40_p1 = scmp.ge.s32.totalorder %s38_s25, 2  ;;  %s47_s16 = sadd.s32 1, %s4486_s11 }
  0x2d   : > { %p54_p2 = scmp.ne.s32.totalorder %s4486_s11, %s4482_s10  ;;  %p55_p4 = scmp.eq.s32.totalorder %s4498_s14, 0 }
  0x2e   : > { %s4993_s25 = smov (%p40_p1, %s38_s25), 0  ;;  %p4979_p8 = scmp.ne.s32.totalorder %s4973_s18, 0 }
  0x2f   : > { %p4615_p6 = por %p55_p4, %p54_p2  ;;  %s42_s26 = ssub.s32 %s4494_s13, %s4993_s25 }
  0x30   : > { %p4621_p10 = por %p4979_p8, %p54_p2  ;;  %p4231_p12 = scmp.lt.s32.totalorder %s4498_s14, 2 }
  0x31   : > { %p45_p11 = scmp.eq.s32.totalorder %s42_s26, 0  ;;  %s157_s23 = sand.u32 1, %s4486_s11  }
  0x32   : > { %s3219_s27 = sshll.u32 %s157_s23, 9  ;;  %s3490_s29 = sshll.u32 %s4494_s13, 13 }
  0x33   : > { %s4630_s28 = scalar_select %p45_p11, %s4486_s11, %s47_s16  }
  0x34   : > { %s4636_s4 = scalar_lea.hbm %s4965_s0, %s3490_s29  ;;  %s161_s18 = scalar_lea.vmem [#allocation3], %s3219_s27 }
  0x35   : > { %s169_s5 = sshll.u32 %s161_s18, 4  ;;  %p4642_p13 = pnand %p4231_p12, %p4615_p6  ;;  %s4638_s5 = int_to_ptr.vmem [resolvable:$true] %s169_s5 }
  0x36   : > { %s4646_s15 = scalar_lea.sflag [#allocation4], %s157_s23  ;;  %s4382_s16 = scalar_lea.hbm %s4636_s4, 8192 }
  0x37   : > { %p4383_p0 = scmp.ne.s32.totalorder %s4636_s4, %s4382_s16  ;;  %p4384_p3 = pneg %p4642_p13 }
  0x38   : > { %s4387_s22 = scalar_lea.hbm %s4965_s0, 16384  ;;  %p4388_p9 = scmp.lt.u32.totalorder %s4636_s4, %s4965_s0 }
  0x39   : > { %p4385_p5 = pnand %p4384_p3, %p4383_p0  ;;  %p4389_p1 = scmp.lt.u32.totalorder %s4387_s22, %s4382_s16 }
  0x3a   : > { %p4391_p4 = scmp.lt.u32.totalorder %s4382_s16, %s4636_s4 }
  0x3b   : > { %p4386_p7 = pneg %p4385_p5  ;;  %p4390_p2 = por %p4389_p1, %p4388_p9 }
  0x3d   : > { %p4392_p6 = por %p4391_p4, %p4390_p2 }
  0x3f   : > { %p4393_p8 = pnand %p4392_p6, %p4386_p7 }
  0x41   : > { %4396 = shalt.err (!%p4393_p8)
}
  0x42   : > { %s4397_s23 = scalar_lea.vmem %s4638_s5, 8192  ;;  %s4503_s3 = smov [#allocation3]  }
  0x43   : > { %p4398_p12 = scmp.ne.s32.totalorder %s4638_s5, %s4397_s23  ;;  %s4402_s18 = sshll.u32 %s4503_s3, 4  ;;  %s4403_s18 = int_to_ptr.vmem [resolvable:$false] %s4402_s18 }
  0x44   : > { %s4404_s26 = scalar_lea.vmem %s4403_s18, 16384  ;;  %p4405_p5 = scmp.lt.s32.totalorder %s4638_s5, %s4403_s18 }
  0x45   : > { %p4400_p11 = pnand %p4398_p12, %p4384_p3  ;;  %p4406_p9 = scmp.lt.s32.totalorder %s4404_s26, %s4397_s23 }
  0x47   : > { %p4401_p0 = pneg %p4400_p11  ;;  %p4407_p1 = por %p4406_p9, %p4405_p5 }
  0x49   : > { %p4408_p2 = pnand %p4407_p1, %p4401_p0 }
  0x4b   : > { %4411 = shalt.err (!%p4408_p2)
}
  0x4c   : > { %4225 = dma.hbm_to_vmem [thread:$0]  (!%p4642_p13), %s4636_s4, 8192, %s4638_s5, %s4646_s15, %s4501_s6, %s4501_s6, %s4502_s7  }
  0x4d   : > { %p4982_p3 = scmp.ne.s32.totalorder %s4976_s21, 0 }
  0x4e   : > { %s4680_s16 = sand.u32 (!%p4982_p3), 1, %s4482_s10   ;;  %p4983_p7 = scmp.ne.s32.totalorder (!%p4982_p3), %s4974_s19, 0 }
  0x4f   : > { %181 = sbr.rel (%p4982_p3) target bundleno = 460 (0x1cc), region = 28  ;;  %s3223_s27 = sshll.u32 (!%p4982_p3), %s4680_s16, 9 }
  0x50   : > { %s184_s22 = scalar_lea.sflag (!%p4982_p3), [#allocation4], %s4680_s16  ;;  %s4686_s8 = scalar_lea.vmem (!%p4982_p3), [#allocation3], %s3223_s27 }
  0x56   : > { %4465 = dma.done.wait (%p4983_p7), %s184_s22, 8192  }
  0x57   : > { %4467 = vsyncadd (%p4983_p7), %s184_s22, 4294959104  ;;  %p4984_p13 = scmp.ne.s32.totalorder %s4972_s17, 0 }
  0x59   : > { %4469 = dma.done.wait (%p4984_p13), [#allocation7], 384  }
  0x5a   : > { %4471 = vsyncadd (%p4984_p13), [#allocation7], 4294966912  ;;  %v4287_v0 = vld [vmem:[#allocation6] sm:$0xff]   ;;  %v4288_v1 = vld [vmem:[#allocation6 + $0x8] sm:$0xff]   ;;  %vm948_vm0 = vcmask 392192   ;;  %s4826_s17 = scalar_lea.vmem [#allocation8], %s3223_s27 }
  0x5b   : > { %4070 = vmatprep.subr.bf16.mxu0 %v4287_v0  ;;  %4204 = vmatprep.subr.bf16.mxu1 %v4287_v0  ;;  %v4289_v2 = vld [vmem:[#allocation6 + $0x10] sm:$0xff]   ;;  %v4290_v3 = vld [vmem:[%s4686_s8] sm:$0xff]   ;;  %v4292_v5 = vld [vmem:[%s4686_s8 + $0x8] sm:$0xff]   ;;  %s3619_s19 = sshll.u32 %s4490_s12, 13  ;;  %s3112_s21 = sshll.u32 %s4826_s17, 4  ;;  %s4912_s21 = int_to_ptr.vmem [resolvable:$true] %s3112_s21 }
  0x5c   : > { %4071 = vmatpush3.bf16.msra.mxu0 %v4287_v0  ;;  %4207 = vmatpush3.bf16.msra.mxu1 %v4287_v0  ;;  %v4291_v4 = vld [vmem:[%s4686_s8 + $0x100] sm:$0xff]   ;;  %v4293_v6 = vld [vmem:[%s4686_s8 + $0x108] sm:$0xff]   ;;  %v4294_v7 = vld [vmem:[%s4686_s8 + $0x10] sm:$0xff]   ;;  %s4910_s4 = scalar_lea.hbm %s4967_s2, %s3619_s19  ;;  %s3098_s5 = scalar_lea.sflag [#allocation5], %s4680_s16 }
  0x5d   : > { %4072 = vmatprep.subr.bf16.mxu0 %v4288_v1  ;;  %4205 = vmatprep.subr.bf16.mxu1 %v4288_v1  ;;  %v4295_v8 = vld [vmem:[%s4686_s8 + $0x110] sm:$0xff]   ;;  %v4296_v9 = vld [vmem:[%s4686_s8 + $0x18] sm:$0xff]   ;;  %v4298_v11 = vld [vmem:[%s4686_s8 + $0x20] sm:$0xff]   ;;  %s4412_s15 = scalar_lea.vmem %s4912_s21, 8192  ;;  %s4504_s12 = smov [#allocation8]  }
  0x5e   : > { %4076 = vmatprep.mubr.msk.bf16.mxu0 %vm948_vm0, %v4290_v3  ;;  %4140 = vmatprep.mubr.msk.bf16.mxu1 %vm948_vm0, %v4291_v4  ;;  %v4297_v10 = vld [vmem:[%s4686_s8 + $0x118] sm:$0xff]   ;;  %v4299_v12 = vld [vmem:[%s4686_s8 + $0x120] sm:$0xff]   ;;  %v4300_v13 = vld [vmem:[%s4686_s8 + $0x28] sm:$0xff]   ;;  %p4413_p4 = scmp.ne.s32.totalorder %s4912_s21, %s4412_s15  ;;  %s4416_s29 = sshll.u32 %s4504_s12, 4  ;;  %s4417_s29 = int_to_ptr.vmem [resolvable:$false] %s4416_s29 }
  0x5f   : > { %v4301_v14 = vld [vmem:[%s4686_s8 + $0x128] sm:$0xff]   ;;  %v4302_v15 = vld [vmem:[%s4686_s8 + $0x30] sm:$0xff]   ;;  %v4304_v17 = vld [vmem:[%s4686_s8 + $0x38] sm:$0xff]   ;;  %s4418_s30 = scalar_lea.vmem %s4417_s29, 16384  ;;  %p4419_p12 = scmp.lt.s32.totalorder %s4912_s21, %s4417_s29 }
  0x60   : > { %4073 = vmatpush3.bf16.msra.mxu0 %v4288_v1  ;;  %4208 = vmatpush3.bf16.msra.mxu1 %v4288_v1  ;;  %v4303_v16 = vld [vmem:[%s4686_s8 + $0x130] sm:$0xff]   ;;  %v4305_v18 = vld [vmem:[%s4686_s8 + $0x138] sm:$0xff]   ;;  %v4306_v19 = vld [vmem:[%s4686_s8 + $0x40] sm:$0xff]   ;;  %p4414_p6 = pnand %p4413_p4, %p4621_p10  ;;  %p4420_p11 = scmp.lt.s32.totalorder %s4418_s30, %s4412_s15 }
  0x61   : > { %4074 = vmatprep.subr.bf16.mxu0 %v4289_v2  ;;  %4206 = vmatprep.subr.bf16.mxu1 %v4289_v2  ;;  %v4307_v20 = vld [vmem:[%s4686_s8 + $0x140] sm:$0xff]   ;;  %v4308_v21 = vld [vmem:[%s4686_s8 + $0x48] sm:$0xff]   ;;  %v4310_v23 = vld [vmem:[%s4686_s8 + $0x50] sm:$0xff]  }
  0x62   : > { %v4309_v22 = vld [vmem:[%s4686_s8 + $0x148] sm:$0xff]   ;;  %v4311_v24 = vld [vmem:[%s4686_s8 + $0x150] sm:$0xff]   ;;  %v4312_v25 = vld [vmem:[%s4686_s8 + $0x58] sm:$0xff]   ;;  %p4415_p8 = pneg %p4414_p6  ;;  %p4421_p0 = por %p4420_p11, %p4419_p12 }
  0x63   : > { %v4313_v26 = vld [vmem:[%s4686_s8 + $0x158] sm:$0xff]   ;;  %v4314_v27 = vld [vmem:[%s4686_s8 + $0x60] sm:$0xff]   ;;  %v4316_v29 = vld [vmem:[%s4686_s8 + $0x68] sm:$0xff]  }
  0x64   : > { %4075 = vmatpush3.bf16.msra.mxu0 %v4289_v2  ;;  %4209 = vmatpush3.bf16.msra.mxu1 %v4289_v2  ;;  %v4315_v28 = vld [vmem:[%s4686_s8 + $0x160] sm:$0xff]   ;;  %v4317_v30 = vld [vmem:[%s4686_s8 + $0x168] sm:$0xff]   ;;  %v4318_v31 = vld [vmem:[%s4686_s8 + $0x70] sm:$0xff]   ;;  %p4422_p5 = pnand %p4421_p0, %p4415_p8 }
  0x65   : > { %v4319_v32 = vld [vmem:[%s4686_s8 + $0x170] sm:$0xff]   ;;  %v4320_v33 = vld [vmem:[%s4686_s8 + $0x78] sm:$0xff]   ;;  %v4322_v35 = vld [vmem:[%s4686_s8 + $0x80] sm:$0xff]  }
  0x66   : > { %v4321_v34 = vld [vmem:[%s4686_s8 + $0x178] sm:$0xff]   ;;  %v4323_v36 = vld [vmem:[%s4686_s8 + $0x180] sm:$0xff]   ;;  %v4324_v37 = vld [vmem:[%s4686_s8 + $0x88] sm:$0xff]  }
  0x67   : > { %4077 = vmatmul.mubr.msk.bf16.vlgmr.msra.gmra.mrb[0].mxu0 %vm948_vm0, %v4292_v5  ;;  %4141 = vmatmul.mubr.msk.bf16.vlgmr.msra.gmra.mrb[0].mxu1 %vm948_vm0, %v4293_v6  ;;  %v4325_v38 = vld [vmem:[%s4686_s8 + $0x188] sm:$0xff]   ;;  %v4326_v39 = vld [vmem:[%s4686_s8 + $0x90] sm:$0xff]   ;;  %v4328_v41 = vld [vmem:[%s4686_s8 + $0x98] sm:$0xff]  }
  0x68   : > { %4080 = vmatprep.mubr.msk.bf16.mxu0 %vm948_vm0, %v4294_v7  ;;  %4144 = vmatprep.mubr.msk.bf16.mxu1 %vm948_vm0, %v4295_v8  ;;  %v4327_v40 = vld [vmem:[%s4686_s8 + $0x190] sm:$0xff]   ;;  %v4329_v42 = vld [vmem:[%s4686_s8 + $0x198] sm:$0xff]   ;;  %v4330_v43 = vld [vmem:[%s4686_s8 + $0xa0] sm:$0xff]  }
  0x69   : > { %v4331_v44 = vld [vmem:[%s4686_s8 + $0x1a0] sm:$0xff]   ;;  %v4332_v45 = vld [vmem:[%s4686_s8 + $0xa8] sm:$0xff]   ;;  %v4334_v47 = vld [vmem:[%s4686_s8 + $0xb0] sm:$0xff]  }
  0x6a   : > { %v4333_v46 = vld [vmem:[%s4686_s8 + $0x1a8] sm:$0xff]   ;;  %v4335_v48 = vld [vmem:[%s4686_s8 + $0x1b0] sm:$0xff]   ;;  %v4336_v49 = vld [vmem:[%s4686_s8 + $0xb8] sm:$0xff]  }
  0x6b   : > { %v4337_v50 = vld [vmem:[%s4686_s8 + $0x1b8] sm:$0xff]   ;;  %v4338_v51 = vld [vmem:[%s4686_s8 + $0xc0] sm:$0xff]   ;;  %v4340_v53 = vld [vmem:[%s4686_s8 + $0xc8] sm:$0xff]  }
  0x6c   : > { %v4339_v52 = vld [vmem:[%s4686_s8 + $0x1c0] sm:$0xff]   ;;  %v4341_v54 = vld [vmem:[%s4686_s8 + $0x1c8] sm:$0xff]   ;;  %v4342_v55 = vld [vmem:[%s4686_s8 + $0xd0] sm:$0xff]  }
  0x6d   : > { %v4343_v56 = vld [vmem:[%s4686_s8 + $0x1d0] sm:$0xff]   ;;  %v4344_v57 = vld [vmem:[%s4686_s8 + $0xd8] sm:$0xff]   ;;  %v4346_v59 = vld [vmem:[%s4686_s8 + $0xe0] sm:$0xff]  }
  0x6e   : > { %v4345_v58 = vld [vmem:[%s4686_s8 + $0x1d8] sm:$0xff]   ;;  %v4347_v60 = vld [vmem:[%s4686_s8 + $0x1e0] sm:$0xff]   ;;  %v4348_v61 = vld [vmem:[%s4686_s8 + $0xe8] sm:$0xff]  }
  0x6f   : > { %4081 = vmatmul.mubr.msk.bf16.gmra.mrb[4].mxu0 %vm948_vm0, %v4296_v9  ;;  %4145 = vmatmul.mubr.msk.bf16.gmra.mrb[4].mxu1 %vm948_vm0, %v4297_v10  ;;  %v4349_v62 = vld [vmem:[%s4686_s8 + $0x1e8] sm:$0xff]   ;;  %v4350_v63 = vld [vmem:[%s4686_s8 + $0xf0] sm:$0xff]   ;;  %v4352_v1 = vld [vmem:[%s4686_s8 + $0xf8] sm:$0xff]  }
  0x70   : > { %4084 = vmatprep.mubr.msk.bf16.mxu0 %vm948_vm0, %v4298_v11  ;;  %4148 = vmatprep.mubr.msk.bf16.mxu1 %vm948_vm0, %v4299_v12  ;;  %v4351_v0 = vld [vmem:[%s4686_s8 + $0x1f0] sm:$0xff]   ;;  %v4353_v2 = vld [vmem:[%s4686_s8 + $0x1f8] sm:$0xff]  }
  0x77   : > { %4085 = vmatmul.mubr.msk.bf16.gmra.mrb[8].mxu0 %vm948_vm0, %v4300_v13  ;;  %4149 = vmatmul.mubr.msk.bf16.gmra.mrb[8].mxu1 %vm948_vm0, %v4301_v14 }
  0x78   : > { %4088 = vmatprep.mubr.msk.bf16.mxu0 %vm948_vm0, %v4302_v15  ;;  %4152 = vmatprep.mubr.msk.bf16.mxu1 %vm948_vm0, %v4303_v16 }
  0x7f   : > { %4089 = vmatmul.mubr.msk.bf16.gmra.mrb[12].mxu0 %vm948_vm0, %v4304_v17  ;;  %4153 = vmatmul.mubr.msk.bf16.gmra.mrb[12].mxu1 %vm948_vm0, %v4305_v18 }
  0x80   : > { %4092 = vmatprep.mubr.msk.bf16.mxu0 %vm948_vm0, %v4306_v19  ;;  %4156 = vmatprep.mubr.msk.bf16.mxu1 %vm948_vm0, %v4307_v20 }
  0x87   : > { %4093 = vmatmul.mubr.msk.bf16.gmra.mrb[16].mxu0 %vm948_vm0, %v4308_v21  ;;  %4157 = vmatmul.mubr.msk.bf16.gmra.mrb[16].mxu1 %vm948_vm0, %v4309_v22 }
  0x88   : > { %4096 = vmatprep.mubr.msk.bf16.mxu0 %vm948_vm0, %v4310_v23  ;;  %4160 = vmatprep.mubr.msk.bf16.mxu1 %vm948_vm0, %v4311_v24 }
  0x8f   : > { %4097 = vmatmul.mubr.msk.bf16.gmra.mrb[20].mxu0 %vm948_vm0, %v4312_v25  ;;  %4161 = vmatmul.mubr.msk.bf16.gmra.mrb[20].mxu1 %vm948_vm0, %v4313_v26 }
  0x90   : > { %4100 = vmatprep.mubr.msk.bf16.mxu0 %vm948_vm0, %v4314_v27  ;;  %4164 = vmatprep.mubr.msk.bf16.mxu1 %vm948_vm0, %v4315_v28 }
  0x97   : > { %4101 = vmatmul.mubr.msk.bf16.gmra.mrb[24].mxu0 %vm948_vm0, %v4316_v29  ;;  %4165 = vmatmul.mubr.msk.bf16.gmra.mrb[24].mxu1 %vm948_vm0, %v4317_v30 }
  0x98   : > { %4104 = vmatprep.mubr.msk.bf16.mxu0 %vm948_vm0, %v4318_v31  ;;  %4168 = vmatprep.mubr.msk.bf16.mxu1 %vm948_vm0, %v4319_v32 }
  0x9f   : > { %4105 = vmatmul.mubr.msk.bf16.gmra.mrb[28].mxu0 %vm948_vm0, %v4320_v33  ;;  %4169 = vmatmul.mubr.msk.bf16.gmra.mrb[28].mxu1 %vm948_vm0, %v4321_v34 }
  0xa0   : > { %4108 = vmatprep.mubr.msk.bf16.mxu0 %vm948_vm0, %v4322_v35  ;;  %4172 = vmatprep.mubr.msk.bf16.mxu1 %vm948_vm0, %v4323_v36 }
  0xa7   : > { %4109 = vmatmul.mubr.msk.bf16.gmra.mrb[32].mxu0 %vm948_vm0, %v4324_v37  ;;  %4173 = vmatmul.mubr.msk.bf16.gmra.mrb[32].mxu1 %vm948_vm0, %v4325_v38 }
  0xa8   : > { %4112 = vmatprep.mubr.msk.bf16.mxu0 %vm948_vm0, %v4326_v39  ;;  %4176 = vmatprep.mubr.msk.bf16.mxu1 %vm948_vm0, %v4327_v40 }
  0xaf   : > { %4113 = vmatmul.mubr.msk.bf16.gmra.mrb[36].mxu0 %vm948_vm0, %v4328_v41  ;;  %4177 = vmatmul.mubr.msk.bf16.gmra.mrb[36].mxu1 %vm948_vm0, %v4329_v42 }
  0xb0   : > { %4116 = vmatprep.mubr.msk.bf16.mxu0 %vm948_vm0, %v4330_v43  ;;  %4180 = vmatprep.mubr.msk.bf16.mxu1 %vm948_vm0, %v4331_v44 }
  0xb7   : > { %4117 = vmatmul.mubr.msk.bf16.gmra.mrb[40].mxu0 %vm948_vm0, %v4332_v45  ;;  %4181 = vmatmul.mubr.msk.bf16.gmra.mrb[40].mxu1 %vm948_vm0, %v4333_v46 }
  0xb8   : > { %4120 = vmatprep.mubr.msk.bf16.mxu0 %vm948_vm0, %v4334_v47  ;;  %4184 = vmatprep.mubr.msk.bf16.mxu1 %vm948_vm0, %v4335_v48 }
  0xbf   : > { %4121 = vmatmul.mubr.msk.bf16.gmra.mrb[44].mxu0 %vm948_vm0, %v4336_v49  ;;  %4185 = vmatmul.mubr.msk.bf16.gmra.mrb[44].mxu1 %vm948_vm0, %v4337_v50 }
  0xc0   : > { %4124 = vmatprep.mubr.msk.bf16.mxu0 %vm948_vm0, %v4338_v51  ;;  %4188 = vmatprep.mubr.msk.bf16.mxu1 %vm948_vm0, %v4339_v52 }
  0xc7   : > { %4125 = vmatmul.mubr.msk.bf16.gmra.mrb[48].mxu0 %vm948_vm0, %v4340_v53  ;;  %4189 = vmatmul.mubr.msk.bf16.gmra.mrb[48].mxu1 %vm948_vm0, %v4341_v54 }
  0xc8   : > { %4128 = vmatprep.mubr.msk.bf16.mxu0 %vm948_vm0, %v4342_v55  ;;  %4192 = vmatprep.mubr.msk.bf16.mxu1 %vm948_vm0, %v4343_v56 }
  0xcf   : > { %4129 = vmatmul.mubr.msk.bf16.gmra.mrb[52].mxu0 %vm948_vm0, %v4344_v57  ;;  %4193 = vmatmul.mubr.msk.bf16.gmra.mrb[52].mxu1 %vm948_vm0, %v4345_v58 }
  0xd0   : > { %4132 = vmatprep.mubr.msk.bf16.mxu0 %vm948_vm0, %v4346_v59  ;;  %4196 = vmatprep.mubr.msk.bf16.mxu1 %vm948_vm0, %v4347_v60 }
  0xd7   : > { %4133 = vmatmul.mubr.msk.bf16.gmra.mrb[56].mxu0 %vm948_vm0, %v4348_v61  ;;  %4197 = vmatmul.mubr.msk.bf16.gmra.mrb[56].mxu1 %vm948_vm0, %v4349_v62 }
  0xd8   : > { %4136 = vmatprep.mubr.msk.bf16.mxu0 %vm948_vm0, %v4350_v63  ;;  %4200 = vmatprep.mubr.msk.bf16.mxu1 %vm948_vm0, %v4351_v0 }
  0xdf   : > { %4137 = vmatmul.mubr.msk.bf16.gmra.mrb[60].mxu0 %vm948_vm0, %v4352_v1  ;;  %4201 = vmatmul.mubr.msk.bf16.gmra.mrb[60].mxu1 %vm948_vm0, %v4353_v2 }
 0x13a   : > { %v4078_v3 = vpop.f32.mrb[0].mxu0  ;;  %v4142_v4 = vpop.f32.mrb[0].mxu1 }
 0x13b   : > { %vm2075_vm1 = vcmp.ge.f32.partialorder %v4078_v3, 0.0  ;;  %v2203_v5 = vmul.f32 0.2, %v4078_v3  ;;  %v2267_v6 = vmul.f32 0.2, %v4142_v4  ;;  %vm2139_vm2 = vcmp.ge.f32.partialorder %v4142_v4, 0.0 }
 0x13c   : > { %v1175_v7 = vpop.f32.mrb[1].mxu0  ;;  %v1431_v8 = vpop.f32.mrb[1].mxu1 }
 0x13d   : > { %v2201_v9 = vmul.f32 0.2, %v1175_v7  ;;  %v4079_v10 = vpop.f32.mrb[2].mxu0  ;;  %v4143_v11 = vpop.f32.mrb[2].mxu1  ;;  %v2331_v12 = vsel %vm2075_vm1, %v4078_v3, %v2203_v5  ;;  %v2265_v13 = vmul.f32 0.2, %v1431_v8  ;;  %v2395_v15 = vsel %vm2139_vm2, %v4142_v4, %v2267_v6 }
 0x13e   : > { %vm2076_vm3 = vcmp.ge.f32.partialorder %v4079_v10, 0.0  ;;  %v2204_v14 = vmul.f32 0.2, %v4079_v10  ;;  %vm2073_vm4 = vcmp.ge.f32.partialorder %v1175_v7, 0.0  ;;  %vm2140_vm5 = vcmp.ge.f32.partialorder %v4143_v11, 0.0  ;;  %v1178_v17 = vpop.f32.mrb[3].mxu0 }
 0x13f   : > { %v2268_v16 = vmul.f32 0.2, %v4143_v11  ;;  %v1434_v18 = vpop.f32.mrb[3].mxu1  ;;  %vm2137_vm6 = vcmp.ge.f32.partialorder %v1431_v8, 0.0  ;;  %vm2074_vm7 = vcmp.ge.f32.partialorder %v1178_v17, 0.0  ;;  %v2329_v24 = vsel %vm2073_vm4, %v1175_v7, %v2201_v9 }
 0x140   : > { %v2332_v19 = vsel %vm2076_vm3, %v4079_v10, %v2204_v14  ;;  %v2202_v20 = vmul.f32 0.2, %v1178_v17  ;;  %vm2138_vm8 = vcmp.ge.f32.partialorder %v1434_v18, 0.0  ;;  %v2266_v23 = vmul.f32 0.2, %v1434_v18 }
 0x141   : > { %v3628_v21 = vpack.c.bf16 %v2332_v19, %v2331_v12  ;;  %v2396_v22 = vsel %vm2140_vm5, %v4143_v11, %v2268_v16  ;;  %v2393_v29 = vsel %vm2137_vm6, %v1431_v8, %v2265_v13 }
 0x142   : > { %v3788_v25 = vpack.c.bf16 %v2396_v22, %v2395_v15  ;;  %v2330_v26 = vsel %vm2074_vm7, %v1178_v17, %v2202_v20  ;;  %v4082_v27 = vpop.f32.mrb[4].mxu0  ;;  %v4146_v28 = vpop.f32.mrb[4].mxu1  ;;  %v2394_v31 = vsel %vm2138_vm8, %v1434_v18, %v2266_v23 }
 0x143   : > { %3940 = vst [vmem:[%s4826_s17 + $0x8] sm:$0xff] %v3628_v21   ;;  %v3623_v30 = vpack.c.bf16 %v2330_v26, %v2329_v24  ;;  %v2207_v32 = vmul.f32 0.2, %v4082_v27  ;;  %v1191_v33 = vpop.f32.mrb[5].mxu0  ;;  %v1447_v34 = vpop.f32.mrb[5].mxu1  ;;  %v3783_v35 = vpack.c.bf16 %v2394_v31, %v2393_v29  ;;  %vm2079_vm9 = vcmp.ge.f32.partialorder %v4082_v27, 0.0 }
 0x144   : > { %3972 = vst [vmem:[%s4826_s17 + $0x108] sm:$0xff] %v3788_v25   ;;  %v2271_v36 = vmul.f32 0.2, %v4146_v28  ;;  %v4083_v37 = vpop.f32.mrb[6].mxu0  ;;  %v4147_v38 = vpop.f32.mrb[6].mxu1  ;;  %vm2143_vm10 = vcmp.ge.f32.partialorder %v4146_v28, 0.0 }
 0x145   : > { %3624 = vst [vmem:[%s4826_s17] sm:$0xff] %v3623_v30   ;;  %v2205_v39 = vmul.f32 0.2, %v1191_v33  ;;  %v2269_v40 = vmul.f32 0.2, %v1447_v34  ;;  %v1194_v41 = vpop.f32.mrb[7].mxu0  ;;  %3971 = vst [vmem:[%s4826_s17 + $0x100] sm:$0xff] %v3783_v35   ;;  %v2335_v44 = vsel %vm2079_vm9, %v4082_v27, %v2207_v32 }
 0x146   : > { %vm2077_vm11 = vcmp.ge.f32.partialorder %v1191_v33, 0.0  ;;  %vm2080_vm12 = vcmp.ge.f32.partialorder %v4083_v37, 0.0  ;;  %v2208_v42 = vmul.f32 0.2, %v4083_v37  ;;  %vm2144_vm13 = vcmp.ge.f32.partialorder %v4147_v38, 0.0  ;;  %v1450_v43 = vpop.f32.mrb[7].mxu1 }
 0x147   : > { %vm2141_vm14 = vcmp.ge.f32.partialorder %v1447_v34, 0.0  ;;  %v2272_v45 = vmul.f32 0.2, %v4147_v38  ;;  %vm2078_vm15 = vcmp.ge.f32.partialorder %v1194_v41, 0.0  ;;  %v2206_v47 = vmul.f32 0.2, %v1194_v41 }
 0x148   : > { %v2336_v46 = vsel %vm2080_vm12, %v4083_v37, %v2208_v42  ;;  %vm2142_vm0 = vcmp.ge.f32.partialorder %v1450_v43, 0.0  ;;  %v2270_v48 = vmul.f32 0.2, %v1450_v43  ;;  %v2399_v49 = vsel %vm2143_vm10, %v4146_v28, %v2271_v36 }
 0x149   : > { %v2333_v50 = vsel %vm2077_vm11, %v1191_v33, %v2205_v39  ;;  %v3638_v51 = vpack.c.bf16 %v2336_v46, %v2335_v44  ;;  %v2400_v52 = vsel %vm2144_vm13, %v4147_v38, %v2272_v45  ;;  %v2397_v53 = vsel %vm2141_vm14, %v1447_v34, %v2269_v40 }
 0x14a   : > { %v3798_v54 = vpack.c.bf16 %v2400_v52, %v2399_v49  ;;  %v2334_v55 = vsel %vm2078_vm15, %v1194_v41, %v2206_v47  ;;  %v2398_v56 = vsel %vm2142_vm0, %v1450_v43, %v2270_v48  ;;  %v4086_v57 = vpop.f32.mrb[8].mxu0  ;;  %v4150_v58 = vpop.f32.mrb[8].mxu1 }
 0x14b   : > { %3942 = vst [vmem:[%s4826_s17 + $0x18] sm:$0xff] %v3638_v51   ;;  %v3633_v59 = vpack.c.bf16 %v2334_v55, %v2333_v50  ;;  %v3793_v60 = vpack.c.bf16 %v2398_v56, %v2397_v53  ;;  %vm2083_vm1 = vcmp.ge.f32.partialorder %v4086_v57, 0.0  ;;  %v2211_v61 = vmul.f32 0.2, %v4086_v57  ;;  %v1207_v62 = vpop.f32.mrb[9].mxu0  ;;  %v1463_v63 = vpop.f32.mrb[9].mxu1 }
 0x14c   : > { %3974 = vst [vmem:[%s4826_s17 + $0x118] sm:$0xff] %v3798_v54   ;;  %vm2147_vm2 = vcmp.ge.f32.partialorder %v4150_v58, 0.0  ;;  %v2275_v0 = vmul.f32 0.2, %v4150_v58  ;;  %v2209_v1 = vmul.f32 0.2, %v1207_v62 }
 0x14d   : > { %3941 = vst [vmem:[%s4826_s17 + $0x10] sm:$0xff] %v3633_v59   ;;  %3973 = vst [vmem:[%s4826_s17 + $0x110] sm:$0xff] %v3793_v60   ;;  %v2273_v2 = vmul.f32 0.2, %v1463_v63  ;;  %v4087_v3 = vpop.f32.mrb[10].mxu0  ;;  %v4151_v4 = vpop.f32.mrb[10].mxu1  ;;  %v2339_v5 = vsel %vm2083_vm1, %v4086_v57, %v2211_v61 }
 0x14e   : > { %vm2081_vm3 = vcmp.ge.f32.partialorder %v1207_v62, 0.0  ;;  %vm2084_vm4 = vcmp.ge.f32.partialorder %v4087_v3, 0.0  ;;  %v2212_v6 = vmul.f32 0.2, %v4087_v3  ;;  %v1210_v7 = vpop.f32.mrb[11].mxu0  ;;  %v1466_v8 = vpop.f32.mrb[11].mxu1  ;;  %v2403_v13 = vsel %vm2147_vm2, %v4150_v58, %v2275_v0 }
 0x14f   : > { %vm2145_vm5 = vcmp.ge.f32.partialorder %v1463_v63, 0.0  ;;  %vm2148_vm6 = vcmp.ge.f32.partialorder %v4151_v4, 0.0  ;;  %v2276_v9 = vmul.f32 0.2, %v4151_v4  ;;  %vm2082_vm7 = vcmp.ge.f32.partialorder %v1210_v7, 0.0 }
 0x150   : > { %v2340_v10 = vsel %vm2084_vm4, %v4087_v3, %v2212_v6  ;;  %v2210_v11 = vmul.f32 0.2, %v1210_v7  ;;  %vm2146_vm8 = vcmp.ge.f32.partialorder %v1466_v8, 0.0  ;;  %v2274_v12 = vmul.f32 0.2, %v1466_v8 }
 0x151   : > { %v2337_v14 = vsel %vm2081_vm3, %v1207_v62, %v2209_v1  ;;  %v3648_v15 = vpack.c.bf16 %v2340_v10, %v2339_v5  ;;  %v2404_v16 = vsel %vm2148_vm6, %v4151_v4, %v2276_v9  ;;  %v2401_v17 = vsel %vm2145_vm5, %v1463_v63, %v2273_v2 }
 0x152   : > { %v3808_v18 = vpack.c.bf16 %v2404_v16, %v2403_v13  ;;  %v2338_v19 = vsel %vm2082_vm7, %v1210_v7, %v2210_v11  ;;  %v2402_v20 = vsel %vm2146_vm8, %v1466_v8, %v2274_v12  ;;  %v4090_v21 = vpop.f32.mrb[12].mxu0  ;;  %v4154_v22 = vpop.f32.mrb[12].mxu1 }
 0x153   : > { %3944 = vst [vmem:[%s4826_s17 + $0x28] sm:$0xff] %v3648_v15   ;;  %v3643_v23 = vpack.c.bf16 %v2338_v19, %v2337_v14  ;;  %v3803_v24 = vpack.c.bf16 %v2402_v20, %v2401_v17  ;;  %vm2087_vm9 = vcmp.ge.f32.partialorder %v4090_v21, 0.0  ;;  %v2215_v25 = vmul.f32 0.2, %v4090_v21  ;;  %v1223_v26 = vpop.f32.mrb[13].mxu0  ;;  %v1479_v27 = vpop.f32.mrb[13].mxu1 }
 0x154   : > { %3976 = vst [vmem:[%s4826_s17 + $0x128] sm:$0xff] %v3808_v18   ;;  %vm2151_vm10 = vcmp.ge.f32.partialorder %v4154_v22, 0.0  ;;  %v2279_v28 = vmul.f32 0.2, %v4154_v22  ;;  %v2213_v29 = vmul.f32 0.2, %v1223_v26 }
 0x155   : > { %3943 = vst [vmem:[%s4826_s17 + $0x20] sm:$0xff] %v3643_v23   ;;  %3975 = vst [vmem:[%s4826_s17 + $0x120] sm:$0xff] %v3803_v24   ;;  %v2277_v30 = vmul.f32 0.2, %v1479_v27  ;;  %v4091_v31 = vpop.f32.mrb[14].mxu0  ;;  %v4155_v32 = vpop.f32.mrb[14].mxu1  ;;  %v2343_v33 = vsel %vm2087_vm9, %v4090_v21, %v2215_v25 }
 0x156   : > { %vm2085_vm11 = vcmp.ge.f32.partialorder %v1223_v26, 0.0  ;;  %vm2088_vm12 = vcmp.ge.f32.partialorder %v4091_v31, 0.0  ;;  %v2216_v34 = vmul.f32 0.2, %v4091_v31  ;;  %v1226_v35 = vpop.f32.mrb[15].mxu0  ;;  %v1482_v36 = vpop.f32.mrb[15].mxu1  ;;  %v2407_v41 = vsel %vm2151_vm10, %v4154_v22, %v2279_v28 }
 0x157   : > { %vm2149_vm13 = vcmp.ge.f32.partialorder %v1479_v27, 0.0  ;;  %vm2152_vm14 = vcmp.ge.f32.partialorder %v4155_v32, 0.0  ;;  %v2280_v37 = vmul.f32 0.2, %v4155_v32  ;;  %vm2086_vm15 = vcmp.ge.f32.partialorder %v1226_v35, 0.0 }
 0x158   : > { %v2344_v38 = vsel %vm2088_vm12, %v4091_v31, %v2216_v34  ;;  %v2214_v39 = vmul.f32 0.2, %v1226_v35  ;;  %vm2150_vm0 = vcmp.ge.f32.partialorder %v1482_v36, 0.0  ;;  %v2278_v40 = vmul.f32 0.2, %v1482_v36 }
 0x159   : > { %v2341_v42 = vsel %vm2085_vm11, %v1223_v26, %v2213_v29  ;;  %v3658_v43 = vpack.c.bf16 %v2344_v38, %v2343_v33  ;;  %v2408_v44 = vsel %vm2152_vm14, %v4155_v32, %v2280_v37  ;;  %v2405_v45 = vsel %vm2149_vm13, %v1479_v27, %v2277_v30 }
 0x15a   : > { %v3818_v46 = vpack.c.bf16 %v2408_v44, %v2407_v41  ;;  %v2342_v47 = vsel %vm2086_vm15, %v1226_v35, %v2214_v39  ;;  %v2406_v48 = vsel %vm2150_vm0, %v1482_v36, %v2278_v40  ;;  %v4094_v49 = vpop.f32.mrb[16].mxu0  ;;  %v4158_v50 = vpop.f32.mrb[16].mxu1 }
 0x15b   : > { %3946 = vst [vmem:[%s4826_s17 + $0x38] sm:$0xff] %v3658_v43   ;;  %v3653_v51 = vpack.c.bf16 %v2342_v47, %v2341_v42  ;;  %v3813_v52 = vpack.c.bf16 %v2406_v48, %v2405_v45  ;;  %vm2091_vm1 = vcmp.ge.f32.partialorder %v4094_v49, 0.0  ;;  %v2219_v53 = vmul.f32 0.2, %v4094_v49  ;;  %v1239_v54 = vpop.f32.mrb[17].mxu0  ;;  %v1495_v55 = vpop.f32.mrb[17].mxu1 }
 0x15c   : > { %3978 = vst [vmem:[%s4826_s17 + $0x138] sm:$0xff] %v3818_v46   ;;  %vm2155_vm2 = vcmp.ge.f32.partialorder %v4158_v50, 0.0  ;;  %v2283_v56 = vmul.f32 0.2, %v4158_v50  ;;  %v2217_v57 = vmul.f32 0.2, %v1239_v54 }
 0x15d   : > { %3945 = vst [vmem:[%s4826_s17 + $0x30] sm:$0xff] %v3653_v51   ;;  %3977 = vst [vmem:[%s4826_s17 + $0x130] sm:$0xff] %v3813_v52   ;;  %v2281_v58 = vmul.f32 0.2, %v1495_v55  ;;  %v4095_v59 = vpop.f32.mrb[18].mxu0  ;;  %v4159_v60 = vpop.f32.mrb[18].mxu1  ;;  %v2347_v61 = vsel %vm2091_vm1, %v4094_v49, %v2219_v53 }
 0x15e   : > { %vm2089_vm3 = vcmp.ge.f32.partialorder %v1239_v54, 0.0  ;;  %vm2092_vm4 = vcmp.ge.f32.partialorder %v4095_v59, 0.0  ;;  %v2220_v62 = vmul.f32 0.2, %v4095_v59  ;;  %v1242_v63 = vpop.f32.mrb[19].mxu0  ;;  %v1498_v0 = vpop.f32.mrb[19].mxu1  ;;  %v2411_v5 = vsel %vm2155_vm2, %v4158_v50, %v2283_v56 }
 0x15f   : > { %vm2153_vm5 = vcmp.ge.f32.partialorder %v1495_v55, 0.0  ;;  %vm2156_vm6 = vcmp.ge.f32.partialorder %v4159_v60, 0.0  ;;  %v2284_v1 = vmul.f32 0.2, %v4159_v60  ;;  %vm2090_vm7 = vcmp.ge.f32.partialorder %v1242_v63, 0.0 }
 0x160   : > { %v2348_v2 = vsel %vm2092_vm4, %v4095_v59, %v2220_v62  ;;  %v2218_v3 = vmul.f32 0.2, %v1242_v63  ;;  %vm2154_vm8 = vcmp.ge.f32.partialorder %v1498_v0, 0.0  ;;  %v2282_v4 = vmul.f32 0.2, %v1498_v0 }
 0x161   : > { %v2345_v6 = vsel %vm2089_vm3, %v1239_v54, %v2217_v57  ;;  %v3668_v7 = vpack.c.bf16 %v2348_v2, %v2347_v61  ;;  %v2412_v8 = vsel %vm2156_vm6, %v4159_v60, %v2284_v1  ;;  %v2409_v9 = vsel %vm2153_vm5, %v1495_v55, %v2281_v58 }
 0x162   : > { %v3828_v10 = vpack.c.bf16 %v2412_v8, %v2411_v5  ;;  %v2346_v11 = vsel %vm2090_vm7, %v1242_v63, %v2218_v3  ;;  %v2410_v12 = vsel %vm2154_vm8, %v1498_v0, %v2282_v4  ;;  %v4098_v13 = vpop.f32.mrb[20].mxu0  ;;  %v4162_v14 = vpop.f32.mrb[20].mxu1 }
 0x163   : > { %3948 = vst [vmem:[%s4826_s17 + $0x48] sm:$0xff] %v3668_v7   ;;  %v3663_v15 = vpack.c.bf16 %v2346_v11, %v2345_v6  ;;  %v3823_v16 = vpack.c.bf16 %v2410_v12, %v2409_v9  ;;  %vm2095_vm9 = vcmp.ge.f32.partialorder %v4098_v13, 0.0  ;;  %v2223_v17 = vmul.f32 0.2, %v4098_v13  ;;  %v1255_v18 = vpop.f32.mrb[21].mxu0  ;;  %v1511_v19 = vpop.f32.mrb[21].mxu1 }
 0x164   : > { %3980 = vst [vmem:[%s4826_s17 + $0x148] sm:$0xff] %v3828_v10   ;;  %vm2159_vm10 = vcmp.ge.f32.partialorder %v4162_v14, 0.0  ;;  %v2287_v20 = vmul.f32 0.2, %v4162_v14  ;;  %v2221_v21 = vmul.f32 0.2, %v1255_v18 }
 0x165   : > { %3947 = vst [vmem:[%s4826_s17 + $0x40] sm:$0xff] %v3663_v15   ;;  %3979 = vst [vmem:[%s4826_s17 + $0x140] sm:$0xff] %v3823_v16   ;;  %v2285_v22 = vmul.f32 0.2, %v1511_v19  ;;  %v4099_v23 = vpop.f32.mrb[22].mxu0  ;;  %v4163_v24 = vpop.f32.mrb[22].mxu1  ;;  %v2351_v25 = vsel %vm2095_vm9, %v4098_v13, %v2223_v17 }
 0x166   : > { %vm2093_vm11 = vcmp.ge.f32.partialorder %v1255_v18, 0.0  ;;  %vm2096_vm12 = vcmp.ge.f32.partialorder %v4099_v23, 0.0  ;;  %v2224_v26 = vmul.f32 0.2, %v4099_v23  ;;  %v1258_v27 = vpop.f32.mrb[23].mxu0  ;;  %v1514_v28 = vpop.f32.mrb[23].mxu1  ;;  %v2415_v33 = vsel %vm2159_vm10, %v4162_v14, %v2287_v20 }
 0x167   : > { %vm2157_vm13 = vcmp.ge.f32.partialorder %v1511_v19, 0.0  ;;  %vm2160_vm14 = vcmp.ge.f32.partialorder %v4163_v24, 0.0  ;;  %v2288_v29 = vmul.f32 0.2, %v4163_v24  ;;  %vm2094_vm15 = vcmp.ge.f32.partialorder %v1258_v27, 0.0 }
 0x168   : > { %v2352_v30 = vsel %vm2096_vm12, %v4099_v23, %v2224_v26  ;;  %v2222_v31 = vmul.f32 0.2, %v1258_v27  ;;  %vm2158_vm0 = vcmp.ge.f32.partialorder %v1514_v28, 0.0  ;;  %v2286_v32 = vmul.f32 0.2, %v1514_v28 }
 0x169   : > { %v2349_v34 = vsel %vm2093_vm11, %v1255_v18, %v2221_v21  ;;  %v3678_v35 = vpack.c.bf16 %v2352_v30, %v2351_v25  ;;  %v2416_v36 = vsel %vm2160_vm14, %v4163_v24, %v2288_v29  ;;  %v2413_v37 = vsel %vm2157_vm13, %v1511_v19, %v2285_v22 }
 0x16a   : > { %v3838_v38 = vpack.c.bf16 %v2416_v36, %v2415_v33  ;;  %v2350_v39 = vsel %vm2094_vm15, %v1258_v27, %v2222_v31  ;;  %v2414_v40 = vsel %vm2158_vm0, %v1514_v28, %v2286_v32  ;;  %v4102_v41 = vpop.f32.mrb[24].mxu0  ;;  %v4166_v42 = vpop.f32.mrb[24].mxu1 }
 0x16b   : > { %3950 = vst [vmem:[%s4826_s17 + $0x58] sm:$0xff] %v3678_v35   ;;  %v3673_v43 = vpack.c.bf16 %v2350_v39, %v2349_v34  ;;  %v3833_v44 = vpack.c.bf16 %v2414_v40, %v2413_v37  ;;  %vm2099_vm1 = vcmp.ge.f32.partialorder %v4102_v41, 0.0  ;;  %v2227_v45 = vmul.f32 0.2, %v4102_v41  ;;  %v1271_v46 = vpop.f32.mrb[25].mxu0  ;;  %v1527_v47 = vpop.f32.mrb[25].mxu1 }
 0x16c   : > { %3982 = vst [vmem:[%s4826_s17 + $0x158] sm:$0xff] %v3838_v38   ;;  %vm2163_vm2 = vcmp.ge.f32.partialorder %v4166_v42, 0.0  ;;  %v2291_v48 = vmul.f32 0.2, %v4166_v42  ;;  %v2225_v49 = vmul.f32 0.2, %v1271_v46 }
 0x16d   : > { %3949 = vst [vmem:[%s4826_s17 + $0x50] sm:$0xff] %v3673_v43   ;;  %3981 = vst [vmem:[%s4826_s17 + $0x150] sm:$0xff] %v3833_v44   ;;  %v2289_v50 = vmul.f32 0.2, %v1527_v47  ;;  %v4103_v51 = vpop.f32.mrb[26].mxu0  ;;  %v4167_v52 = vpop.f32.mrb[26].mxu1  ;;  %v2355_v53 = vsel %vm2099_vm1, %v4102_v41, %v2227_v45 }
 0x16e   : > { %vm2097_vm3 = vcmp.ge.f32.partialorder %v1271_v46, 0.0  ;;  %vm2100_vm4 = vcmp.ge.f32.partialorder %v4103_v51, 0.0  ;;  %v2228_v54 = vmul.f32 0.2, %v4103_v51  ;;  %v1274_v55 = vpop.f32.mrb[27].mxu0  ;;  %v1530_v56 = vpop.f32.mrb[27].mxu1  ;;  %v2419_v61 = vsel %vm2163_vm2, %v4166_v42, %v2291_v48 }
 0x16f   : > { %vm2161_vm5 = vcmp.ge.f32.partialorder %v1527_v47, 0.0  ;;  %vm2164_vm6 = vcmp.ge.f32.partialorder %v4167_v52, 0.0  ;;  %v2292_v57 = vmul.f32 0.2, %v4167_v52  ;;  %vm2098_vm7 = vcmp.ge.f32.partialorder %v1274_v55, 0.0 }
 0x170   : > { %v2356_v58 = vsel %vm2100_vm4, %v4103_v51, %v2228_v54  ;;  %v2226_v59 = vmul.f32 0.2, %v1274_v55  ;;  %vm2162_vm8 = vcmp.ge.f32.partialorder %v1530_v56, 0.0  ;;  %v2290_v60 = vmul.f32 0.2, %v1530_v56 }
 0x171   : > { %v2353_v62 = vsel %vm2097_vm3, %v1271_v46, %v2225_v49  ;;  %v3688_v63 = vpack.c.bf16 %v2356_v58, %v2355_v53  ;;  %v2420_v0 = vsel %vm2164_vm6, %v4167_v52, %v2292_v57  ;;  %v2417_v1 = vsel %vm2161_vm5, %v1527_v47, %v2289_v50 }
 0x172   : > { %v3848_v2 = vpack.c.bf16 %v2420_v0, %v2419_v61  ;;  %v2354_v3 = vsel %vm2098_vm7, %v1274_v55, %v2226_v59  ;;  %v2418_v4 = vsel %vm2162_vm8, %v1530_v56, %v2290_v60  ;;  %v4106_v5 = vpop.f32.mrb[28].mxu0  ;;  %v4170_v6 = vpop.f32.mrb[28].mxu1 }
 0x173   : > { %3952 = vst [vmem:[%s4826_s17 + $0x68] sm:$0xff] %v3688_v63   ;;  %v3683_v7 = vpack.c.bf16 %v2354_v3, %v2353_v62  ;;  %v3843_v8 = vpack.c.bf16 %v2418_v4, %v2417_v1  ;;  %vm2103_vm9 = vcmp.ge.f32.partialorder %v4106_v5, 0.0  ;;  %v2231_v9 = vmul.f32 0.2, %v4106_v5  ;;  %v1287_v10 = vpop.f32.mrb[29].mxu0  ;;  %v1543_v11 = vpop.f32.mrb[29].mxu1 }
 0x174   : > { %3984 = vst [vmem:[%s4826_s17 + $0x168] sm:$0xff] %v3848_v2   ;;  %vm2167_vm10 = vcmp.ge.f32.partialorder %v4170_v6, 0.0  ;;  %v2295_v12 = vmul.f32 0.2, %v4170_v6  ;;  %v2229_v13 = vmul.f32 0.2, %v1287_v10 }
 0x175   : > { %3951 = vst [vmem:[%s4826_s17 + $0x60] sm:$0xff] %v3683_v7   ;;  %3983 = vst [vmem:[%s4826_s17 + $0x160] sm:$0xff] %v3843_v8   ;;  %v2293_v14 = vmul.f32 0.2, %v1543_v11  ;;  %v4107_v15 = vpop.f32.mrb[30].mxu0  ;;  %v4171_v16 = vpop.f32.mrb[30].mxu1  ;;  %v2359_v17 = vsel %vm2103_vm9, %v4106_v5, %v2231_v9 }
 0x176   : > { %vm2101_vm11 = vcmp.ge.f32.partialorder %v1287_v10, 0.0  ;;  %vm2104_vm12 = vcmp.ge.f32.partialorder %v4107_v15, 0.0  ;;  %v2232_v18 = vmul.f32 0.2, %v4107_v15  ;;  %v1290_v19 = vpop.f32.mrb[31].mxu0  ;;  %v1546_v20 = vpop.f32.mrb[31].mxu1  ;;  %v2423_v25 = vsel %vm2167_vm10, %v4170_v6, %v2295_v12 }
 0x177   : > { %vm2165_vm13 = vcmp.ge.f32.partialorder %v1543_v11, 0.0  ;;  %vm2168_vm14 = vcmp.ge.f32.partialorder %v4171_v16, 0.0  ;;  %v2296_v21 = vmul.f32 0.2, %v4171_v16  ;;  %vm2102_vm15 = vcmp.ge.f32.partialorder %v1290_v19, 0.0 }
 0x178   : > { %v2360_v22 = vsel %vm2104_vm12, %v4107_v15, %v2232_v18  ;;  %v2230_v23 = vmul.f32 0.2, %v1290_v19  ;;  %vm2166_vm0 = vcmp.ge.f32.partialorder %v1546_v20, 0.0  ;;  %v2294_v24 = vmul.f32 0.2, %v1546_v20 }
 0x179   : > { %v2357_v26 = vsel %vm2101_vm11, %v1287_v10, %v2229_v13  ;;  %v3698_v27 = vpack.c.bf16 %v2360_v22, %v2359_v17  ;;  %v2424_v28 = vsel %vm2168_vm14, %v4171_v16, %v2296_v21  ;;  %v2421_v29 = vsel %vm2165_vm13, %v1543_v11, %v2293_v14 }
 0x17a   : > { %v3858_v30 = vpack.c.bf16 %v2424_v28, %v2423_v25  ;;  %v2358_v31 = vsel %vm2102_vm15, %v1290_v19, %v2230_v23  ;;  %v2422_v32 = vsel %vm2166_vm0, %v1546_v20, %v2294_v24  ;;  %v4110_v33 = vpop.f32.mrb[32].mxu0  ;;  %v4174_v34 = vpop.f32.mrb[32].mxu1 }
 0x17b   : > { %3954 = vst [vmem:[%s4826_s17 + $0x78] sm:$0xff] %v3698_v27   ;;  %v3693_v35 = vpack.c.bf16 %v2358_v31, %v2357_v26  ;;  %v3853_v36 = vpack.c.bf16 %v2422_v32, %v2421_v29  ;;  %vm2107_vm1 = vcmp.ge.f32.partialorder %v4110_v33, 0.0  ;;  %v2235_v37 = vmul.f32 0.2, %v4110_v33  ;;  %v1303_v38 = vpop.f32.mrb[33].mxu0  ;;  %v1559_v39 = vpop.f32.mrb[33].mxu1 }
 0x17c   : > { %3986 = vst [vmem:[%s4826_s17 + $0x178] sm:$0xff] %v3858_v30   ;;  %vm2171_vm2 = vcmp.ge.f32.partialorder %v4174_v34, 0.0  ;;  %v2299_v40 = vmul.f32 0.2, %v4174_v34  ;;  %v2233_v41 = vmul.f32 0.2, %v1303_v38 }
 0x17d   : > { %3953 = vst [vmem:[%s4826_s17 + $0x70] sm:$0xff] %v3693_v35   ;;  %3985 = vst [vmem:[%s4826_s17 + $0x170] sm:$0xff] %v3853_v36   ;;  %v2297_v42 = vmul.f32 0.2, %v1559_v39  ;;  %v4111_v43 = vpop.f32.mrb[34].mxu0  ;;  %v4175_v44 = vpop.f32.mrb[34].mxu1  ;;  %v2363_v45 = vsel %vm2107_vm1, %v4110_v33, %v2235_v37 }
 0x17e   : > { %vm2105_vm3 = vcmp.ge.f32.partialorder %v1303_v38, 0.0  ;;  %vm2108_vm4 = vcmp.ge.f32.partialorder %v4111_v43, 0.0  ;;  %v2236_v46 = vmul.f32 0.2, %v4111_v43  ;;  %v1306_v47 = vpop.f32.mrb[35].mxu0  ;;  %v1562_v48 = vpop.f32.mrb[35].mxu1  ;;  %v2427_v53 = vsel %vm2171_vm2, %v4174_v34, %v2299_v40 }
 0x17f   : > { %vm2169_vm5 = vcmp.ge.f32.partialorder %v1559_v39, 0.0  ;;  %vm2172_vm6 = vcmp.ge.f32.partialorder %v4175_v44, 0.0  ;;  %v2300_v49 = vmul.f32 0.2, %v4175_v44  ;;  %vm2106_vm7 = vcmp.ge.f32.partialorder %v1306_v47, 0.0 }
 0x180   : > { %v2364_v50 = vsel %vm2108_vm4, %v4111_v43, %v2236_v46  ;;  %v2234_v51 = vmul.f32 0.2, %v1306_v47  ;;  %vm2170_vm8 = vcmp.ge.f32.partialorder %v1562_v48, 0.0  ;;  %v2298_v52 = vmul.f32 0.2, %v1562_v48 }
 0x181   : > { %v2361_v54 = vsel %vm2105_vm3, %v1303_v38, %v2233_v41  ;;  %v3708_v55 = vpack.c.bf16 %v2364_v50, %v2363_v45  ;;  %v2428_v56 = vsel %vm2172_vm6, %v4175_v44, %v2300_v49  ;;  %v2425_v57 = vsel %vm2169_vm5, %v1559_v39, %v2297_v42 }
 0x182   : > { %v3868_v58 = vpack.c.bf16 %v2428_v56, %v2427_v53  ;;  %v2362_v59 = vsel %vm2106_vm7, %v1306_v47, %v2234_v51  ;;  %v2426_v60 = vsel %vm2170_vm8, %v1562_v48, %v2298_v52  ;;  %v4114_v61 = vpop.f32.mrb[36].mxu0  ;;  %v4178_v62 = vpop.f32.mrb[36].mxu1 }
 0x183   : > { %3956 = vst [vmem:[%s4826_s17 + $0x88] sm:$0xff] %v3708_v55   ;;  %v3703_v63 = vpack.c.bf16 %v2362_v59, %v2361_v54  ;;  %v3863_v0 = vpack.c.bf16 %v2426_v60, %v2425_v57  ;;  %vm2111_vm9 = vcmp.ge.f32.partialorder %v4114_v61, 0.0  ;;  %v2239_v1 = vmul.f32 0.2, %v4114_v61  ;;  %v1319_v2 = vpop.f32.mrb[37].mxu0  ;;  %v1575_v3 = vpop.f32.mrb[37].mxu1 }
 0x184   : > { %3988 = vst [vmem:[%s4826_s17 + $0x188] sm:$0xff] %v3868_v58   ;;  %vm2175_vm10 = vcmp.ge.f32.partialorder %v4178_v62, 0.0  ;;  %v2303_v4 = vmul.f32 0.2, %v4178_v62  ;;  %v2237_v5 = vmul.f32 0.2, %v1319_v2 }
 0x185   : > { %3955 = vst [vmem:[%s4826_s17 + $0x80] sm:$0xff] %v3703_v63   ;;  %3987 = vst [vmem:[%s4826_s17 + $0x180] sm:$0xff] %v3863_v0   ;;  %v2301_v6 = vmul.f32 0.2, %v1575_v3  ;;  %v4115_v7 = vpop.f32.mrb[38].mxu0  ;;  %v4179_v8 = vpop.f32.mrb[38].mxu1  ;;  %v2367_v9 = vsel %vm2111_vm9, %v4114_v61, %v2239_v1 }
 0x186   : > { %vm2109_vm11 = vcmp.ge.f32.partialorder %v1319_v2, 0.0  ;;  %vm2112_vm12 = vcmp.ge.f32.partialorder %v4115_v7, 0.0  ;;  %v2240_v10 = vmul.f32 0.2, %v4115_v7  ;;  %v1322_v11 = vpop.f32.mrb[39].mxu0  ;;  %v1578_v12 = vpop.f32.mrb[39].mxu1  ;;  %v2431_v17 = vsel %vm2175_vm10, %v4178_v62, %v2303_v4 }
 0x187   : > { %vm2173_vm13 = vcmp.ge.f32.partialorder %v1575_v3, 0.0  ;;  %vm2176_vm14 = vcmp.ge.f32.partialorder %v4179_v8, 0.0  ;;  %v2304_v13 = vmul.f32 0.2, %v4179_v8  ;;  %vm2110_vm15 = vcmp.ge.f32.partialorder %v1322_v11, 0.0 }
 0x188   : > { %v2368_v14 = vsel %vm2112_vm12, %v4115_v7, %v2240_v10  ;;  %v2238_v15 = vmul.f32 0.2, %v1322_v11  ;;  %vm2174_vm0 = vcmp.ge.f32.partialorder %v1578_v12, 0.0  ;;  %v2302_v16 = vmul.f32 0.2, %v1578_v12 }
 0x189   : > { %v2365_v18 = vsel %vm2109_vm11, %v1319_v2, %v2237_v5  ;;  %v3718_v19 = vpack.c.bf16 %v2368_v14, %v2367_v9  ;;  %v2432_v20 = vsel %vm2176_vm14, %v4179_v8, %v2304_v13  ;;  %v2429_v21 = vsel %vm2173_vm13, %v1575_v3, %v2301_v6 }
 0x18a   : > { %v3878_v22 = vpack.c.bf16 %v2432_v20, %v2431_v17  ;;  %v2366_v23 = vsel %vm2110_vm15, %v1322_v11, %v2238_v15  ;;  %v2430_v24 = vsel %vm2174_vm0, %v1578_v12, %v2302_v16  ;;  %v4118_v25 = vpop.f32.mrb[40].mxu0  ;;  %v4182_v26 = vpop.f32.mrb[40].mxu1 }
 0x18b   : > { %3958 = vst [vmem:[%s4826_s17 + $0x98] sm:$0xff] %v3718_v19   ;;  %v3713_v27 = vpack.c.bf16 %v2366_v23, %v2365_v18  ;;  %v3873_v28 = vpack.c.bf16 %v2430_v24, %v2429_v21  ;;  %vm2115_vm1 = vcmp.ge.f32.partialorder %v4118_v25, 0.0  ;;  %v2243_v29 = vmul.f32 0.2, %v4118_v25  ;;  %v1335_v30 = vpop.f32.mrb[41].mxu0  ;;  %v1591_v31 = vpop.f32.mrb[41].mxu1 }
 0x18c   : > { %3990 = vst [vmem:[%s4826_s17 + $0x198] sm:$0xff] %v3878_v22   ;;  %vm2179_vm2 = vcmp.ge.f32.partialorder %v4182_v26, 0.0  ;;  %v2307_v32 = vmul.f32 0.2, %v4182_v26  ;;  %v2241_v33 = vmul.f32 0.2, %v1335_v30 }
 0x18d   : > { %3957 = vst [vmem:[%s4826_s17 + $0x90] sm:$0xff] %v3713_v27   ;;  %3989 = vst [vmem:[%s4826_s17 + $0x190] sm:$0xff] %v3873_v28   ;;  %v2305_v34 = vmul.f32 0.2, %v1591_v31  ;;  %v4119_v35 = vpop.f32.mrb[42].mxu0  ;;  %v4183_v36 = vpop.f32.mrb[42].mxu1  ;;  %v2371_v37 = vsel %vm2115_vm1, %v4118_v25, %v2243_v29 }
 0x18e   : > { %vm2113_vm3 = vcmp.ge.f32.partialorder %v1335_v30, 0.0  ;;  %vm2116_vm4 = vcmp.ge.f32.partialorder %v4119_v35, 0.0  ;;  %v2244_v38 = vmul.f32 0.2, %v4119_v35  ;;  %v1338_v39 = vpop.f32.mrb[43].mxu0  ;;  %v1594_v40 = vpop.f32.mrb[43].mxu1  ;;  %v2435_v45 = vsel %vm2179_vm2, %v4182_v26, %v2307_v32 }
 0x18f   : > { %vm2177_vm5 = vcmp.ge.f32.partialorder %v1591_v31, 0.0  ;;  %vm2180_vm6 = vcmp.ge.f32.partialorder %v4183_v36, 0.0  ;;  %v2308_v41 = vmul.f32 0.2, %v4183_v36  ;;  %vm2114_vm7 = vcmp.ge.f32.partialorder %v1338_v39, 0.0 }
 0x190   : > { %v2372_v42 = vsel %vm2116_vm4, %v4119_v35, %v2244_v38  ;;  %v2242_v43 = vmul.f32 0.2, %v1338_v39  ;;  %vm2178_vm8 = vcmp.ge.f32.partialorder %v1594_v40, 0.0  ;;  %v2306_v44 = vmul.f32 0.2, %v1594_v40 }
 0x191   : > { %v2369_v46 = vsel %vm2113_vm3, %v1335_v30, %v2241_v33  ;;  %v3728_v47 = vpack.c.bf16 %v2372_v42, %v2371_v37  ;;  %v2436_v48 = vsel %vm2180_vm6, %v4183_v36, %v2308_v41  ;;  %v2433_v49 = vsel %vm2177_vm5, %v1591_v31, %v2305_v34 }
 0x192   : > { %v3888_v50 = vpack.c.bf16 %v2436_v48, %v2435_v45  ;;  %v2370_v51 = vsel %vm2114_vm7, %v1338_v39, %v2242_v43  ;;  %v2434_v52 = vsel %vm2178_vm8, %v1594_v40, %v2306_v44  ;;  %v4122_v53 = vpop.f32.mrb[44].mxu0  ;;  %v4186_v54 = vpop.f32.mrb[44].mxu1 }
 0x193   : > { %3960 = vst [vmem:[%s4826_s17 + $0xa8] sm:$0xff] %v3728_v47   ;;  %v3723_v55 = vpack.c.bf16 %v2370_v51, %v2369_v46  ;;  %v3883_v56 = vpack.c.bf16 %v2434_v52, %v2433_v49  ;;  %vm2119_vm9 = vcmp.ge.f32.partialorder %v4122_v53, 0.0  ;;  %v2247_v57 = vmul.f32 0.2, %v4122_v53  ;;  %v1351_v58 = vpop.f32.mrb[45].mxu0  ;;  %v1607_v59 = vpop.f32.mrb[45].mxu1 }
 0x194   : > { %3992 = vst [vmem:[%s4826_s17 + $0x1a8] sm:$0xff] %v3888_v50   ;;  %vm2183_vm10 = vcmp.ge.f32.partialorder %v4186_v54, 0.0  ;;  %v2311_v60 = vmul.f32 0.2, %v4186_v54  ;;  %v2245_v61 = vmul.f32 0.2, %v1351_v58 }
 0x195   : > { %3959 = vst [vmem:[%s4826_s17 + $0xa0] sm:$0xff] %v3723_v55   ;;  %3991 = vst [vmem:[%s4826_s17 + $0x1a0] sm:$0xff] %v3883_v56   ;;  %v2309_v62 = vmul.f32 0.2, %v1607_v59  ;;  %v4123_v63 = vpop.f32.mrb[46].mxu0  ;;  %v4187_v0 = vpop.f32.mrb[46].mxu1  ;;  %v2375_v1 = vsel %vm2119_vm9, %v4122_v53, %v2247_v57 }
 0x196   : > { %vm2117_vm11 = vcmp.ge.f32.partialorder %v1351_v58, 0.0  ;;  %vm2120_vm12 = vcmp.ge.f32.partialorder %v4123_v63, 0.0  ;;  %v2248_v2 = vmul.f32 0.2, %v4123_v63  ;;  %v1354_v3 = vpop.f32.mrb[47].mxu0  ;;  %v1610_v4 = vpop.f32.mrb[47].mxu1  ;;  %v2439_v9 = vsel %vm2183_vm10, %v4186_v54, %v2311_v60 }
 0x197   : > { %vm2181_vm13 = vcmp.ge.f32.partialorder %v1607_v59, 0.0  ;;  %vm2184_vm14 = vcmp.ge.f32.partialorder %v4187_v0, 0.0  ;;  %v2312_v5 = vmul.f32 0.2, %v4187_v0  ;;  %vm2118_vm15 = vcmp.ge.f32.partialorder %v1354_v3, 0.0 }
 0x198   : > { %v2376_v6 = vsel %vm2120_vm12, %v4123_v63, %v2248_v2  ;;  %v2246_v7 = vmul.f32 0.2, %v1354_v3  ;;  %vm2182_vm0 = vcmp.ge.f32.partialorder %v1610_v4, 0.0  ;;  %v2310_v8 = vmul.f32 0.2, %v1610_v4 }
 0x199   : > { %v2373_v10 = vsel %vm2117_vm11, %v1351_v58, %v2245_v61  ;;  %v3738_v11 = vpack.c.bf16 %v2376_v6, %v2375_v1  ;;  %v2440_v12 = vsel %vm2184_vm14, %v4187_v0, %v2312_v5  ;;  %v2437_v13 = vsel %vm2181_vm13, %v1607_v59, %v2309_v62 }
 0x19a   : > { %v3898_v14 = vpack.c.bf16 %v2440_v12, %v2439_v9  ;;  %v2374_v15 = vsel %vm2118_vm15, %v1354_v3, %v2246_v7  ;;  %v2438_v16 = vsel %vm2182_vm0, %v1610_v4, %v2310_v8  ;;  %v4126_v17 = vpop.f32.mrb[48].mxu0  ;;  %v4190_v18 = vpop.f32.mrb[48].mxu1 }
 0x19b   : > { %3962 = vst [vmem:[%s4826_s17 + $0xb8] sm:$0xff] %v3738_v11   ;;  %v3733_v19 = vpack.c.bf16 %v2374_v15, %v2373_v10  ;;  %v3893_v20 = vpack.c.bf16 %v2438_v16, %v2437_v13  ;;  %vm2123_vm1 = vcmp.ge.f32.partialorder %v4126_v17, 0.0  ;;  %v2251_v21 = vmul.f32 0.2, %v4126_v17  ;;  %v1367_v22 = vpop.f32.mrb[49].mxu0  ;;  %v1623_v23 = vpop.f32.mrb[49].mxu1 }
 0x19c   : > { %3994 = vst [vmem:[%s4826_s17 + $0x1b8] sm:$0xff] %v3898_v14   ;;  %vm2187_vm2 = vcmp.ge.f32.partialorder %v4190_v18, 0.0  ;;  %v2315_v24 = vmul.f32 0.2, %v4190_v18  ;;  %v2249_v25 = vmul.f32 0.2, %v1367_v22 }
 0x19d   : > { %3961 = vst [vmem:[%s4826_s17 + $0xb0] sm:$0xff] %v3733_v19   ;;  %3993 = vst [vmem:[%s4826_s17 + $0x1b0] sm:$0xff] %v3893_v20   ;;  %v2313_v26 = vmul.f32 0.2, %v1623_v23  ;;  %v4127_v27 = vpop.f32.mrb[50].mxu0  ;;  %v4191_v28 = vpop.f32.mrb[50].mxu1  ;;  %v2379_v29 = vsel %vm2123_vm1, %v4126_v17, %v2251_v21 }
 0x19e   : > { %vm2121_vm3 = vcmp.ge.f32.partialorder %v1367_v22, 0.0  ;;  %vm2124_vm4 = vcmp.ge.f32.partialorder %v4127_v27, 0.0  ;;  %v2252_v30 = vmul.f32 0.2, %v4127_v27  ;;  %v1370_v31 = vpop.f32.mrb[51].mxu0  ;;  %v1626_v32 = vpop.f32.mrb[51].mxu1  ;;  %v2443_v37 = vsel %vm2187_vm2, %v4190_v18, %v2315_v24 }
 0x19f   : > { %vm2185_vm5 = vcmp.ge.f32.partialorder %v1623_v23, 0.0  ;;  %vm2188_vm6 = vcmp.ge.f32.partialorder %v4191_v28, 0.0  ;;  %v2316_v33 = vmul.f32 0.2, %v4191_v28  ;;  %vm2122_vm7 = vcmp.ge.f32.partialorder %v1370_v31, 0.0 }
 0x1a0   : > { %v2380_v34 = vsel %vm2124_vm4, %v4127_v27, %v2252_v30  ;;  %v2250_v35 = vmul.f32 0.2, %v1370_v31  ;;  %vm2186_vm8 = vcmp.ge.f32.partialorder %v1626_v32, 0.0  ;;  %v2314_v36 = vmul.f32 0.2, %v1626_v32 }
 0x1a1   : > { %v2377_v38 = vsel %vm2121_vm3, %v1367_v22, %v2249_v25  ;;  %v3748_v39 = vpack.c.bf16 %v2380_v34, %v2379_v29  ;;  %v2444_v40 = vsel %vm2188_vm6, %v4191_v28, %v2316_v33  ;;  %v2441_v41 = vsel %vm2185_vm5, %v1623_v23, %v2313_v26 }
 0x1a2   : > { %v3908_v42 = vpack.c.bf16 %v2444_v40, %v2443_v37  ;;  %v2378_v43 = vsel %vm2122_vm7, %v1370_v31, %v2250_v35  ;;  %v2442_v44 = vsel %vm2186_vm8, %v1626_v32, %v2314_v36  ;;  %v4130_v45 = vpop.f32.mrb[52].mxu0  ;;  %v4194_v46 = vpop.f32.mrb[52].mxu1 }
 0x1a3   : > { %3964 = vst [vmem:[%s4826_s17 + $0xc8] sm:$0xff] %v3748_v39   ;;  %v3743_v47 = vpack.c.bf16 %v2378_v43, %v2377_v38  ;;  %v3903_v48 = vpack.c.bf16 %v2442_v44, %v2441_v41  ;;  %vm2127_vm9 = vcmp.ge.f32.partialorder %v4130_v45, 0.0  ;;  %v2255_v49 = vmul.f32 0.2, %v4130_v45  ;;  %v1383_v50 = vpop.f32.mrb[53].mxu0  ;;  %v1639_v51 = vpop.f32.mrb[53].mxu1 }
 0x1a4   : > { %3996 = vst [vmem:[%s4826_s17 + $0x1c8] sm:$0xff] %v3908_v42   ;;  %vm2191_vm10 = vcmp.ge.f32.partialorder %v4194_v46, 0.0  ;;  %v2319_v52 = vmul.f32 0.2, %v4194_v46  ;;  %v2253_v53 = vmul.f32 0.2, %v1383_v50 }
 0x1a5   : > { %3963 = vst [vmem:[%s4826_s17 + $0xc0] sm:$0xff] %v3743_v47   ;;  %3995 = vst [vmem:[%s4826_s17 + $0x1c0] sm:$0xff] %v3903_v48   ;;  %v2317_v54 = vmul.f32 0.2, %v1639_v51  ;;  %v4131_v55 = vpop.f32.mrb[54].mxu0  ;;  %v4195_v56 = vpop.f32.mrb[54].mxu1  ;;  %v2383_v57 = vsel %vm2127_vm9, %v4130_v45, %v2255_v49 }
 0x1a6   : > { %vm2125_vm11 = vcmp.ge.f32.partialorder %v1383_v50, 0.0  ;;  %vm2128_vm12 = vcmp.ge.f32.partialorder %v4131_v55, 0.0  ;;  %v2256_v58 = vmul.f32 0.2, %v4131_v55  ;;  %v1386_v59 = vpop.f32.mrb[55].mxu0  ;;  %v1642_v60 = vpop.f32.mrb[55].mxu1  ;;  %v2447_v1 = vsel %vm2191_vm10, %v4194_v46, %v2319_v52 }
 0x1a7   : > { %vm2189_vm13 = vcmp.ge.f32.partialorder %v1639_v51, 0.0  ;;  %vm2192_vm14 = vcmp.ge.f32.partialorder %v4195_v56, 0.0  ;;  %v2320_v61 = vmul.f32 0.2, %v4195_v56  ;;  %vm2126_vm15 = vcmp.ge.f32.partialorder %v1386_v59, 0.0 }
 0x1a8   : > { %v2384_v62 = vsel %vm2128_vm12, %v4131_v55, %v2256_v58  ;;  %v2254_v63 = vmul.f32 0.2, %v1386_v59  ;;  %vm2190_vm0 = vcmp.ge.f32.partialorder %v1642_v60, 0.0  ;;  %v2318_v0 = vmul.f32 0.2, %v1642_v60 }
 0x1a9   : > { %v2381_v2 = vsel %vm2125_vm11, %v1383_v50, %v2253_v53  ;;  %v3758_v3 = vpack.c.bf16 %v2384_v62, %v2383_v57  ;;  %v2448_v4 = vsel %vm2192_vm14, %v4195_v56, %v2320_v61  ;;  %v2445_v5 = vsel %vm2189_vm13, %v1639_v51, %v2317_v54 }
 0x1aa   : > { %v3918_v6 = vpack.c.bf16 %v2448_v4, %v2447_v1  ;;  %v2382_v7 = vsel %vm2126_vm15, %v1386_v59, %v2254_v63  ;;  %v2446_v8 = vsel %vm2190_vm0, %v1642_v60, %v2318_v0  ;;  %v4134_v9 = vpop.f32.mrb[56].mxu0  ;;  %v4198_v10 = vpop.f32.mrb[56].mxu1 }
 0x1ab   : > { %3966 = vst [vmem:[%s4826_s17 + $0xd8] sm:$0xff] %v3758_v3   ;;  %v3753_v11 = vpack.c.bf16 %v2382_v7, %v2381_v2  ;;  %v3913_v12 = vpack.c.bf16 %v2446_v8, %v2445_v5  ;;  %vm2131_vm1 = vcmp.ge.f32.partialorder %v4134_v9, 0.0  ;;  %v2259_v13 = vmul.f32 0.2, %v4134_v9  ;;  %v1399_v14 = vpop.f32.mrb[57].mxu0  ;;  %v1655_v15 = vpop.f32.mrb[57].mxu1 }
 0x1ac   : > { %3998 = vst [vmem:[%s4826_s17 + $0x1d8] sm:$0xff] %v3918_v6   ;;  %vm2195_vm2 = vcmp.ge.f32.partialorder %v4198_v10, 0.0  ;;  %v2323_v16 = vmul.f32 0.2, %v4198_v10  ;;  %v2257_v17 = vmul.f32 0.2, %v1399_v14 }
 0x1ad   : > { %3965 = vst [vmem:[%s4826_s17 + $0xd0] sm:$0xff] %v3753_v11   ;;  %3997 = vst [vmem:[%s4826_s17 + $0x1d0] sm:$0xff] %v3913_v12   ;;  %v2321_v18 = vmul.f32 0.2, %v1655_v15  ;;  %v4135_v19 = vpop.f32.mrb[58].mxu0  ;;  %v4199_v20 = vpop.f32.mrb[58].mxu1  ;;  %v2387_v21 = vsel %vm2131_vm1, %v4134_v9, %v2259_v13 }
 0x1ae   : > { %vm2129_vm3 = vcmp.ge.f32.partialorder %v1399_v14, 0.0  ;;  %vm2132_vm4 = vcmp.ge.f32.partialorder %v4135_v19, 0.0  ;;  %v2260_v22 = vmul.f32 0.2, %v4135_v19  ;;  %v1402_v23 = vpop.f32.mrb[59].mxu0  ;;  %v1658_v24 = vpop.f32.mrb[59].mxu1  ;;  %v2451_v29 = vsel %vm2195_vm2, %v4198_v10, %v2323_v16 }
 0x1af   : > { %vm2193_vm5 = vcmp.ge.f32.partialorder %v1655_v15, 0.0  ;;  %vm2196_vm6 = vcmp.ge.f32.partialorder %v4199_v20, 0.0  ;;  %v2324_v25 = vmul.f32 0.2, %v4199_v20  ;;  %vm2130_vm7 = vcmp.ge.f32.partialorder %v1402_v23, 0.0 }
 0x1b0   : > { %v2388_v26 = vsel %vm2132_vm4, %v4135_v19, %v2260_v22  ;;  %v2258_v27 = vmul.f32 0.2, %v1402_v23  ;;  %vm2194_vm8 = vcmp.ge.f32.partialorder %v1658_v24, 0.0  ;;  %v2322_v28 = vmul.f32 0.2, %v1658_v24 }
 0x1b1   : > { %v2385_v30 = vsel %vm2129_vm3, %v1399_v14, %v2257_v17  ;;  %v3768_v31 = vpack.c.bf16 %v2388_v26, %v2387_v21  ;;  %v2452_v32 = vsel %vm2196_vm6, %v4199_v20, %v2324_v25  ;;  %v2449_v33 = vsel %vm2193_vm5, %v1655_v15, %v2321_v18 }
 0x1b2   : > { %v3928_v34 = vpack.c.bf16 %v2452_v32, %v2451_v29  ;;  %v2386_v35 = vsel %vm2130_vm7, %v1402_v23, %v2258_v27  ;;  %v2450_v36 = vsel %vm2194_vm8, %v1658_v24, %v2322_v28  ;;  %v4138_v37 = vpop.f32.mrb[60].mxu0  ;;  %v4202_v38 = vpop.f32.mrb[60].mxu1 }
 0x1b3   : > { %3968 = vst [vmem:[%s4826_s17 + $0xe8] sm:$0xff] %v3768_v31   ;;  %v3763_v39 = vpack.c.bf16 %v2386_v35, %v2385_v30  ;;  %v3923_v40 = vpack.c.bf16 %v2450_v36, %v2449_v33  ;;  %vm2135_vm9 = vcmp.ge.f32.partialorder %v4138_v37, 0.0  ;;  %v2263_v41 = vmul.f32 0.2, %v4138_v37  ;;  %v1415_v42 = vpop.f32.mrb[61].mxu0  ;;  %v1671_v43 = vpop.f32.mrb[61].mxu1 }
 0x1b4   : > { %4000 = vst [vmem:[%s4826_s17 + $0x1e8] sm:$0xff] %v3928_v34   ;;  %vm2199_vm10 = vcmp.ge.f32.partialorder %v4202_v38, 0.0  ;;  %v2327_v44 = vmul.f32 0.2, %v4202_v38  ;;  %v2261_v45 = vmul.f32 0.2, %v1415_v42 }
 0x1b5   : > { %3967 = vst [vmem:[%s4826_s17 + $0xe0] sm:$0xff] %v3763_v39   ;;  %3999 = vst [vmem:[%s4826_s17 + $0x1e0] sm:$0xff] %v3923_v40   ;;  %v2325_v46 = vmul.f32 0.2, %v1671_v43  ;;  %v4139_v47 = vpop.f32.mrb[62].mxu0  ;;  %v4203_v48 = vpop.f32.mrb[62].mxu1  ;;  %v2391_v49 = vsel %vm2135_vm9, %v4138_v37, %v2263_v41 }
 0x1b6   : > { %vm2133_vm11 = vcmp.ge.f32.partialorder %v1415_v42, 0.0  ;;  %vm2136_vm12 = vcmp.ge.f32.partialorder %v4139_v47, 0.0  ;;  %v2264_v50 = vmul.f32 0.2, %v4139_v47  ;;  %v1418_v51 = vpop.f32.mrb[63].mxu0  ;;  %v1674_v52 = vpop.f32.mrb[63].mxu1  ;;  %v2455_v57 = vsel %vm2199_vm10, %v4202_v38, %v2327_v44 }
 0x1b7   : > { %vm2197_vm13 = vcmp.ge.f32.partialorder %v1671_v43, 0.0  ;;  %vm2200_vm14 = vcmp.ge.f32.partialorder %v4203_v48, 0.0  ;;  %v2328_v53 = vmul.f32 0.2, %v4203_v48  ;;  %vm2134_vm15 = vcmp.ge.f32.partialorder %v1418_v51, 0.0 }
 0x1b8   : > { %v2392_v54 = vsel %vm2136_vm12, %v4139_v47, %v2264_v50  ;;  %v2262_v55 = vmul.f32 0.2, %v1418_v51  ;;  %vm2198_vm0 = vcmp.ge.f32.partialorder %v1674_v52, 0.0  ;;  %v2326_v56 = vmul.f32 0.2, %v1674_v52 }
 0x1b9   : > { %v2389_v58 = vsel %vm2133_vm11, %v1415_v42, %v2261_v45  ;;  %v3778_v59 = vpack.c.bf16 %v2392_v54, %v2391_v49  ;;  %v2456_v60 = vsel %vm2200_vm14, %v4203_v48, %v2328_v53  ;;  %v2453_v61 = vsel %vm2197_vm13, %v1671_v43, %v2325_v46 }
 0x1ba   : > { %v3938_v62 = vpack.c.bf16 %v2456_v60, %v2455_v57  ;;  %v2390_v63 = vsel %vm2134_vm15, %v1418_v51, %v2262_v55  ;;  %v2454_v0 = vsel %vm2198_vm0, %v1674_v52, %v2326_v56 }
 0x1bb   : > { %3970 = vst [vmem:[%s4826_s17 + $0xf8] sm:$0xff] %v3778_v59   ;;  %v3773_v1 = vpack.c.bf16 %v2390_v63, %v2389_v58  ;;  %v3933_v2 = vpack.c.bf16 %v2454_v0, %v2453_v61 }
 0x1bc   : > { %4002 = vst [vmem:[%s4826_s17 + $0x1f8] sm:$0xff] %v3938_v62  }
 0x1bd   : > { %3969 = vst [vmem:[%s4826_s17 + $0xf0] sm:$0xff] %v3773_v1   ;;  %4001 = vst [vmem:[%s4826_s17 + $0x1f0] sm:$0xff] %v3933_v2  }
 0x1be   : > { %4425 = shalt.err (!%p4422_p5)
}
 0x1bf   : > { %s4426_s23 = scalar_lea.hbm %s4910_s4, 8192  ;;  %s4430_s26 = scalar_lea.hbm %s4967_s2, 16384 }
 0x1c0   : > { %p4427_p9 = scmp.ne.s32.totalorder %s4910_s4, %s4426_s23  ;;  %p4431_p3 = scmp.lt.u32.totalorder %s4910_s4, %s4967_s2 }
 0x1c1   : > { %p4432_p7 = scmp.lt.u32.totalorder %s4430_s26, %s4426_s23  ;;  %p4434_p4 = scmp.lt.u32.totalorder %s4426_s23, %s4910_s4 }
 0x1c2   : > { %p4428_p1 = pnand %p4427_p9, %p4621_p10 }
 0x1c3   : > { %p4433_p13 = por %p4432_p7, %p4431_p3 }
 0x1c4   : > { %p4429_p2 = pneg %p4428_p1 }
 0x1c5   : > { %p4435_p6 = por %p4434_p4, %p4433_p13 }
 0x1c7   : > { %p4436_p8 = pnand %p4435_p6, %p4429_p2 }
 0x1c9   : > { %4439 = shalt.err (!%p4436_p8)
}
 0x1ca   : > { %s4505_s8 = smov 64   ;;  %s4506_s17 = smov 4  }
 0x1cb   : > { %4216 = dma.vmem_to_hbm [thread:$0]  (%p4621_p10), %s4912_s21, 8192, %s4910_s4, %s3098_s5, %s4505_s8, %s4505_s8, %s4506_s17  }
 0x1cc PF: > { %s3127_s19 = sand.u32 1, %s4478_s9   ;;  %p4985_p12 = scmp.ne.s32.totalorder %s4975_s20, 0 }
 0x1cd   : > { %p4986_p11 = scmp.ge.s32.totalorder %s4498_s14, 2  ;;  %s3128_s6 = scalar_lea.sflag [#allocation5], %s3127_s19 }
 0x1cf   : > { %p4227_p0 = pnand %p4986_p11, %p4985_p12 }
 0x1d1   : > { %4473 = dma.done.wait (!%p4227_p0), %s3128_s6, 8192  }
 0x1d2   : > { %4475 = vsyncadd (!%p4227_p0), %s3128_s6, 4294959104  ;;  %s19_s14 = sadd.s32 1, %s4498_s14   ;;  %s4987_s9 = smov %s4482_s10 }
 0x1d3   : > { %p16_p5 = scmp.ge.s32.totalorder %s19_s14, 4   ;;  %s4988_s10 = smov %s4486_s11 }
 0x1d4   : > { %s4989_s11 = smov %s4630_s28  ;;  %s4990_s12 = smov %s4494_s13 }
 0x1d5   : > { %s4991_s13 = smov %s4993_s25  ;;  %18 = sbr.rel (!%p16_p5) target bundleno = 7 (0x7), region = 86 }
 0x1dc   :  { %3133 = vsyncpa [#allocation4], 1 }
 0x1dd   :  { %3135 = vsyncpa [#allocation4 + $0x1], 1 }
 0x1de   :  { %3136 = vsyncpa [#allocation7], 1 }
 0x1df   :  { %3137 = vsyncpa [#allocation5], 1 }
 0x1e0   :  { %3139 = vsyncpa [#allocation5 + $0x1], 1 }

// kernel: _forward.5
= control target key start
LH: loop header
LB: loop body
LE: loop exit
PB: predicated region body
PF: predicated region fallthrough
CT: control target
= control target key end

     0   :  { %7 = vsyncpa [#allocation4], 0  ;;  %s2419_s0 = inlined_call_operand.hbm [shape: bf16[512,256], index: 0, kind: input, shape index: {}]   ;;  %s2420_s1 = inlined_call_operand.hbm [shape: bf16[256,128], index: 1, kind: input, shape index: {}]   ;;  %s2421_s2 = inlined_call_operand.hbm [shape: bf16[512,128], index: 2, kind: output, shape index: {}]  }
   0x1   :  { %8 = vsyncpa [#allocation7], 0 }
   0x2   :  { %9 = vsyncpa [#allocation5], 0  ;;  %s2322_s9 = smov [#allocation3]   ;;  %s2250_s13 = scalar_lea.hbm %s2419_s0, 8192 }
   0x3   :  { %s15_s10 = sshll.u32 %s2322_s9, 4  ;;  %p2251_p0 = scmp.ne.s32.totalorder %s2419_s0, %s2250_s13  ;;  %s16_s10 = int_to_ptr.vmem [resolvable:$true] %s15_s10 }
   0x4   :  { %p2254_p1 = scmp.lt.u32.totalorder %s2250_s13, %s2419_s0 }
   0x6   :  { %p2256_p2 = pnand %p2254_p1, %p2251_p0 }
   0x8   :  { %2259 = shalt.err (!%p2256_p2)
}
   0x9   :  { %s2260_s18 = scalar_lea.vmem %s16_s10, 8192  ;;  %p2265_p4 = scmp.lt.s32.totalorder %s16_s10, %s16_s10 }
   0xa   :  { %p2261_p3 = scmp.ne.s32.totalorder %s16_s10, %s2260_s18  ;;  %p2266_p5 = scmp.lt.s32.totalorder %s2260_s18, %s2260_s18 }
   0xc   :  { %p2267_p6 = por %p2266_p5, %p2265_p4 }
   0xe   :  { %p2268_p7 = pnand %p2267_p6, %p2261_p3 }
  0x10   :  { %2271 = shalt.err (!%p2268_p7)
}
  0x11   :  { %s2323_s19 = smov 128   ;;  %s2324_s20 = smov 8  }
  0x12   :  { %21 = dma.hbm_to_vmem [thread:$0]  %s2419_s0, 8192, %s16_s10, [#allocation4], %s2323_s19, %s2323_s19, %s2324_s20  }
  0x13   :  { %s2325_s23 = smov [#allocation6]   ;;  %s2272_s27 = scalar_lea.hbm %s2420_s1, 2048 }
  0x14   :  { %s27_s24 = sshll.u32 %s2325_s23, 4  ;;  %p2273_p8 = scmp.ne.s32.totalorder %s2420_s1, %s2272_s27  ;;  %s28_s24 = int_to_ptr.vmem [resolvable:$true] %s27_s24 }
  0x15   :  { %p2276_p9 = scmp.lt.u32.totalorder %s2272_s27, %s2420_s1 }
  0x17   :  { %p2278_p10 = pnand %p2276_p9, %p2273_p8 }
  0x19   :  { %2281 = shalt.err (!%p2278_p10)
}
  0x1a   :  { %s2282_s4 = scalar_lea.vmem %s28_s24, 2048  ;;  %p2287_p12 = scmp.lt.s32.totalorder %s28_s24, %s28_s24 }
  0x1b   :  { %p2283_p11 = scmp.ne.s32.totalorder %s28_s24, %s2282_s4  ;;  %p2288_p13 = scmp.lt.s32.totalorder %s2282_s4, %s2282_s4 }
  0x1d   :  { %p2289_p0 = por %p2288_p13, %p2287_p12 }
  0x1f   :  { %p2290_p1 = pnand %p2289_p0, %p2283_p11 }
  0x21   :  { %2293 = shalt.err (!%p2290_p1)
}
  0x22   :  { %s2326_s0 = smov 64   ;;  %s2327_s5 = smov 4  }
  0x23   :  { %33 = dma.hbm_to_vmem [thread:$0]  %s2420_s1, 2048, %s28_s24, [#allocation7], %s2326_s0, %s2326_s0, %s2327_s5  }
  0x24   :  { %2316 = dma.done.wait [#allocation4], 8192  }
  0x25   :  { %2317 = vsyncadd [#allocation4], 4294959104 }
  0x26   :  { %2318 = dma.done.wait [#allocation7], 2048  }
  0x27   :  { %2319 = vsyncadd [#allocation7], 4294965248  ;;  %v2328_v0 = vmov 0   ;;  %v2138_v1 = vld [vmem:[#allocation6] sm:$0xff]   ;;  %v2139_v2 = vld [vmem:[#allocation6 + $0x8] sm:$0xff]   ;;  %s2329_s1 = smov [#allocation8]  }
  0x28   :  { %685 = vmatprep.subr.bf16.mxu0 %v2328_v0  ;;  %2098 = vmatprep.subr.bf16.mxu1 %v2328_v0  ;;  %v2140_v3 = vld [vmem:[#allocation6 + $0x10] sm:$0xff]   ;;  %v2141_v4 = vld [vmem:[#allocation6 + $0x18] sm:$0xff]   ;;  %v2142_v5 = vld [vmem:[#allocation6 + $0x20] sm:$0xff]   ;;  %s1686_s8 = sshll.u32 %s2329_s1, 4  ;;  %s1687_s8 = int_to_ptr.vmem [resolvable:$true] %s1686_s8 }
  0x29   :  { %686 = vmatpush1.bf16.msra.mxu0 %v2138_v1  ;;  %2114 = vmatpush1.bf16.msra.mxu1 %v2138_v1  ;;  %v2156_v6 = vld [vmem:[#allocation3 + $0x4] ss:$8 sps:$4 sm:$0xff]   ;;  %v2144_v9 = vld [vmem:[#allocation6 + $0x30] sm:$0xff]   ;;  %v2145_v10 = vld [vmem:[#allocation6 + $0x38] sm:$0xff]   ;;  %s2294_s9 = scalar_lea.vmem %s1687_s8, 4096  ;;  %p2299_p3 = scmp.lt.s32.totalorder %s1687_s8, %s1687_s8 }
  0x2a   :  { %687 = vmatprep.subr.bf16.mxu0 %v2328_v0  ;;  %2099 = vmatprep.subr.bf16.mxu1 %v2328_v0  ;;  %v2143_v7 = vld [vmem:[#allocation6 + $0x28] sm:$0xff]   ;;  %v2146_v11 = vld [vmem:[#allocation6 + $0x40] sm:$0xff]   ;;  %v2148_v13 = vld [vmem:[#allocation6 + $0x50] sm:$0xff]   ;;  %p2295_p2 = scmp.ne.s32.totalorder %s1687_s8, %s2294_s9  ;;  %p2300_p4 = scmp.lt.s32.totalorder %s2294_s9, %s2294_s9 }
  0x2b   :  { %v2159_v8 = vld [vmem:[#allocation3 + $0x104] ss:$8 sps:$4 sm:$0xff]   ;;  %717 = vmatprep.mubr.bf16.mxu0 %v2156_v6  ;;  %v2149_v14 = vld [vmem:[#allocation6 + $0x58] sm:$0xff]   ;;  %v2152_v17 = vld [vmem:[#allocation6 + $0x70] sm:$0xff]  }
  0x2c   :  { %845 = vmatprep.mubr.bf16.mxu1 %v2159_v8  ;;  %v2147_v12 = vld [vmem:[#allocation6 + $0x48] sm:$0xff]   ;;  %v2150_v15 = vld [vmem:[#allocation6 + $0x60] sm:$0xff]   ;;  %v2153_v18 = vld [vmem:[#allocation6 + $0x78] sm:$0xff]   ;;  %p2301_p5 = por %p2300_p4, %p2299_p3 }
  0x2d   :  { %688 = vmatpush1.bf16.msra.mxu0 %v2139_v2  ;;  %2115 = vmatpush1.bf16.msra.mxu1 %v2139_v2  ;;  %v2151_v16 = vld [vmem:[#allocation6 + $0x68] sm:$0xff]   ;;  %v2160_v21 = vld [vmem:[#allocation3 + $0x14] ss:$8 sps:$4 sm:$0xff]   ;;  %v2164_v23 = vld [vmem:[#allocation3 + $0x10] ss:$8 sps:$4 sm:$0xff]  }
  0x2e   :  { %689 = vmatprep.subr.bf16.mxu0 %v2328_v0  ;;  %2100 = vmatprep.subr.bf16.mxu1 %v2328_v0  ;;  %v2154_v19 = vld [vmem:[#allocation3] ss:$8 sps:$4 sm:$0xff]   ;;  %v2162_v22 = vld [vmem:[#allocation3 + $0x114] ss:$8 sps:$4 sm:$0xff]   ;;  %v2165_v24 = vld [vmem:[#allocation3 + $0x110] ss:$8 sps:$4 sm:$0xff]   ;;  %p2302_p6 = pnand %p2301_p5, %p2295_p2 }
  0x2f   :  { %v2157_v20 = vld [vmem:[#allocation3 + $0x100] ss:$8 sps:$4 sm:$0xff]   ;;  %v2166_v25 = vld [vmem:[#allocation3 + $0x24] ss:$8 sps:$4 sm:$0xff]   ;;  %v2172_v29 = vld [vmem:[#allocation3 + $0x34] ss:$8 sps:$4 sm:$0xff]  }
  0x30   :  { %v2168_v26 = vld [vmem:[#allocation3 + $0x124] ss:$8 sps:$4 sm:$0xff]   ;;  %v2170_v27 = vld [vmem:[#allocation3 + $0x20] ss:$8 sps:$4 sm:$0xff]   ;;  %v2174_v30 = vld [vmem:[#allocation3 + $0x134] ss:$8 sps:$4 sm:$0xff]  }
  0x31   :  { %690 = vmatpush1.bf16.msra.mxu0 %v2140_v3  ;;  %2116 = vmatpush1.bf16.msra.mxu1 %v2140_v3  ;;  %v2171_v28 = vld [vmem:[#allocation3 + $0x120] ss:$8 sps:$4 sm:$0xff]   ;;  %v2176_v31 = vld [vmem:[#allocation3 + $0x30] ss:$8 sps:$4 sm:$0xff]   ;;  %v2178_v33 = vld [vmem:[#allocation3 + $0x44] ss:$8 sps:$4 sm:$0xff]  }
  0x32   :  { %691 = vmatprep.subr.bf16.mxu0 %v2328_v0  ;;  %2101 = vmatprep.subr.bf16.mxu1 %v2328_v0  ;;  %v2177_v32 = vld [vmem:[#allocation3 + $0x130] ss:$8 sps:$4 sm:$0xff]   ;;  %v2180_v34 = vld [vmem:[#allocation3 + $0x144] ss:$8 sps:$4 sm:$0xff]   ;;  %v2182_v35 = vld [vmem:[#allocation3 + $0x40] ss:$8 sps:$4 sm:$0xff]  }
  0x33   :  { %v2183_v36 = vld [vmem:[#allocation3 + $0x140] ss:$8 sps:$4 sm:$0xff]   ;;  %v2184_v37 = vld [vmem:[#allocation3 + $0x54] ss:$8 sps:$4 sm:$0xff]   ;;  %v2188_v39 = vld [vmem:[#allocation3 + $0x50] ss:$8 sps:$4 sm:$0xff]  }
  0x34   :  { %v2186_v38 = vld [vmem:[#allocation3 + $0x154] ss:$8 sps:$4 sm:$0xff]   ;;  %v2189_v40 = vld [vmem:[#allocation3 + $0x150] ss:$8 sps:$4 sm:$0xff]   ;;  %v2190_v41 = vld [vmem:[#allocation3 + $0x64] ss:$8 sps:$4 sm:$0xff]  }
  0x35   :  { %692 = vmatpush1.bf16.msra.mxu0 %v2141_v4  ;;  %2117 = vmatpush1.bf16.msra.mxu1 %v2141_v4  ;;  %v2192_v42 = vld [vmem:[#allocation3 + $0x164] ss:$8 sps:$4 sm:$0xff]   ;;  %v2194_v43 = vld [vmem:[#allocation3 + $0x60] ss:$8 sps:$4 sm:$0xff]   ;;  %v2196_v45 = vld [vmem:[#allocation3 + $0x74] ss:$8 sps:$4 sm:$0xff]  }
  0x36   :  { %693 = vmatprep.subr.bf16.mxu0 %v2328_v0  ;;  %2102 = vmatprep.subr.bf16.mxu1 %v2328_v0  ;;  %v2195_v44 = vld [vmem:[#allocation3 + $0x160] ss:$8 sps:$4 sm:$0xff]   ;;  %v2198_v46 = vld [vmem:[#allocation3 + $0x174] ss:$8 sps:$4 sm:$0xff]   ;;  %v2200_v47 = vld [vmem:[#allocation3 + $0x70] ss:$8 sps:$4 sm:$0xff]  }
  0x37   :  { %v2201_v48 = vld [vmem:[#allocation3 + $0x170] ss:$8 sps:$4 sm:$0xff]   ;;  %v2202_v49 = vld [vmem:[#allocation3 + $0x84] ss:$8 sps:$4 sm:$0xff]   ;;  %v2206_v51 = vld [vmem:[#allocation3 + $0x80] ss:$8 sps:$4 sm:$0xff]  }
  0x38   :  { %v2204_v50 = vld [vmem:[#allocation3 + $0x184] ss:$8 sps:$4 sm:$0xff]   ;;  %v2207_v52 = vld [vmem:[#allocation3 + $0x180] ss:$8 sps:$4 sm:$0xff]   ;;  %v2208_v53 = vld [vmem:[#allocation3 + $0x94] ss:$8 sps:$4 sm:$0xff]  }
  0x39   :  { %694 = vmatpush1.bf16.msra.mxu0 %v2142_v5  ;;  %2118 = vmatpush1.bf16.msra.mxu1 %v2142_v5  ;;  %v2210_v54 = vld [vmem:[#allocation3 + $0x194] ss:$8 sps:$4 sm:$0xff]   ;;  %v2212_v55 = vld [vmem:[#allocation3 + $0x90] ss:$8 sps:$4 sm:$0xff]   ;;  %v2214_v57 = vld [vmem:[#allocation3 + $0xa4] ss:$8 sps:$4 sm:$0xff]  }
  0x3a   :  { %695 = vmatprep.subr.bf16.mxu0 %v2328_v0  ;;  %2103 = vmatprep.subr.bf16.mxu1 %v2328_v0  ;;  %v2213_v56 = vld [vmem:[#allocation3 + $0x190] ss:$8 sps:$4 sm:$0xff]   ;;  %v2216_v58 = vld [vmem:[#allocation3 + $0x1a4] ss:$8 sps:$4 sm:$0xff]   ;;  %v2218_v59 = vld [vmem:[#allocation3 + $0xa0] ss:$8 sps:$4 sm:$0xff]  }
  0x3b   :  { %v2219_v60 = vld [vmem:[#allocation3 + $0x1a0] ss:$8 sps:$4 sm:$0xff]   ;;  %v2220_v61 = vld [vmem:[#allocation3 + $0xb4] ss:$8 sps:$4 sm:$0xff]   ;;  %v2224_v63 = vld [vmem:[#allocation3 + $0xb0] ss:$8 sps:$4 sm:$0xff]  }
  0x3c   :  { %v2222_v62 = vld [vmem:[#allocation3 + $0x1b4] ss:$8 sps:$4 sm:$0xff]   ;;  %v2226_v1 = vld [vmem:[#allocation3 + $0xc4] ss:$8 sps:$4 sm:$0xff]   ;;  %v2230_v3 = vld [vmem:[#allocation3 + $0xc0] ss:$8 sps:$4 sm:$0xff]  }
  0x3d   :  { %696 = vmatpush1.bf16.msra.mxu0 %v2143_v7  ;;  %2119 = vmatpush1.bf16.msra.mxu1 %v2143_v7  ;;  %v2228_v2 = vld [vmem:[#allocation3 + $0x1c4] ss:$8 sps:$4 sm:$0xff]   ;;  %v2231_v4 = vld [vmem:[#allocation3 + $0x1c0] ss:$8 sps:$4 sm:$0xff]   ;;  %v2232_v5 = vld [vmem:[#allocation3 + $0xd4] ss:$8 sps:$4 sm:$0xff]  }
  0x3e   :  { %697 = vmatprep.subr.bf16.mxu0 %v2328_v0  ;;  %2104 = vmatprep.subr.bf16.mxu1 %v2328_v0  ;;  %v2234_v6 = vld [vmem:[#allocation3 + $0x1d4] ss:$8 sps:$4 sm:$0xff]   ;;  %v2236_v7 = vld [vmem:[#allocation3 + $0xd0] ss:$8 sps:$4 sm:$0xff]  }
  0x3f   :  { %v2237_v8 = vld [vmem:[#allocation3 + $0x1d0] ss:$8 sps:$4 sm:$0xff]  }
  0x41   :  { %698 = vmatpush1.bf16.msra.mxu0 %v2144_v9  ;;  %2120 = vmatpush1.bf16.msra.mxu1 %v2144_v9  ;;  %v2238_v9 = vld [vmem:[#allocation3 + $0xe4] ss:$8 sps:$4 sm:$0xff]  }
  0x42   :  { %699 = vmatprep.subr.bf16.mxu0 %v2328_v0  ;;  %2105 = vmatprep.subr.bf16.mxu1 %v2328_v0 }
  0x45   :  { %700 = vmatpush1.bf16.msra.mxu0 %v2145_v10  ;;  %2121 = vmatpush1.bf16.msra.mxu1 %v2145_v10  ;;  %v2240_v10 = vld [vmem:[#allocation3 + $0x1e4] ss:$8 sps:$4 sm:$0xff]  }
  0x46   :  { %701 = vmatprep.subr.bf16.mxu0 %v2328_v0  ;;  %2106 = vmatprep.subr.bf16.mxu1 %v2328_v0 }
  0x49   :  { %702 = vmatpush1.bf16.msra.mxu0 %v2146_v11  ;;  %2122 = vmatpush1.bf16.msra.mxu1 %v2146_v11  ;;  %v2242_v11 = vld [vmem:[#allocation3 + $0xe0] ss:$8 sps:$4 sm:$0xff]  }
  0x4a   :  { %703 = vmatprep.subr.bf16.mxu0 %v2328_v0  ;;  %2107 = vmatprep.subr.bf16.mxu1 %v2328_v0 }
  0x4d   :  { %704 = vmatpush1.bf16.msra.mxu0 %v2147_v12  ;;  %2123 = vmatpush1.bf16.msra.mxu1 %v2147_v12  ;;  %v2243_v12 = vld [vmem:[#allocation3 + $0x1e0] ss:$8 sps:$4 sm:$0xff]  }
  0x4e   :  { %705 = vmatprep.subr.bf16.mxu0 %v2328_v0  ;;  %2108 = vmatprep.subr.bf16.mxu1 %v2328_v0 }
  0x51   :  { %706 = vmatpush1.bf16.msra.mxu0 %v2148_v13  ;;  %2124 = vmatpush1.bf16.msra.mxu1 %v2148_v13  ;;  %v2244_v13 = vld [vmem:[#allocation3 + $0xf4] ss:$8 sps:$4 sm:$0xff]  }
  0x52   :  { %707 = vmatprep.subr.bf16.mxu0 %v2328_v0  ;;  %2109 = vmatprep.subr.bf16.mxu1 %v2328_v0 }
  0x55   :  { %708 = vmatpush1.bf16.msra.mxu0 %v2149_v14  ;;  %2125 = vmatpush1.bf16.msra.mxu1 %v2149_v14  ;;  %v2246_v14 = vld [vmem:[#allocation3 + $0x1f4] ss:$8 sps:$4 sm:$0xff]  }
  0x56   :  { %709 = vmatprep.subr.bf16.mxu0 %v2328_v0  ;;  %2110 = vmatprep.subr.bf16.mxu1 %v2328_v0 }
  0x59   :  { %710 = vmatpush1.bf16.msra.mxu0 %v2150_v15  ;;  %2126 = vmatpush1.bf16.msra.mxu1 %v2150_v15  ;;  %v2248_v15 = vld [vmem:[#allocation3 + $0xf0] ss:$8 sps:$4 sm:$0xff]  }
  0x5a   :  { %711 = vmatprep.subr.bf16.mxu0 %v2328_v0  ;;  %2111 = vmatprep.subr.bf16.mxu1 %v2328_v0 }
  0x5d   :  { %712 = vmatpush1.bf16.msra.mxu0 %v2151_v16  ;;  %2127 = vmatpush1.bf16.msra.mxu1 %v2151_v16  ;;  %v2249_v16 = vld [vmem:[#allocation3 + $0x1f0] ss:$8 sps:$4 sm:$0xff]  }
  0x5e   :  { %713 = vmatprep.subr.bf16.mxu0 %v2328_v0  ;;  %2112 = vmatprep.subr.bf16.mxu1 %v2328_v0 }
  0x61   :  { %714 = vmatpush1.bf16.msra.mxu0 %v2152_v17  ;;  %2128 = vmatpush1.bf16.msra.mxu1 %v2152_v17 }
  0x62   :  { %715 = vmatprep.subr.bf16.mxu0 %v2328_v0  ;;  %2113 = vmatprep.subr.bf16.mxu1 %v2328_v0  ;;  %v2225_v0 = vld [vmem:[#allocation3 + $0x1b0] ss:$8 sps:$4 sm:$0xff]  }
  0x65   :  { %716 = vmatpush1.bf16.msra.mxu0 %v2153_v18  ;;  %2129 = vmatpush1.bf16.msra.mxu1 %v2153_v18 }
  0x68   :  { %718 = vmatmul.mubr.bf16.vlgmr.msra.gmra.mrb[0].mxu0 %v2154_v19  ;;  %846 = vmatmul.mubr.bf16.vlgmr.msra.gmra.mrb[0].mxu1 %v2157_v20 }
  0x69   :  { %725 = vmatprep.mubr.bf16.mxu0 %v2160_v21  ;;  %853 = vmatprep.mubr.bf16.mxu1 %v2162_v22 }
  0x70   :  { %726 = vmatmul.mubr.bf16.gmra.mrb[4].mxu0 %v2164_v23  ;;  %854 = vmatmul.mubr.bf16.gmra.mrb[4].mxu1 %v2165_v24 }
  0x71   :  { %733 = vmatprep.mubr.bf16.mxu0 %v2166_v25  ;;  %861 = vmatprep.mubr.bf16.mxu1 %v2168_v26 }
  0x78   :  { %734 = vmatmul.mubr.bf16.gmra.mrb[8].mxu0 %v2170_v27  ;;  %862 = vmatmul.mubr.bf16.gmra.mrb[8].mxu1 %v2171_v28 }
  0x79   :  { %741 = vmatprep.mubr.bf16.mxu0 %v2172_v29  ;;  %869 = vmatprep.mubr.bf16.mxu1 %v2174_v30 }
  0x80   :  { %742 = vmatmul.mubr.bf16.gmra.mrb[12].mxu0 %v2176_v31  ;;  %870 = vmatmul.mubr.bf16.gmra.mrb[12].mxu1 %v2177_v32 }
  0x81   :  { %749 = vmatprep.mubr.bf16.mxu0 %v2178_v33  ;;  %877 = vmatprep.mubr.bf16.mxu1 %v2180_v34 }
  0x88   :  { %750 = vmatmul.mubr.bf16.gmra.mrb[16].mxu0 %v2182_v35  ;;  %878 = vmatmul.mubr.bf16.gmra.mrb[16].mxu1 %v2183_v36 }
  0x89   :  { %757 = vmatprep.mubr.bf16.mxu0 %v2184_v37  ;;  %885 = vmatprep.mubr.bf16.mxu1 %v2186_v38 }
  0x90   :  { %758 = vmatmul.mubr.bf16.gmra.mrb[20].mxu0 %v2188_v39  ;;  %886 = vmatmul.mubr.bf16.gmra.mrb[20].mxu1 %v2189_v40 }
  0x91   :  { %765 = vmatprep.mubr.bf16.mxu0 %v2190_v41  ;;  %893 = vmatprep.mubr.bf16.mxu1 %v2192_v42 }
  0x98   :  { %766 = vmatmul.mubr.bf16.gmra.mrb[24].mxu0 %v2194_v43  ;;  %894 = vmatmul.mubr.bf16.gmra.mrb[24].mxu1 %v2195_v44 }
  0x99   :  { %773 = vmatprep.mubr.bf16.mxu0 %v2196_v45  ;;  %901 = vmatprep.mubr.bf16.mxu1 %v2198_v46 }
  0xa0   :  { %774 = vmatmul.mubr.bf16.gmra.mrb[28].mxu0 %v2200_v47  ;;  %902 = vmatmul.mubr.bf16.gmra.mrb[28].mxu1 %v2201_v48 }
  0xa1   :  { %781 = vmatprep.mubr.bf16.mxu0 %v2202_v49  ;;  %909 = vmatprep.mubr.bf16.mxu1 %v2204_v50 }
  0xa8   :  { %782 = vmatmul.mubr.bf16.gmra.mrb[32].mxu0 %v2206_v51  ;;  %910 = vmatmul.mubr.bf16.gmra.mrb[32].mxu1 %v2207_v52 }
  0xa9   :  { %789 = vmatprep.mubr.bf16.mxu0 %v2208_v53  ;;  %917 = vmatprep.mubr.bf16.mxu1 %v2210_v54 }
  0xb0   :  { %790 = vmatmul.mubr.bf16.gmra.mrb[36].mxu0 %v2212_v55  ;;  %918 = vmatmul.mubr.bf16.gmra.mrb[36].mxu1 %v2213_v56 }
  0xb1   :  { %797 = vmatprep.mubr.bf16.mxu0 %v2214_v57  ;;  %925 = vmatprep.mubr.bf16.mxu1 %v2216_v58 }
  0xb8   :  { %798 = vmatmul.mubr.bf16.gmra.mrb[40].mxu0 %v2218_v59  ;;  %926 = vmatmul.mubr.bf16.gmra.mrb[40].mxu1 %v2219_v60 }
  0xb9   :  { %805 = vmatprep.mubr.bf16.mxu0 %v2220_v61  ;;  %933 = vmatprep.mubr.bf16.mxu1 %v2222_v62 }
  0xc0   :  { %806 = vmatmul.mubr.bf16.gmra.mrb[44].mxu0 %v2224_v63  ;;  %934 = vmatmul.mubr.bf16.gmra.mrb[44].mxu1 %v2225_v0 }
  0xc1   :  { %813 = vmatprep.mubr.bf16.mxu0 %v2226_v1  ;;  %941 = vmatprep.mubr.bf16.mxu1 %v2228_v2 }
  0xc8   :  { %814 = vmatmul.mubr.bf16.gmra.mrb[48].mxu0 %v2230_v3  ;;  %942 = vmatmul.mubr.bf16.gmra.mrb[48].mxu1 %v2231_v4 }
  0xc9   :  { %821 = vmatprep.mubr.bf16.mxu0 %v2232_v5  ;;  %949 = vmatprep.mubr.bf16.mxu1 %v2234_v6 }
  0xd0   :  { %822 = vmatmul.mubr.bf16.gmra.mrb[52].mxu0 %v2236_v7  ;;  %950 = vmatmul.mubr.bf16.gmra.mrb[52].mxu1 %v2237_v8 }
  0xd1   :  { %829 = vmatprep.mubr.bf16.mxu0 %v2238_v9  ;;  %957 = vmatprep.mubr.bf16.mxu1 %v2240_v10 }
  0xd8   :  { %830 = vmatmul.mubr.bf16.gmra.mrb[56].mxu0 %v2242_v11  ;;  %958 = vmatmul.mubr.bf16.gmra.mrb[56].mxu1 %v2243_v12 }
  0xd9   :  { %837 = vmatprep.mubr.bf16.mxu0 %v2244_v13  ;;  %965 = vmatprep.mubr.bf16.mxu1 %v2246_v14 }
  0xe0   :  { %838 = vmatmul.mubr.bf16.gmra.mrb[60].mxu0 %v2248_v15  ;;  %966 = vmatmul.mubr.bf16.gmra.mrb[60].mxu1 %v2249_v16 }
 0x13b   :  { %v719_v17 = vpop.f32.mrb[0].mxu0  ;;  %v847_v18 = vpop.f32.mrb[0].mxu1 }
 0x13c   :  { %v1233_v19 = vmul.f32 0.2, %v719_v17  ;;  %v1265_v20 = vmul.f32 0.2, %v847_v18  ;;  %v721_v21 = vpop.f32.mrb[1].mxu0  ;;  %v849_v22 = vpop.f32.mrb[1].mxu1 }
 0x13d   :  { %vm1169_vm0 = vcmp.ge.f32.partialorder %v719_v17, 0.0  ;;  %vm1201_vm1 = vcmp.ge.f32.partialorder %v847_v18, 0.0  ;;  %v722_v23 = vpop.f32.mrb[2].mxu0  ;;  %v850_v24 = vpop.f32.mrb[2].mxu1 }
 0x13e   :  { %vm1170_vm2 = vcmp.ge.f32.partialorder %v722_v23, 0.0  ;;  %v1234_v25 = vmul.f32 0.2, %v722_v23  ;;  %vm1202_vm3 = vcmp.ge.f32.partialorder %v850_v24, 0.0  ;;  %v1266_v26 = vmul.f32 0.2, %v850_v24 }
 0x13f   :  { %v724_v27 = vpop.f32.mrb[3].mxu0  ;;  %v852_v28 = vpop.f32.mrb[3].mxu1  ;;  %v1297_v29 = vsel %vm1169_vm0, %v719_v17, %v1233_v19  ;;  %v1329_v30 = vsel %vm1201_vm1, %v847_v18, %v1265_v20 }
 0x140   :  { %v1298_v31 = vsel %vm1170_vm2, %v722_v23, %v1234_v25  ;;  %v1330_v32 = vsel %vm1202_vm3, %v850_v24, %v1266_v26 }
 0x141   :  { %v1910_v33 = vpack.c.bf16 %v1298_v31, %v1297_v29  ;;  %v1990_v34 = vpack.c.bf16 %v1330_v32, %v1329_v30 }
 0x143   :  { %v727_v35 = vpop.f32.mrb[4].mxu0  ;;  %v855_v36 = vpop.f32.mrb[4].mxu1  ;;  %1911 = vst [vmem:[#allocation8] sm:$0xff] %v1910_v33   ;;  %2082 = vst [vmem:[#allocation8 + $0x80] sm:$0xff] %v1990_v34  }
 0x144   :  { %v1235_v37 = vmul.f32 0.2, %v727_v35  ;;  %v1267_v38 = vmul.f32 0.2, %v855_v36  ;;  %v729_v39 = vpop.f32.mrb[5].mxu0  ;;  %v857_v40 = vpop.f32.mrb[5].mxu1 }
 0x145   :  { %vm1171_vm4 = vcmp.ge.f32.partialorder %v727_v35, 0.0  ;;  %vm1203_vm5 = vcmp.ge.f32.partialorder %v855_v36, 0.0  ;;  %v730_v41 = vpop.f32.mrb[6].mxu0  ;;  %v858_v42 = vpop.f32.mrb[6].mxu1 }
 0x146   :  { %vm1172_vm6 = vcmp.ge.f32.partialorder %v730_v41, 0.0  ;;  %v1236_v43 = vmul.f32 0.2, %v730_v41  ;;  %vm1204_vm7 = vcmp.ge.f32.partialorder %v858_v42, 0.0  ;;  %v1268_v44 = vmul.f32 0.2, %v858_v42 }
 0x147   :  { %v732_v45 = vpop.f32.mrb[7].mxu0  ;;  %v860_v46 = vpop.f32.mrb[7].mxu1  ;;  %v1299_v47 = vsel %vm1171_vm4, %v727_v35, %v1235_v37  ;;  %v1331_v48 = vsel %vm1203_vm5, %v855_v36, %v1267_v38 }
 0x148   :  { %v1300_v49 = vsel %vm1172_vm6, %v730_v41, %v1236_v43  ;;  %v1332_v50 = vsel %vm1204_vm7, %v858_v42, %v1268_v44 }
 0x149   :  { %v1915_v51 = vpack.c.bf16 %v1300_v49, %v1299_v47  ;;  %v1995_v52 = vpack.c.bf16 %v1332_v50, %v1331_v48 }
 0x14b   :  { %v735_v53 = vpop.f32.mrb[8].mxu0  ;;  %v863_v54 = vpop.f32.mrb[8].mxu1  ;;  %2067 = vst [vmem:[#allocation8 + $0x8] sm:$0xff] %v1915_v51   ;;  %2083 = vst [vmem:[#allocation8 + $0x88] sm:$0xff] %v1995_v52  }
 0x14c   :  { %v1237_v55 = vmul.f32 0.2, %v735_v53  ;;  %v1269_v56 = vmul.f32 0.2, %v863_v54  ;;  %v737_v57 = vpop.f32.mrb[9].mxu0  ;;  %v865_v58 = vpop.f32.mrb[9].mxu1 }
 0x14d   :  { %vm1173_vm8 = vcmp.ge.f32.partialorder %v735_v53, 0.0  ;;  %vm1205_vm9 = vcmp.ge.f32.partialorder %v863_v54, 0.0  ;;  %v738_v59 = vpop.f32.mrb[10].mxu0  ;;  %v866_v60 = vpop.f32.mrb[10].mxu1 }
 0x14e   :  { %vm1174_vm10 = vcmp.ge.f32.partialorder %v738_v59, 0.0  ;;  %v1238_v61 = vmul.f32 0.2, %v738_v59  ;;  %vm1206_vm11 = vcmp.ge.f32.partialorder %v866_v60, 0.0  ;;  %v1270_v62 = vmul.f32 0.2, %v866_v60 }
 0x14f   :  { %v740_v63 = vpop.f32.mrb[11].mxu0  ;;  %v868_v0 = vpop.f32.mrb[11].mxu1  ;;  %v1301_v1 = vsel %vm1173_vm8, %v735_v53, %v1237_v55  ;;  %v1333_v2 = vsel %vm1205_vm9, %v863_v54, %v1269_v56 }
 0x150   :  { %v1302_v3 = vsel %vm1174_vm10, %v738_v59, %v1238_v61  ;;  %v1334_v4 = vsel %vm1206_vm11, %v866_v60, %v1270_v62 }
 0x151   :  { %v1920_v5 = vpack.c.bf16 %v1302_v3, %v1301_v1  ;;  %v2000_v6 = vpack.c.bf16 %v1334_v4, %v1333_v2 }
 0x153   :  { %v743_v7 = vpop.f32.mrb[12].mxu0  ;;  %v871_v8 = vpop.f32.mrb[12].mxu1  ;;  %2068 = vst [vmem:[#allocation8 + $0x10] sm:$0xff] %v1920_v5   ;;  %2084 = vst [vmem:[#allocation8 + $0x90] sm:$0xff] %v2000_v6  }
 0x154   :  { %v1239_v9 = vmul.f32 0.2, %v743_v7  ;;  %v1271_v10 = vmul.f32 0.2, %v871_v8  ;;  %v745_v11 = vpop.f32.mrb[13].mxu0  ;;  %v873_v12 = vpop.f32.mrb[13].mxu1 }
 0x155   :  { %vm1175_vm12 = vcmp.ge.f32.partialorder %v743_v7, 0.0  ;;  %vm1207_vm13 = vcmp.ge.f32.partialorder %v871_v8, 0.0  ;;  %v746_v13 = vpop.f32.mrb[14].mxu0  ;;  %v874_v14 = vpop.f32.mrb[14].mxu1 }
 0x156   :  { %vm1176_vm14 = vcmp.ge.f32.partialorder %v746_v13, 0.0  ;;  %v1240_v15 = vmul.f32 0.2, %v746_v13  ;;  %vm1208_vm15 = vcmp.ge.f32.partialorder %v874_v14, 0.0  ;;  %v1272_v16 = vmul.f32 0.2, %v874_v14 }
 0x157   :  { %v748_v17 = vpop.f32.mrb[15].mxu0  ;;  %v876_v18 = vpop.f32.mrb[15].mxu1  ;;  %v1303_v19 = vsel %vm1175_vm12, %v743_v7, %v1239_v9  ;;  %v1335_v20 = vsel %vm1207_vm13, %v871_v8, %v1271_v10 }
 0x158   :  { %v1304_v21 = vsel %vm1176_vm14, %v746_v13, %v1240_v15  ;;  %v1336_v22 = vsel %vm1208_vm15, %v874_v14, %v1272_v16 }
 0x159   :  { %v1925_v23 = vpack.c.bf16 %v1304_v21, %v1303_v19  ;;  %v2005_v24 = vpack.c.bf16 %v1336_v22, %v1335_v20 }
 0x15b   :  { %v751_v25 = vpop.f32.mrb[16].mxu0  ;;  %v879_v26 = vpop.f32.mrb[16].mxu1  ;;  %2069 = vst [vmem:[#allocation8 + $0x18] sm:$0xff] %v1925_v23   ;;  %2085 = vst [vmem:[#allocation8 + $0x98] sm:$0xff] %v2005_v24  }
 0x15c   :  { %v1241_v27 = vmul.f32 0.2, %v751_v25  ;;  %v1273_v28 = vmul.f32 0.2, %v879_v26  ;;  %v753_v29 = vpop.f32.mrb[17].mxu0  ;;  %v881_v30 = vpop.f32.mrb[17].mxu1 }
 0x15d   :  { %vm1177_vm0 = vcmp.ge.f32.partialorder %v751_v25, 0.0  ;;  %vm1209_vm1 = vcmp.ge.f32.partialorder %v879_v26, 0.0  ;;  %v754_v31 = vpop.f32.mrb[18].mxu0  ;;  %v882_v32 = vpop.f32.mrb[18].mxu1 }
 0x15e   :  { %vm1178_vm2 = vcmp.ge.f32.partialorder %v754_v31, 0.0  ;;  %v1242_v33 = vmul.f32 0.2, %v754_v31  ;;  %vm1210_vm3 = vcmp.ge.f32.partialorder %v882_v32, 0.0  ;;  %v1274_v34 = vmul.f32 0.2, %v882_v32 }
 0x15f   :  { %v756_v35 = vpop.f32.mrb[19].mxu0  ;;  %v884_v36 = vpop.f32.mrb[19].mxu1  ;;  %v1305_v37 = vsel %vm1177_vm0, %v751_v25, %v1241_v27  ;;  %v1337_v38 = vsel %vm1209_vm1, %v879_v26, %v1273_v28 }
 0x160   :  { %v1306_v39 = vsel %vm1178_vm2, %v754_v31, %v1242_v33  ;;  %v1338_v40 = vsel %vm1210_vm3, %v882_v32, %v1274_v34 }
 0x161   :  { %v1930_v41 = vpack.c.bf16 %v1306_v39, %v1305_v37  ;;  %v2010_v42 = vpack.c.bf16 %v1338_v40, %v1337_v38 }
 0x163   :  { %v759_v43 = vpop.f32.mrb[20].mxu0  ;;  %v887_v44 = vpop.f32.mrb[20].mxu1  ;;  %2070 = vst [vmem:[#allocation8 + $0x20] sm:$0xff] %v1930_v41   ;;  %2086 = vst [vmem:[#allocation8 + $0xa0] sm:$0xff] %v2010_v42  }
 0x164   :  { %v1243_v45 = vmul.f32 0.2, %v759_v43  ;;  %v1275_v46 = vmul.f32 0.2, %v887_v44  ;;  %v761_v47 = vpop.f32.mrb[21].mxu0  ;;  %v889_v48 = vpop.f32.mrb[21].mxu1 }
 0x165   :  { %vm1179_vm4 = vcmp.ge.f32.partialorder %v759_v43, 0.0  ;;  %vm1211_vm5 = vcmp.ge.f32.partialorder %v887_v44, 0.0  ;;  %v762_v49 = vpop.f32.mrb[22].mxu0  ;;  %v890_v50 = vpop.f32.mrb[22].mxu1 }
 0x166   :  { %vm1180_vm6 = vcmp.ge.f32.partialorder %v762_v49, 0.0  ;;  %v1244_v51 = vmul.f32 0.2, %v762_v49  ;;  %vm1212_vm7 = vcmp.ge.f32.partialorder %v890_v50, 0.0  ;;  %v1276_v52 = vmul.f32 0.2, %v890_v50 }
 0x167   :  { %v764_v53 = vpop.f32.mrb[23].mxu0  ;;  %v892_v54 = vpop.f32.mrb[23].mxu1  ;;  %v1307_v55 = vsel %vm1179_vm4, %v759_v43, %v1243_v45  ;;  %v1339_v56 = vsel %vm1211_vm5, %v887_v44, %v1275_v46 }
 0x168   :  { %v1308_v57 = vsel %vm1180_vm6, %v762_v49, %v1244_v51  ;;  %v1340_v58 = vsel %vm1212_vm7, %v890_v50, %v1276_v52 }
 0x169   :  { %v1935_v59 = vpack.c.bf16 %v1308_v57, %v1307_v55  ;;  %v2015_v60 = vpack.c.bf16 %v1340_v58, %v1339_v56 }
 0x16b   :  { %v767_v61 = vpop.f32.mrb[24].mxu0  ;;  %v895_v62 = vpop.f32.mrb[24].mxu1  ;;  %2071 = vst [vmem:[#allocation8 + $0x28] sm:$0xff] %v1935_v59   ;;  %2087 = vst [vmem:[#allocation8 + $0xa8] sm:$0xff] %v2015_v60  }
 0x16c   :  { %v1245_v63 = vmul.f32 0.2, %v767_v61  ;;  %v1277_v0 = vmul.f32 0.2, %v895_v62  ;;  %v769_v1 = vpop.f32.mrb[25].mxu0  ;;  %v897_v2 = vpop.f32.mrb[25].mxu1 }
 0x16d   :  { %vm1181_vm8 = vcmp.ge.f32.partialorder %v767_v61, 0.0  ;;  %vm1213_vm9 = vcmp.ge.f32.partialorder %v895_v62, 0.0  ;;  %v770_v3 = vpop.f32.mrb[26].mxu0  ;;  %v898_v4 = vpop.f32.mrb[26].mxu1 }
 0x16e   :  { %vm1182_vm10 = vcmp.ge.f32.partialorder %v770_v3, 0.0  ;;  %v1246_v5 = vmul.f32 0.2, %v770_v3  ;;  %vm1214_vm11 = vcmp.ge.f32.partialorder %v898_v4, 0.0  ;;  %v1278_v6 = vmul.f32 0.2, %v898_v4 }
 0x16f   :  { %v772_v7 = vpop.f32.mrb[27].mxu0  ;;  %v900_v8 = vpop.f32.mrb[27].mxu1  ;;  %v1309_v9 = vsel %vm1181_vm8, %v767_v61, %v1245_v63  ;;  %v1341_v10 = vsel %vm1213_vm9, %v895_v62, %v1277_v0 }
 0x170   :  { %v1310_v11 = vsel %vm1182_vm10, %v770_v3, %v1246_v5  ;;  %v1342_v12 = vsel %vm1214_vm11, %v898_v4, %v1278_v6 }
 0x171   :  { %v1940_v13 = vpack.c.bf16 %v1310_v11, %v1309_v9  ;;  %v2020_v14 = vpack.c.bf16 %v1342_v12, %v1341_v10 }
 0x173   :  { %v775_v15 = vpop.f32.mrb[28].mxu0  ;;  %v903_v16 = vpop.f32.mrb[28].mxu1  ;;  %2072 = vst [vmem:[#allocation8 + $0x30] sm:$0xff] %v1940_v13   ;;  %2088 = vst [vmem:[#allocation8 + $0xb0] sm:$0xff] %v2020_v14  }
 0x174   :  { %v1247_v17 = vmul.f32 0.2, %v775_v15  ;;  %v1279_v18 = vmul.f32 0.2, %v903_v16  ;;  %v777_v19 = vpop.f32.mrb[29].mxu0  ;;  %v905_v20 = vpop.f32.mrb[29].mxu1 }
 0x175   :  { %vm1183_vm12 = vcmp.ge.f32.partialorder %v775_v15, 0.0  ;;  %vm1215_vm13 = vcmp.ge.f32.partialorder %v903_v16, 0.0  ;;  %v778_v21 = vpop.f32.mrb[30].mxu0  ;;  %v906_v22 = vpop.f32.mrb[30].mxu1 }
 0x176   :  { %vm1184_vm14 = vcmp.ge.f32.partialorder %v778_v21, 0.0  ;;  %v1248_v23 = vmul.f32 0.2, %v778_v21  ;;  %vm1216_vm15 = vcmp.ge.f32.partialorder %v906_v22, 0.0  ;;  %v1280_v24 = vmul.f32 0.2, %v906_v22 }
 0x177   :  { %v780_v25 = vpop.f32.mrb[31].mxu0  ;;  %v908_v26 = vpop.f32.mrb[31].mxu1  ;;  %v1311_v27 = vsel %vm1183_vm12, %v775_v15, %v1247_v17  ;;  %v1343_v28 = vsel %vm1215_vm13, %v903_v16, %v1279_v18 }
 0x178   :  { %v1312_v29 = vsel %vm1184_vm14, %v778_v21, %v1248_v23  ;;  %v1344_v30 = vsel %vm1216_vm15, %v906_v22, %v1280_v24 }
 0x179   :  { %v1945_v31 = vpack.c.bf16 %v1312_v29, %v1311_v27  ;;  %v2025_v32 = vpack.c.bf16 %v1344_v30, %v1343_v28 }
 0x17b   :  { %v783_v33 = vpop.f32.mrb[32].mxu0  ;;  %v911_v34 = vpop.f32.mrb[32].mxu1  ;;  %2073 = vst [vmem:[#allocation8 + $0x38] sm:$0xff] %v1945_v31   ;;  %2089 = vst [vmem:[#allocation8 + $0xb8] sm:$0xff] %v2025_v32  }
 0x17c   :  { %v1249_v35 = vmul.f32 0.2, %v783_v33  ;;  %v1281_v36 = vmul.f32 0.2, %v911_v34  ;;  %v785_v37 = vpop.f32.mrb[33].mxu0  ;;  %v913_v38 = vpop.f32.mrb[33].mxu1 }
 0x17d   :  { %vm1185_vm0 = vcmp.ge.f32.partialorder %v783_v33, 0.0  ;;  %vm1217_vm1 = vcmp.ge.f32.partialorder %v911_v34, 0.0  ;;  %v786_v39 = vpop.f32.mrb[34].mxu0  ;;  %v914_v40 = vpop.f32.mrb[34].mxu1 }
 0x17e   :  { %vm1186_vm2 = vcmp.ge.f32.partialorder %v786_v39, 0.0  ;;  %v1250_v41 = vmul.f32 0.2, %v786_v39  ;;  %vm1218_vm3 = vcmp.ge.f32.partialorder %v914_v40, 0.0  ;;  %v1282_v42 = vmul.f32 0.2, %v914_v40 }
 0x17f   :  { %v788_v43 = vpop.f32.mrb[35].mxu0  ;;  %v916_v44 = vpop.f32.mrb[35].mxu1  ;;  %v1313_v45 = vsel %vm1185_vm0, %v783_v33, %v1249_v35  ;;  %v1345_v46 = vsel %vm1217_vm1, %v911_v34, %v1281_v36 }
 0x180   :  { %v1314_v47 = vsel %vm1186_vm2, %v786_v39, %v1250_v41  ;;  %v1346_v48 = vsel %vm1218_vm3, %v914_v40, %v1282_v42 }
 0x181   :  { %v1950_v49 = vpack.c.bf16 %v1314_v47, %v1313_v45  ;;  %v2030_v50 = vpack.c.bf16 %v1346_v48, %v1345_v46 }
 0x183   :  { %v791_v51 = vpop.f32.mrb[36].mxu0  ;;  %v919_v52 = vpop.f32.mrb[36].mxu1  ;;  %2074 = vst [vmem:[#allocation8 + $0x40] sm:$0xff] %v1950_v49   ;;  %2090 = vst [vmem:[#allocation8 + $0xc0] sm:$0xff] %v2030_v50  }
 0x184   :  { %v1251_v53 = vmul.f32 0.2, %v791_v51  ;;  %v1283_v54 = vmul.f32 0.2, %v919_v52  ;;  %v793_v55 = vpop.f32.mrb[37].mxu0  ;;  %v921_v56 = vpop.f32.mrb[37].mxu1 }
 0x185   :  { %vm1187_vm4 = vcmp.ge.f32.partialorder %v791_v51, 0.0  ;;  %vm1219_vm5 = vcmp.ge.f32.partialorder %v919_v52, 0.0  ;;  %v794_v57 = vpop.f32.mrb[38].mxu0  ;;  %v922_v58 = vpop.f32.mrb[38].mxu1 }
 0x186   :  { %vm1188_vm6 = vcmp.ge.f32.partialorder %v794_v57, 0.0  ;;  %v1252_v59 = vmul.f32 0.2, %v794_v57  ;;  %vm1220_vm7 = vcmp.ge.f32.partialorder %v922_v58, 0.0  ;;  %v1284_v60 = vmul.f32 0.2, %v922_v58 }
 0x187   :  { %v796_v61 = vpop.f32.mrb[39].mxu0  ;;  %v924_v62 = vpop.f32.mrb[39].mxu1  ;;  %v1315_v63 = vsel %vm1187_vm4, %v791_v51, %v1251_v53  ;;  %v1347_v0 = vsel %vm1219_vm5, %v919_v52, %v1283_v54 }
 0x188   :  { %v1316_v1 = vsel %vm1188_vm6, %v794_v57, %v1252_v59  ;;  %v1348_v2 = vsel %vm1220_vm7, %v922_v58, %v1284_v60 }
 0x189   :  { %v1955_v3 = vpack.c.bf16 %v1316_v1, %v1315_v63  ;;  %v2035_v4 = vpack.c.bf16 %v1348_v2, %v1347_v0 }
 0x18b   :  { %v799_v5 = vpop.f32.mrb[40].mxu0  ;;  %v927_v6 = vpop.f32.mrb[40].mxu1  ;;  %2075 = vst [vmem:[#allocation8 + $0x48] sm:$0xff] %v1955_v3   ;;  %2091 = vst [vmem:[#allocation8 + $0xc8] sm:$0xff] %v2035_v4  }
 0x18c   :  { %v1253_v7 = vmul.f32 0.2, %v799_v5  ;;  %v1285_v8 = vmul.f32 0.2, %v927_v6  ;;  %v801_v9 = vpop.f32.mrb[41].mxu0  ;;  %v929_v10 = vpop.f32.mrb[41].mxu1 }
 0x18d   :  { %vm1189_vm8 = vcmp.ge.f32.partialorder %v799_v5, 0.0  ;;  %vm1221_vm9 = vcmp.ge.f32.partialorder %v927_v6, 0.0  ;;  %v802_v11 = vpop.f32.mrb[42].mxu0  ;;  %v930_v12 = vpop.f32.mrb[42].mxu1 }
 0x18e   :  { %vm1190_vm10 = vcmp.ge.f32.partialorder %v802_v11, 0.0  ;;  %v1254_v13 = vmul.f32 0.2, %v802_v11  ;;  %vm1222_vm11 = vcmp.ge.f32.partialorder %v930_v12, 0.0  ;;  %v1286_v14 = vmul.f32 0.2, %v930_v12 }
 0x18f   :  { %v804_v15 = vpop.f32.mrb[43].mxu0  ;;  %v932_v16 = vpop.f32.mrb[43].mxu1  ;;  %v1317_v17 = vsel %vm1189_vm8, %v799_v5, %v1253_v7  ;;  %v1349_v18 = vsel %vm1221_vm9, %v927_v6, %v1285_v8 }
 0x190   :  { %v1318_v19 = vsel %vm1190_vm10, %v802_v11, %v1254_v13  ;;  %v1350_v20 = vsel %vm1222_vm11, %v930_v12, %v1286_v14 }
 0x191   :  { %v1960_v21 = vpack.c.bf16 %v1318_v19, %v1317_v17  ;;  %v2040_v22 = vpack.c.bf16 %v1350_v20, %v1349_v18 }
 0x193   :  { %v807_v23 = vpop.f32.mrb[44].mxu0  ;;  %v935_v24 = vpop.f32.mrb[44].mxu1  ;;  %2076 = vst [vmem:[#allocation8 + $0x50] sm:$0xff] %v1960_v21   ;;  %2092 = vst [vmem:[#allocation8 + $0xd0] sm:$0xff] %v2040_v22  }
 0x194   :  { %v1255_v25 = vmul.f32 0.2, %v807_v23  ;;  %v1287_v26 = vmul.f32 0.2, %v935_v24  ;;  %v809_v27 = vpop.f32.mrb[45].mxu0  ;;  %v937_v28 = vpop.f32.mrb[45].mxu1 }
 0x195   :  { %vm1191_vm12 = vcmp.ge.f32.partialorder %v807_v23, 0.0  ;;  %vm1223_vm13 = vcmp.ge.f32.partialorder %v935_v24, 0.0  ;;  %v810_v29 = vpop.f32.mrb[46].mxu0  ;;  %v938_v30 = vpop.f32.mrb[46].mxu1 }
 0x196   :  { %vm1192_vm14 = vcmp.ge.f32.partialorder %v810_v29, 0.0  ;;  %v1256_v31 = vmul.f32 0.2, %v810_v29  ;;  %vm1224_vm15 = vcmp.ge.f32.partialorder %v938_v30, 0.0  ;;  %v1288_v32 = vmul.f32 0.2, %v938_v30 }
 0x197   :  { %v812_v33 = vpop.f32.mrb[47].mxu0  ;;  %v940_v34 = vpop.f32.mrb[47].mxu1  ;;  %v1319_v35 = vsel %vm1191_vm12, %v807_v23, %v1255_v25  ;;  %v1351_v36 = vsel %vm1223_vm13, %v935_v24, %v1287_v26 }
 0x198   :  { %v1320_v37 = vsel %vm1192_vm14, %v810_v29, %v1256_v31  ;;  %v1352_v38 = vsel %vm1224_vm15, %v938_v30, %v1288_v32 }
 0x199   :  { %v1965_v39 = vpack.c.bf16 %v1320_v37, %v1319_v35  ;;  %v2045_v40 = vpack.c.bf16 %v1352_v38, %v1351_v36 }
 0x19b   :  { %v815_v41 = vpop.f32.mrb[48].mxu0  ;;  %v943_v42 = vpop.f32.mrb[48].mxu1  ;;  %2077 = vst [vmem:[#allocation8 + $0x58] sm:$0xff] %v1965_v39   ;;  %2093 = vst [vmem:[#allocation8 + $0xd8] sm:$0xff] %v2045_v40  }
 0x19c   :  { %v1257_v43 = vmul.f32 0.2, %v815_v41  ;;  %v1289_v44 = vmul.f32 0.2, %v943_v42  ;;  %v817_v45 = vpop.f32.mrb[49].mxu0  ;;  %v945_v46 = vpop.f32.mrb[49].mxu1 }
 0x19d   :  { %vm1193_vm0 = vcmp.ge.f32.partialorder %v815_v41, 0.0  ;;  %vm1225_vm1 = vcmp.ge.f32.partialorder %v943_v42, 0.0  ;;  %v818_v47 = vpop.f32.mrb[50].mxu0  ;;  %v946_v48 = vpop.f32.mrb[50].mxu1 }
 0x19e   :  { %vm1194_vm2 = vcmp.ge.f32.partialorder %v818_v47, 0.0  ;;  %v1258_v49 = vmul.f32 0.2, %v818_v47  ;;  %vm1226_vm3 = vcmp.ge.f32.partialorder %v946_v48, 0.0  ;;  %v1290_v50 = vmul.f32 0.2, %v946_v48 }
 0x19f   :  { %v820_v51 = vpop.f32.mrb[51].mxu0  ;;  %v948_v52 = vpop.f32.mrb[51].mxu1  ;;  %v1321_v53 = vsel %vm1193_vm0, %v815_v41, %v1257_v43  ;;  %v1353_v54 = vsel %vm1225_vm1, %v943_v42, %v1289_v44 }
 0x1a0   :  { %v1322_v55 = vsel %vm1194_vm2, %v818_v47, %v1258_v49  ;;  %v1354_v56 = vsel %vm1226_vm3, %v946_v48, %v1290_v50 }
 0x1a1   :  { %v1970_v57 = vpack.c.bf16 %v1322_v55, %v1321_v53  ;;  %v2050_v58 = vpack.c.bf16 %v1354_v56, %v1353_v54 }
 0x1a3   :  { %v823_v59 = vpop.f32.mrb[52].mxu0  ;;  %v951_v60 = vpop.f32.mrb[52].mxu1  ;;  %2078 = vst [vmem:[#allocation8 + $0x60] sm:$0xff] %v1970_v57   ;;  %2094 = vst [vmem:[#allocation8 + $0xe0] sm:$0xff] %v2050_v58  }
 0x1a4   :  { %v1259_v61 = vmul.f32 0.2, %v823_v59  ;;  %v1291_v62 = vmul.f32 0.2, %v951_v60  ;;  %v825_v63 = vpop.f32.mrb[53].mxu0  ;;  %v953_v0 = vpop.f32.mrb[53].mxu1 }
 0x1a5   :  { %vm1195_vm4 = vcmp.ge.f32.partialorder %v823_v59, 0.0  ;;  %vm1227_vm5 = vcmp.ge.f32.partialorder %v951_v60, 0.0  ;;  %v826_v1 = vpop.f32.mrb[54].mxu0  ;;  %v954_v2 = vpop.f32.mrb[54].mxu1 }
 0x1a6   :  { %vm1196_vm6 = vcmp.ge.f32.partialorder %v826_v1, 0.0  ;;  %v1260_v3 = vmul.f32 0.2, %v826_v1  ;;  %vm1228_vm7 = vcmp.ge.f32.partialorder %v954_v2, 0.0  ;;  %v1292_v4 = vmul.f32 0.2, %v954_v2 }
 0x1a7   :  { %v828_v5 = vpop.f32.mrb[55].mxu0  ;;  %v956_v6 = vpop.f32.mrb[55].mxu1  ;;  %v1323_v7 = vsel %vm1195_vm4, %v823_v59, %v1259_v61  ;;  %v1355_v8 = vsel %vm1227_vm5, %v951_v60, %v1291_v62 }
 0x1a8   :  { %v1324_v9 = vsel %vm1196_vm6, %v826_v1, %v1260_v3  ;;  %v1356_v10 = vsel %vm1228_vm7, %v954_v2, %v1292_v4 }
 0x1a9   :  { %v1975_v11 = vpack.c.bf16 %v1324_v9, %v1323_v7  ;;  %v2055_v12 = vpack.c.bf16 %v1356_v10, %v1355_v8 }
 0x1ab   :  { %v831_v13 = vpop.f32.mrb[56].mxu0  ;;  %v959_v14 = vpop.f32.mrb[56].mxu1  ;;  %2079 = vst [vmem:[#allocation8 + $0x68] sm:$0xff] %v1975_v11   ;;  %2095 = vst [vmem:[#allocation8 + $0xe8] sm:$0xff] %v2055_v12  }
 0x1ac   :  { %v1261_v15 = vmul.f32 0.2, %v831_v13  ;;  %v1293_v16 = vmul.f32 0.2, %v959_v14  ;;  %v833_v17 = vpop.f32.mrb[57].mxu0  ;;  %v961_v18 = vpop.f32.mrb[57].mxu1 }
 0x1ad   :  { %vm1197_vm8 = vcmp.ge.f32.partialorder %v831_v13, 0.0  ;;  %vm1229_vm9 = vcmp.ge.f32.partialorder %v959_v14, 0.0  ;;  %v834_v19 = vpop.f32.mrb[58].mxu0  ;;  %v962_v20 = vpop.f32.mrb[58].mxu1 }
 0x1ae   :  { %vm1198_vm10 = vcmp.ge.f32.partialorder %v834_v19, 0.0  ;;  %v1262_v21 = vmul.f32 0.2, %v834_v19  ;;  %vm1230_vm11 = vcmp.ge.f32.partialorder %v962_v20, 0.0  ;;  %v1294_v22 = vmul.f32 0.2, %v962_v20 }
 0x1af   :  { %v836_v23 = vpop.f32.mrb[59].mxu0  ;;  %v964_v24 = vpop.f32.mrb[59].mxu1  ;;  %v1325_v25 = vsel %vm1197_vm8, %v831_v13, %v1261_v15  ;;  %v1357_v26 = vsel %vm1229_vm9, %v959_v14, %v1293_v16 }
 0x1b0   :  { %v1326_v27 = vsel %vm1198_vm10, %v834_v19, %v1262_v21  ;;  %v1358_v28 = vsel %vm1230_vm11, %v962_v20, %v1294_v22 }
 0x1b1   :  { %v1980_v29 = vpack.c.bf16 %v1326_v27, %v1325_v25  ;;  %v2060_v30 = vpack.c.bf16 %v1358_v28, %v1357_v26 }
 0x1b3   :  { %v839_v31 = vpop.f32.mrb[60].mxu0  ;;  %v967_v32 = vpop.f32.mrb[60].mxu1  ;;  %2080 = vst [vmem:[#allocation8 + $0x70] sm:$0xff] %v1980_v29   ;;  %2096 = vst [vmem:[#allocation8 + $0xf0] sm:$0xff] %v2060_v30  }
 0x1b4   :  { %v1263_v33 = vmul.f32 0.2, %v839_v31  ;;  %v1295_v34 = vmul.f32 0.2, %v967_v32  ;;  %v841_v35 = vpop.f32.mrb[61].mxu0  ;;  %v969_v36 = vpop.f32.mrb[61].mxu1 }
 0x1b5   :  { %vm1199_vm12 = vcmp.ge.f32.partialorder %v839_v31, 0.0  ;;  %vm1231_vm13 = vcmp.ge.f32.partialorder %v967_v32, 0.0  ;;  %v842_v37 = vpop.f32.mrb[62].mxu0  ;;  %v970_v38 = vpop.f32.mrb[62].mxu1 }
 0x1b6   :  { %vm1200_vm14 = vcmp.ge.f32.partialorder %v842_v37, 0.0  ;;  %v1264_v39 = vmul.f32 0.2, %v842_v37  ;;  %vm1232_vm15 = vcmp.ge.f32.partialorder %v970_v38, 0.0  ;;  %v1296_v40 = vmul.f32 0.2, %v970_v38 }
 0x1b7   :  { %v844_v41 = vpop.f32.mrb[63].mxu0  ;;  %v972_v42 = vpop.f32.mrb[63].mxu1  ;;  %v1327_v43 = vsel %vm1199_vm12, %v839_v31, %v1263_v33  ;;  %v1359_v44 = vsel %vm1231_vm13, %v967_v32, %v1295_v34 }
 0x1b8   :  { %v1328_v45 = vsel %vm1200_vm14, %v842_v37, %v1264_v39  ;;  %v1360_v46 = vsel %vm1232_vm15, %v970_v38, %v1296_v40 }
 0x1b9   :  { %v1985_v47 = vpack.c.bf16 %v1328_v45, %v1327_v43  ;;  %v2065_v48 = vpack.c.bf16 %v1360_v46, %v1359_v44 }
 0x1bb   :  { %2081 = vst [vmem:[#allocation8 + $0x78] sm:$0xff] %v1985_v47   ;;  %2097 = vst [vmem:[#allocation8 + $0xf8] sm:$0xff] %v2065_v48  }
 0x1bc   :  { %2305 = shalt.err (!%p2302_p6)
}
 0x1bd   :  { %s2306_s12 = scalar_lea.hbm %s2421_s2, 4096 }
 0x1be   :  { %p2307_p7 = scmp.ne.s32.totalorder %s2421_s2, %s2306_s12  ;;  %p2310_p8 = scmp.lt.u32.totalorder %s2306_s12, %s2421_s2 }
 0x1c0   :  { %p2312_p9 = pnand %p2310_p8, %p2307_p7 }
 0x1c2   :  { %2315 = shalt.err (!%p2312_p9)
}
 0x1c3   :  { %1692 = dma.vmem_to_hbm [thread:$0]  %s1687_s8, 4096, %s2421_s2, [#allocation5], %s2326_s0, %s2326_s0, %s2327_s5  }
 0x1c4   :  { %2320 = dma.done.wait [#allocation5], 4096  }
 0x1c5   :  { %2321 = vsyncadd [#allocation5], 4294963200 }
 0x1c6   :  { %1696 = vsyncpa [#allocation4], 1 }
 0x1c7   :  { %1697 = vsyncpa [#allocation7], 1 }
 0x1c8   :  { %1698 = vsyncpa [#allocation5], 1 }

// kernel: _forward.6
= control target key start
LH: loop header
LB: loop body
LE: loop exit
PB: predicated region body
PF: predicated region fallthrough
CT: control target
= control target key end

     0   :  { %7 = vsyncpa [#allocation4], 0  ;;  %s1410_s0 = inlined_call_operand.hbm [shape: bf16[128,512], index: 0, kind: input, shape index: {}]   ;;  %s1411_s1 = inlined_call_operand.hbm [shape: bf16[512,128], index: 1, kind: input, shape index: {}]   ;;  %s1412_s2 = inlined_call_operand.hbm [shape: bf16[128,128], index: 2, kind: output, shape index: {}]  }
   0x1   :  { %8 = vsyncpa [#allocation7], 0 }
   0x2   :  { %9 = vsyncpa [#allocation5], 0  ;;  %s1346_s9 = smov [#allocation3]   ;;  %s1274_s13 = scalar_lea.hbm %s1410_s0, 4096 }
   0x3   :  { %s15_s10 = sshll.u32 %s1346_s9, 4  ;;  %p1275_p0 = scmp.ne.s32.totalorder %s1410_s0, %s1274_s13  ;;  %s16_s10 = int_to_ptr.vmem [resolvable:$true] %s15_s10 }
   0x4   :  { %p1278_p1 = scmp.lt.u32.totalorder %s1274_s13, %s1410_s0 }
   0x6   :  { %p1280_p2 = pnand %p1278_p1, %p1275_p0 }
   0x8   :  { %1283 = shalt.err (!%p1280_p2)
}
   0x9   :  { %s1284_s18 = scalar_lea.vmem %s16_s10, 4096  ;;  %p1289_p4 = scmp.lt.s32.totalorder %s16_s10, %s16_s10 }
   0xa   :  { %p1285_p3 = scmp.ne.s32.totalorder %s16_s10, %s1284_s18  ;;  %p1290_p5 = scmp.lt.s32.totalorder %s1284_s18, %s1284_s18 }
   0xc   :  { %p1291_p6 = por %p1290_p5, %p1289_p4 }
   0xe   :  { %p1292_p7 = pnand %p1291_p6, %p1285_p3 }
  0x10   :  { %1295 = shalt.err (!%p1292_p7)
}
  0x11   :  { %s1347_s19 = smov 256   ;;  %s1348_s20 = smov 16  }
  0x12   :  { %21 = dma.hbm_to_vmem [thread:$0]  %s1410_s0, 4096, %s16_s10, [#allocation4], %s1347_s19, %s1347_s19, %s1348_s20  }
  0x13   :  { %s1349_s23 = smov [#allocation6]   ;;  %s1296_s27 = scalar_lea.hbm %s1411_s1, 4096 }
  0x14   :  { %s27_s24 = sshll.u32 %s1349_s23, 4  ;;  %p1297_p8 = scmp.ne.s32.totalorder %s1411_s1, %s1296_s27  ;;  %s28_s24 = int_to_ptr.vmem [resolvable:$true] %s27_s24 }
  0x15   :  { %p1300_p9 = scmp.lt.u32.totalorder %s1296_s27, %s1411_s1 }
  0x17   :  { %p1302_p10 = pnand %p1300_p9, %p1297_p8 }
  0x19   :  { %1305 = shalt.err (!%p1302_p10)
}
  0x1a   :  { %s1306_s4 = scalar_lea.vmem %s28_s24, 4096  ;;  %p1311_p12 = scmp.lt.s32.totalorder %s28_s24, %s28_s24 }
  0x1b   :  { %p1307_p11 = scmp.ne.s32.totalorder %s28_s24, %s1306_s4  ;;  %p1312_p13 = scmp.lt.s32.totalorder %s1306_s4, %s1306_s4 }
  0x1d   :  { %p1313_p0 = por %p1312_p13, %p1311_p12 }
  0x1f   :  { %p1314_p1 = pnand %p1313_p0, %p1307_p11 }
  0x21   :  { %1317 = shalt.err (!%p1314_p1)
}
  0x22   :  { %s1350_s0 = smov 64   ;;  %s1351_s5 = smov 4  }
  0x23   :  { %33 = dma.hbm_to_vmem [thread:$0]  %s1411_s1, 4096, %s28_s24, [#allocation7], %s1350_s0, %s1350_s0, %s1351_s5  }
  0x24   :  { %1340 = dma.done.wait [#allocation4], 4096  }
  0x25   :  { %1341 = vsyncadd [#allocation4], 4294963200 }
  0x26   :  { %1342 = dma.done.wait [#allocation7], 4096  }
  0x27   :  { %1343 = vsyncadd [#allocation7], 4294963200  ;;  %v1194_v0 = vld [vmem:[#allocation6 + $0x40] sm:$0xff]   ;;  %v1198_v4 = vld [vmem:[#allocation6 + $0x48] sm:$0xff]   ;;  %s1352_s1 = smov [#allocation8]  }
  0x28   :  { %v1195_v1 = vld [vmem:[#allocation6 + $0xc0] sm:$0xff]   ;;  %1059 = vmatprep.subr.bf16.mxu0 %v1194_v0  ;;  %v1199_v5 = vld [vmem:[#allocation6 + $0xc8] sm:$0xff]   ;;  %v1202_v8 = vld [vmem:[#allocation6 + $0x50] sm:$0xff]   ;;  %s903_s8 = sshll.u32 %s1352_s1, 4  ;;  %s904_s8 = int_to_ptr.vmem [resolvable:$true] %s903_s8 }
  0x29   :  { %v1196_v2 = vld [vmem:[#allocation6] sm:$0xff]   ;;  %1123 = vmatprep.subr.bf16.mxu1 %v1195_v1  ;;  %v1200_v6 = vld [vmem:[#allocation6 + $0x8] sm:$0xff]   ;;  %v1203_v9 = vld [vmem:[#allocation6 + $0xd0] sm:$0xff]   ;;  %s1318_s9 = scalar_lea.vmem %s904_s8, 1024  ;;  %p1323_p3 = scmp.lt.s32.totalorder %s904_s8, %s904_s8 }
  0x2a   :  { %v1197_v3 = vld [vmem:[#allocation6 + $0x80] sm:$0xff]   ;;  %1060 = vmatpush3.bf16.msra.mxu0 %v1196_v2  ;;  %v1201_v7 = vld [vmem:[#allocation6 + $0x88] sm:$0xff]   ;;  %v1204_v10 = vld [vmem:[#allocation6 + $0x10] sm:$0xff]   ;;  %p1319_p2 = scmp.ne.s32.totalorder %s904_s8, %s1318_s9  ;;  %p1324_p4 = scmp.lt.s32.totalorder %s1318_s9, %s1318_s9 }
  0x2b   :  { %1124 = vmatpush3.bf16.msra.mxu1 %v1197_v3  ;;  %1061 = vmatprep.subr.bf16.mxu0 %v1198_v4  ;;  %v1205_v11 = vld [vmem:[#allocation6 + $0x90] sm:$0xff]   ;;  %v1206_v12 = vld [vmem:[#allocation6 + $0x58] sm:$0xff]   ;;  %v1210_v16 = vld [vmem:[#allocation6 + $0x60] sm:$0xff]  }
  0x2c   :  { %1125 = vmatprep.subr.bf16.mxu1 %v1199_v5  ;;  %v1207_v13 = vld [vmem:[#allocation6 + $0xd8] sm:$0xff]   ;;  %v1211_v17 = vld [vmem:[#allocation6 + $0xe0] sm:$0xff]   ;;  %v1214_v20 = vld [vmem:[#allocation6 + $0x68] sm:$0xff]   ;;  %p1325_p5 = por %p1324_p4, %p1323_p3 }
  0x2d   :  { %v1208_v14 = vld [vmem:[#allocation6 + $0x18] sm:$0xff]   ;;  %v1212_v18 = vld [vmem:[#allocation6 + $0x20] sm:$0xff]   ;;  %v1215_v21 = vld [vmem:[#allocation6 + $0xe8] sm:$0xff]  }
  0x2e   :  { %1062 = vmatpush3.bf16.msra.mxu0 %v1200_v6  ;;  %v1209_v15 = vld [vmem:[#allocation6 + $0x98] sm:$0xff]   ;;  %v1213_v19 = vld [vmem:[#allocation6 + $0xa0] sm:$0xff]   ;;  %v1216_v22 = vld [vmem:[#allocation6 + $0x28] sm:$0xff]   ;;  %p1326_p6 = pnand %p1325_p5, %p1319_p2 }
  0x2f   :  { %1126 = vmatpush3.bf16.msra.mxu1 %v1201_v7  ;;  %1063 = vmatprep.subr.bf16.mxu0 %v1202_v8  ;;  %v1217_v23 = vld [vmem:[#allocation6 + $0xa8] sm:$0xff]   ;;  %v1218_v24 = vld [vmem:[#allocation6 + $0x70] sm:$0xff]   ;;  %v1222_v28 = vld [vmem:[#allocation6 + $0x78] sm:$0xff]  }
  0x30   :  { %1127 = vmatprep.subr.bf16.mxu1 %v1203_v9  ;;  %v1219_v25 = vld [vmem:[#allocation6 + $0xf0] sm:$0xff]   ;;  %v1223_v29 = vld [vmem:[#allocation6 + $0xf8] sm:$0xff]  }
  0x31   :  { %v1220_v26 = vld [vmem:[#allocation6 + $0x30] sm:$0xff]   ;;  %v1224_v30 = vld [vmem:[#allocation6 + $0x38] sm:$0xff]  }
  0x32   :  { %1064 = vmatpush3.bf16.msra.mxu0 %v1204_v10  ;;  %v1221_v27 = vld [vmem:[#allocation6 + $0xb0] sm:$0xff]   ;;  %v1225_v31 = vld [vmem:[#allocation6 + $0xb8] sm:$0xff]  }
  0x33   :  { %1128 = vmatpush3.bf16.msra.mxu1 %v1205_v11  ;;  %1065 = vmatprep.subr.bf16.mxu0 %v1206_v12  ;;  %v1226_v32 = vld [vmem:[#allocation3] ss:$16 sps:$4 sm:$0xff]   ;;  %v1228_v33 = vld [vmem:[#allocation3 + $0x4] ss:$16 sps:$4 sm:$0xff]   ;;  %v1229_v34 = vld [vmem:[#allocation3 + $0x8] ss:$16 sps:$4 sm:$0xff]  }
  0x34   :  { %1129 = vmatprep.subr.bf16.mxu1 %v1207_v13  ;;  %v1231_v35 = vld [vmem:[#allocation3 + $0xc] ss:$16 sps:$4 sm:$0xff]   ;;  %557 = vmatprep.mubr.bf16.mxu0 %v1228_v33  ;;  %v1232_v36 = vld [vmem:[#allocation3 + $0x24] ss:$16 sps:$4 sm:$0xff]   ;;  %v1236_v38 = vld [vmem:[#allocation3 + $0x20] ss:$16 sps:$4 sm:$0xff]  }
  0x35   :  { %654 = vmatprep.mubr.bf16.mxu1 %v1231_v35  ;;  %v1234_v37 = vld [vmem:[#allocation3 + $0x2c] ss:$16 sps:$4 sm:$0xff]   ;;  %v1237_v39 = vld [vmem:[#allocation3 + $0x28] ss:$16 sps:$4 sm:$0xff]   ;;  %v1238_v40 = vld [vmem:[#allocation3 + $0x44] ss:$16 sps:$4 sm:$0xff]  }
  0x36   :  { %1066 = vmatpush3.bf16.msra.mxu0 %v1208_v14  ;;  %v1240_v41 = vld [vmem:[#allocation3 + $0x4c] ss:$16 sps:$4 sm:$0xff]   ;;  %v1242_v42 = vld [vmem:[#allocation3 + $0x40] ss:$16 sps:$4 sm:$0xff]   ;;  %v1243_v43 = vld [vmem:[#allocation3 + $0x48] ss:$16 sps:$4 sm:$0xff]  }
  0x37   :  { %1130 = vmatpush3.bf16.msra.mxu1 %v1209_v15  ;;  %1067 = vmatprep.subr.bf16.mxu0 %v1210_v16  ;;  %v1244_v44 = vld [vmem:[#allocation3 + $0x64] ss:$16 sps:$4 sm:$0xff]   ;;  %v1246_v45 = vld [vmem:[#allocation3 + $0x6c] ss:$16 sps:$4 sm:$0xff]   ;;  %v1248_v46 = vld [vmem:[#allocation3 + $0x60] ss:$16 sps:$4 sm:$0xff]  }
  0x38   :  { %1131 = vmatprep.subr.bf16.mxu1 %v1211_v17  ;;  %v1249_v47 = vld [vmem:[#allocation3 + $0x68] ss:$16 sps:$4 sm:$0xff]   ;;  %v1250_v48 = vld [vmem:[#allocation3 + $0x84] ss:$16 sps:$4 sm:$0xff]   ;;  %v1252_v49 = vld [vmem:[#allocation3 + $0x8c] ss:$16 sps:$4 sm:$0xff]  }
  0x39   :  { %v1254_v50 = vld [vmem:[#allocation3 + $0x80] ss:$16 sps:$4 sm:$0xff]   ;;  %v1255_v51 = vld [vmem:[#allocation3 + $0x88] ss:$16 sps:$4 sm:$0xff]   ;;  %v1256_v52 = vld [vmem:[#allocation3 + $0xa4] ss:$16 sps:$4 sm:$0xff]  }
  0x3a   :  { %1068 = vmatpush3.bf16.msra.mxu0 %v1212_v18  ;;  %v1258_v53 = vld [vmem:[#allocation3 + $0xac] ss:$16 sps:$4 sm:$0xff]   ;;  %v1260_v54 = vld [vmem:[#allocation3 + $0xa0] ss:$16 sps:$4 sm:$0xff]   ;;  %v1261_v55 = vld [vmem:[#allocation3 + $0xa8] ss:$16 sps:$4 sm:$0xff]  }
  0x3b   :  { %1132 = vmatpush3.bf16.msra.mxu1 %v1213_v19  ;;  %1069 = vmatprep.subr.bf16.mxu0 %v1214_v20  ;;  %v1262_v56 = vld [vmem:[#allocation3 + $0xc4] ss:$16 sps:$4 sm:$0xff]   ;;  %v1264_v57 = vld [vmem:[#allocation3 + $0xcc] ss:$16 sps:$4 sm:$0xff]   ;;  %v1266_v58 = vld [vmem:[#allocation3 + $0xc0] ss:$16 sps:$4 sm:$0xff]  }
  0x3c   :  { %1133 = vmatprep.subr.bf16.mxu1 %v1215_v21  ;;  %v1267_v59 = vld [vmem:[#allocation3 + $0xc8] ss:$16 sps:$4 sm:$0xff]   ;;  %v1268_v60 = vld [vmem:[#allocation3 + $0xe4] ss:$16 sps:$4 sm:$0xff]   ;;  %v1270_v61 = vld [vmem:[#allocation3 + $0xec] ss:$16 sps:$4 sm:$0xff]  }
  0x3d   :  { %v1272_v62 = vld [vmem:[#allocation3 + $0xe0] ss:$16 sps:$4 sm:$0xff]   ;;  %v1273_v63 = vld [vmem:[#allocation3 + $0xe8] ss:$16 sps:$4 sm:$0xff]  }
  0x3e   :  { %1070 = vmatpush3.bf16.msra.mxu0 %v1216_v22 }
  0x3f   :  { %1134 = vmatpush3.bf16.msra.mxu1 %v1217_v23  ;;  %1071 = vmatprep.subr.bf16.mxu0 %v1218_v24 }
  0x40   :  { %1135 = vmatprep.subr.bf16.mxu1 %v1219_v25 }
  0x42   :  { %1072 = vmatpush3.bf16.msra.mxu0 %v1220_v26 }
  0x43   :  { %1136 = vmatpush3.bf16.msra.mxu1 %v1221_v27  ;;  %1073 = vmatprep.subr.bf16.mxu0 %v1222_v28 }
  0x44   :  { %1137 = vmatprep.subr.bf16.mxu1 %v1223_v29 }
  0x46   :  { %1074 = vmatpush3.bf16.msra.mxu0 %v1224_v30 }
  0x47   :  { %1138 = vmatpush3.bf16.msra.mxu1 %v1225_v31 }
  0x49   :  { %558 = vmatmul.mubr.bf16.vlgmr.msra.gmra.mrb[0].mxu0 %v1226_v32 }
  0x4a   :  { %655 = vmatmul.mubr.bf16.vlgmr.msra.gmra.mrb[0].mxu1 %v1229_v34  ;;  %565 = vmatprep.mubr.bf16.mxu0 %v1232_v36 }
  0x4b   :  { %662 = vmatprep.mubr.bf16.mxu1 %v1234_v37 }
  0x51   :  { %566 = vmatmul.mubr.bf16.gmra.mrb[4].mxu0 %v1236_v38 }
  0x52   :  { %663 = vmatmul.mubr.bf16.gmra.mrb[4].mxu1 %v1237_v39  ;;  %573 = vmatprep.mubr.bf16.mxu0 %v1238_v40 }
  0x53   :  { %670 = vmatprep.mubr.bf16.mxu1 %v1240_v41 }
  0x59   :  { %574 = vmatmul.mubr.bf16.gmra.mrb[8].mxu0 %v1242_v42 }
  0x5a   :  { %671 = vmatmul.mubr.bf16.gmra.mrb[8].mxu1 %v1243_v43  ;;  %581 = vmatprep.mubr.bf16.mxu0 %v1244_v44 }
  0x5b   :  { %678 = vmatprep.mubr.bf16.mxu1 %v1246_v45 }
  0x61   :  { %582 = vmatmul.mubr.bf16.gmra.mrb[12].mxu0 %v1248_v46 }
  0x62   :  { %679 = vmatmul.mubr.bf16.gmra.mrb[12].mxu1 %v1249_v47  ;;  %589 = vmatprep.mubr.bf16.mxu0 %v1250_v48 }
  0x63   :  { %686 = vmatprep.mubr.bf16.mxu1 %v1252_v49 }
  0x69   :  { %590 = vmatmul.mubr.bf16.gmra.mrb[16].mxu0 %v1254_v50 }
  0x6a   :  { %687 = vmatmul.mubr.bf16.gmra.mrb[16].mxu1 %v1255_v51  ;;  %597 = vmatprep.mubr.bf16.mxu0 %v1256_v52 }
  0x6b   :  { %694 = vmatprep.mubr.bf16.mxu1 %v1258_v53 }
  0x71   :  { %598 = vmatmul.mubr.bf16.gmra.mrb[20].mxu0 %v1260_v54 }
  0x72   :  { %695 = vmatmul.mubr.bf16.gmra.mrb[20].mxu1 %v1261_v55  ;;  %605 = vmatprep.mubr.bf16.mxu0 %v1262_v56 }
  0x73   :  { %702 = vmatprep.mubr.bf16.mxu1 %v1264_v57 }
  0x79   :  { %606 = vmatmul.mubr.bf16.gmra.mrb[24].mxu0 %v1266_v58 }
  0x7a   :  { %703 = vmatmul.mubr.bf16.gmra.mrb[24].mxu1 %v1267_v59  ;;  %613 = vmatprep.mubr.bf16.mxu0 %v1268_v60 }
  0x7b   :  { %710 = vmatprep.mubr.bf16.mxu1 %v1270_v61 }
  0x81   :  { %614 = vmatmul.mubr.bf16.gmra.mrb[28].mxu0 %v1272_v62 }
  0x82   :  { %711 = vmatmul.mubr.bf16.gmra.mrb[28].mxu1 %v1273_v63 }
 0x11c   :  { %v1075_v0 = vpop.f32.mrb[0].mxu0 }
 0x11d   :  { %v1139_v1 = vpop.f32.mrb[0].mxu1  ;;  %v1076_v2 = vpop.f32.mrb[1].mxu0 }
 0x11e   :  { %v1077_v3 = vadd.f32 %v1076_v2, %v1075_v0  ;;  %v1140_v4 = vpop.f32.mrb[1].mxu1  ;;  %v1078_v5 = vpop.f32.mrb[2].mxu0 }
 0x11f   :  { %v1141_v6 = vadd.f32 %v1140_v4, %v1139_v1  ;;  %v1142_v7 = vpop.f32.mrb[2].mxu1  ;;  %v1079_v8 = vpop.f32.mrb[3].mxu0 }
 0x120   :  { %v1080_v9 = vadd.f32 %v1079_v8, %v1078_v5  ;;  %v1143_v10 = vpop.f32.mrb[3].mxu1 }
 0x121   :  { %v657_v11 = vadd.f32 %v1141_v6, %v1077_v3  ;;  %v1144_v12 = vadd.f32 %v1143_v10, %v1142_v7 }
 0x123   :  { %v786_v13 = vmul.f32 0.2, %v657_v11  ;;  %v660_v14 = vadd.f32 %v1144_v12, %v1080_v9  ;;  %vm770_vm0 = vcmp.ge.f32.partialorder %v657_v11, 0.0 }
 0x124   :  { %v1081_v15 = vpop.f32.mrb[4].mxu0 }
 0x125   :  { %vm771_vm1 = vcmp.ge.f32.partialorder %v660_v14, 0.0  ;;  %v787_v16 = vmul.f32 0.2, %v660_v14  ;;  %v1145_v17 = vpop.f32.mrb[4].mxu1  ;;  %v1082_v18 = vpop.f32.mrb[5].mxu0  ;;  %v802_v22 = vsel %vm770_vm0, %v657_v11, %v786_v13 }
 0x126   :  { %v1083_v19 = vadd.f32 %v1082_v18, %v1081_v15  ;;  %v1146_v20 = vpop.f32.mrb[5].mxu1  ;;  %v1084_v21 = vpop.f32.mrb[6].mxu0 }
 0x127   :  { %v803_v23 = vsel %vm771_vm1, %v660_v14, %v787_v16  ;;  %v1147_v24 = vadd.f32 %v1146_v20, %v1145_v17  ;;  %v1148_v25 = vpop.f32.mrb[6].mxu1  ;;  %v1085_v26 = vpop.f32.mrb[7].mxu0 }
 0x128   :  { %v1015_v27 = vpack.c.bf16 %v803_v23, %v802_v22  ;;  %v1086_v28 = vadd.f32 %v1085_v26, %v1084_v21  ;;  %v1149_v29 = vpop.f32.mrb[7].mxu1 }
 0x129   :  { %v665_v30 = vadd.f32 %v1147_v24, %v1083_v19  ;;  %v1150_v31 = vadd.f32 %v1149_v29, %v1148_v25 }
 0x12a   :  { %1016 = vst [vmem:[#allocation8] sm:$0xff] %v1015_v27  }
 0x12b   :  { %v788_v32 = vmul.f32 0.2, %v665_v30  ;;  %v668_v33 = vadd.f32 %v1150_v31, %v1086_v28  ;;  %vm772_vm2 = vcmp.ge.f32.partialorder %v665_v30, 0.0 }
 0x12c   :  { %v1087_v34 = vpop.f32.mrb[8].mxu0 }
 0x12d   :  { %vm773_vm3 = vcmp.ge.f32.partialorder %v668_v33, 0.0  ;;  %v789_v35 = vmul.f32 0.2, %v668_v33  ;;  %v1151_v36 = vpop.f32.mrb[8].mxu1  ;;  %v1088_v37 = vpop.f32.mrb[9].mxu0  ;;  %v804_v41 = vsel %vm772_vm2, %v665_v30, %v788_v32 }
 0x12e   :  { %v1089_v38 = vadd.f32 %v1088_v37, %v1087_v34  ;;  %v1152_v39 = vpop.f32.mrb[9].mxu1  ;;  %v1090_v40 = vpop.f32.mrb[10].mxu0 }
 0x12f   :  { %v805_v42 = vsel %vm773_vm3, %v668_v33, %v789_v35  ;;  %v1153_v43 = vadd.f32 %v1152_v39, %v1151_v36  ;;  %v1154_v44 = vpop.f32.mrb[10].mxu1  ;;  %v1091_v45 = vpop.f32.mrb[11].mxu0 }
 0x130   :  { %v1020_v46 = vpack.c.bf16 %v805_v42, %v804_v41  ;;  %v1092_v47 = vadd.f32 %v1091_v45, %v1090_v40  ;;  %v1155_v48 = vpop.f32.mrb[11].mxu1 }
 0x131   :  { %v673_v49 = vadd.f32 %v1153_v43, %v1089_v38  ;;  %v1156_v50 = vadd.f32 %v1155_v48, %v1154_v44 }
 0x132   :  { %1052 = vst [vmem:[#allocation8 + $0x8] sm:$0xff] %v1020_v46  }
 0x133   :  { %v790_v51 = vmul.f32 0.2, %v673_v49  ;;  %v676_v52 = vadd.f32 %v1156_v50, %v1092_v47  ;;  %vm774_vm4 = vcmp.ge.f32.partialorder %v673_v49, 0.0 }
 0x134   :  { %v1093_v53 = vpop.f32.mrb[12].mxu0 }
 0x135   :  { %vm775_vm5 = vcmp.ge.f32.partialorder %v676_v52, 0.0  ;;  %v791_v54 = vmul.f32 0.2, %v676_v52  ;;  %v1157_v55 = vpop.f32.mrb[12].mxu1  ;;  %v1094_v56 = vpop.f32.mrb[13].mxu0  ;;  %v806_v60 = vsel %vm774_vm4, %v673_v49, %v790_v51 }
 0x136   :  { %v1095_v57 = vadd.f32 %v1094_v56, %v1093_v53  ;;  %v1158_v58 = vpop.f32.mrb[13].mxu1  ;;  %v1096_v59 = vpop.f32.mrb[14].mxu0 }
 0x137   :  { %v807_v61 = vsel %vm775_vm5, %v676_v52, %v791_v54  ;;  %v1159_v62 = vadd.f32 %v1158_v58, %v1157_v55  ;;  %v1160_v63 = vpop.f32.mrb[14].mxu1  ;;  %v1097_v0 = vpop.f32.mrb[15].mxu0 }
 0x138   :  { %v1025_v1 = vpack.c.bf16 %v807_v61, %v806_v60  ;;  %v1098_v2 = vadd.f32 %v1097_v0, %v1096_v59  ;;  %v1161_v3 = vpop.f32.mrb[15].mxu1 }
 0x139   :  { %v681_v4 = vadd.f32 %v1159_v62, %v1095_v57  ;;  %v1162_v5 = vadd.f32 %v1161_v3, %v1160_v63 }
 0x13a   :  { %1053 = vst [vmem:[#allocation8 + $0x10] sm:$0xff] %v1025_v1  }
 0x13b   :  { %v792_v6 = vmul.f32 0.2, %v681_v4  ;;  %v684_v7 = vadd.f32 %v1162_v5, %v1098_v2  ;;  %vm776_vm6 = vcmp.ge.f32.partialorder %v681_v4, 0.0 }
 0x13c   :  { %v1099_v8 = vpop.f32.mrb[16].mxu0 }
 0x13d   :  { %vm777_vm7 = vcmp.ge.f32.partialorder %v684_v7, 0.0  ;;  %v793_v9 = vmul.f32 0.2, %v684_v7  ;;  %v1163_v10 = vpop.f32.mrb[16].mxu1  ;;  %v1100_v11 = vpop.f32.mrb[17].mxu0  ;;  %v808_v15 = vsel %vm776_vm6, %v681_v4, %v792_v6 }
 0x13e   :  { %v1101_v12 = vadd.f32 %v1100_v11, %v1099_v8  ;;  %v1164_v13 = vpop.f32.mrb[17].mxu1  ;;  %v1102_v14 = vpop.f32.mrb[18].mxu0 }
 0x13f   :  { %v809_v16 = vsel %vm777_vm7, %v684_v7, %v793_v9  ;;  %v1165_v17 = vadd.f32 %v1164_v13, %v1163_v10  ;;  %v1166_v18 = vpop.f32.mrb[18].mxu1  ;;  %v1103_v19 = vpop.f32.mrb[19].mxu0 }
 0x140   :  { %v1030_v20 = vpack.c.bf16 %v809_v16, %v808_v15  ;;  %v1104_v21 = vadd.f32 %v1103_v19, %v1102_v14  ;;  %v1167_v22 = vpop.f32.mrb[19].mxu1 }
 0x141   :  { %v689_v23 = vadd.f32 %v1165_v17, %v1101_v12  ;;  %v1168_v24 = vadd.f32 %v1167_v22, %v1166_v18 }
 0x142   :  { %1054 = vst [vmem:[#allocation8 + $0x18] sm:$0xff] %v1030_v20  }
 0x143   :  { %v794_v25 = vmul.f32 0.2, %v689_v23  ;;  %v692_v26 = vadd.f32 %v1168_v24, %v1104_v21  ;;  %vm778_vm8 = vcmp.ge.f32.partialorder %v689_v23, 0.0 }
 0x144   :  { %v1105_v27 = vpop.f32.mrb[20].mxu0 }
 0x145   :  { %vm779_vm9 = vcmp.ge.f32.partialorder %v692_v26, 0.0  ;;  %v795_v28 = vmul.f32 0.2, %v692_v26  ;;  %v1169_v29 = vpop.f32.mrb[20].mxu1  ;;  %v1106_v30 = vpop.f32.mrb[21].mxu0  ;;  %v810_v34 = vsel %vm778_vm8, %v689_v23, %v794_v25 }
 0x146   :  { %v1107_v31 = vadd.f32 %v1106_v30, %v1105_v27  ;;  %v1170_v32 = vpop.f32.mrb[21].mxu1  ;;  %v1108_v33 = vpop.f32.mrb[22].mxu0 }
 0x147   :  { %v811_v35 = vsel %vm779_vm9, %v692_v26, %v795_v28  ;;  %v1171_v36 = vadd.f32 %v1170_v32, %v1169_v29  ;;  %v1172_v37 = vpop.f32.mrb[22].mxu1  ;;  %v1109_v38 = vpop.f32.mrb[23].mxu0 }
 0x148   :  { %v1035_v39 = vpack.c.bf16 %v811_v35, %v810_v34  ;;  %v1110_v40 = vadd.f32 %v1109_v38, %v1108_v33  ;;  %v1173_v41 = vpop.f32.mrb[23].mxu1 }
 0x149   :  { %v697_v42 = vadd.f32 %v1171_v36, %v1107_v31  ;;  %v1174_v43 = vadd.f32 %v1173_v41, %v1172_v37 }
 0x14a   :  { %1055 = vst [vmem:[#allocation8 + $0x20] sm:$0xff] %v1035_v39  }
 0x14b   :  { %v796_v44 = vmul.f32 0.2, %v697_v42  ;;  %v700_v45 = vadd.f32 %v1174_v43, %v1110_v40  ;;  %vm780_vm10 = vcmp.ge.f32.partialorder %v697_v42, 0.0 }
 0x14c   :  { %v1111_v46 = vpop.f32.mrb[24].mxu0 }
 0x14d   :  { %vm781_vm11 = vcmp.ge.f32.partialorder %v700_v45, 0.0  ;;  %v797_v47 = vmul.f32 0.2, %v700_v45  ;;  %v1175_v48 = vpop.f32.mrb[24].mxu1  ;;  %v1112_v49 = vpop.f32.mrb[25].mxu0  ;;  %v812_v53 = vsel %vm780_vm10, %v697_v42, %v796_v44 }
 0x14e   :  { %v1113_v50 = vadd.f32 %v1112_v49, %v1111_v46  ;;  %v1176_v51 = vpop.f32.mrb[25].mxu1  ;;  %v1114_v52 = vpop.f32.mrb[26].mxu0 }
 0x14f   :  { %v813_v54 = vsel %vm781_vm11, %v700_v45, %v797_v47  ;;  %v1177_v55 = vadd.f32 %v1176_v51, %v1175_v48  ;;  %v1178_v56 = vpop.f32.mrb[26].mxu1  ;;  %v1115_v57 = vpop.f32.mrb[27].mxu0 }
 0x150   :  { %v1040_v58 = vpack.c.bf16 %v813_v54, %v812_v53  ;;  %v1116_v59 = vadd.f32 %v1115_v57, %v1114_v52  ;;  %v1179_v60 = vpop.f32.mrb[27].mxu1 }
 0x151   :  { %v705_v61 = vadd.f32 %v1177_v55, %v1113_v50  ;;  %v1180_v62 = vadd.f32 %v1179_v60, %v1178_v56 }
 0x152   :  { %1056 = vst [vmem:[#allocation8 + $0x28] sm:$0xff] %v1040_v58  }
 0x153   :  { %v798_v63 = vmul.f32 0.2, %v705_v61  ;;  %v708_v0 = vadd.f32 %v1180_v62, %v1116_v59  ;;  %vm782_vm12 = vcmp.ge.f32.partialorder %v705_v61, 0.0 }
 0x154   :  { %v1117_v1 = vpop.f32.mrb[28].mxu0 }
 0x155   :  { %vm783_vm13 = vcmp.ge.f32.partialorder %v708_v0, 0.0  ;;  %v799_v2 = vmul.f32 0.2, %v708_v0  ;;  %v1181_v3 = vpop.f32.mrb[28].mxu1  ;;  %v1118_v4 = vpop.f32.mrb[29].mxu0  ;;  %v814_v8 = vsel %vm782_vm12, %v705_v61, %v798_v63 }
 0x156   :  { %v1119_v5 = vadd.f32 %v1118_v4, %v1117_v1  ;;  %v1182_v6 = vpop.f32.mrb[29].mxu1  ;;  %v1120_v7 = vpop.f32.mrb[30].mxu0 }
 0x157   :  { %v815_v9 = vsel %vm783_vm13, %v708_v0, %v799_v2  ;;  %v1183_v10 = vadd.f32 %v1182_v6, %v1181_v3  ;;  %v1184_v11 = vpop.f32.mrb[30].mxu1  ;;  %v1121_v12 = vpop.f32.mrb[31].mxu0 }
 0x158   :  { %v1045_v13 = vpack.c.bf16 %v815_v9, %v814_v8  ;;  %v1122_v14 = vadd.f32 %v1121_v12, %v1120_v7  ;;  %v1185_v15 = vpop.f32.mrb[31].mxu1 }
 0x159   :  { %v713_v16 = vadd.f32 %v1183_v10, %v1119_v5  ;;  %v1186_v17 = vadd.f32 %v1185_v15, %v1184_v11 }
 0x15a   :  { %1057 = vst [vmem:[#allocation8 + $0x30] sm:$0xff] %v1045_v13  }
 0x15b   :  { %v800_v18 = vmul.f32 0.2, %v713_v16  ;;  %v716_v19 = vadd.f32 %v1186_v17, %v1122_v14  ;;  %vm784_vm14 = vcmp.ge.f32.partialorder %v713_v16, 0.0 }
 0x15d   :  { %vm785_vm15 = vcmp.ge.f32.partialorder %v716_v19, 0.0  ;;  %v801_v20 = vmul.f32 0.2, %v716_v19  ;;  %v816_v21 = vsel %vm784_vm14, %v713_v16, %v800_v18 }
 0x15f   :  { %v817_v22 = vsel %vm785_vm15, %v716_v19, %v801_v20 }
 0x160   :  { %v1050_v23 = vpack.c.bf16 %v817_v22, %v816_v21 }
 0x162   :  { %1058 = vst [vmem:[#allocation8 + $0x38] sm:$0xff] %v1050_v23  }
 0x163   :  { %1329 = shalt.err (!%p1326_p6)
}
 0x164   :  { %s1330_s12 = scalar_lea.hbm %s1412_s2, 1024 }
 0x165   :  { %p1331_p7 = scmp.ne.s32.totalorder %s1412_s2, %s1330_s12  ;;  %p1334_p8 = scmp.lt.u32.totalorder %s1330_s12, %s1412_s2 }
 0x167   :  { %p1336_p9 = pnand %p1334_p8, %p1331_p7 }
 0x169   :  { %1339 = shalt.err (!%p1336_p9)
}
 0x16a   :  { %909 = dma.vmem_to_hbm [thread:$0]  %s904_s8, 1024, %s1412_s2, [#allocation5], %s1350_s0, %s1350_s0, %s1351_s5  }
 0x16b   :  { %1344 = dma.done.wait [#allocation5], 1024  }
 0x16c   :  { %1345 = vsyncadd [#allocation5], 4294966272 }
 0x16d   :  { %913 = vsyncpa [#allocation4], 1 }
 0x16e   :  { %914 = vsyncpa [#allocation7], 1 }
 0x16f   :  { %915 = vsyncpa [#allocation5], 1 }

// kernel: _forward.7
= control target key start
LH: loop header
LB: loop body
LE: loop exit
PB: predicated region body
PF: predicated region fallthrough
CT: control target
= control target key end

     0   :  { %7 = vsyncpa [#allocation4], 0  ;;  %s1340_s0 = inlined_call_operand.hbm [shape: bf16[32,1024], index: 0, kind: input, shape index: {}]   ;;  %s1341_s1 = inlined_call_operand.hbm [shape: bf16[1024,128], index: 1, kind: input, shape index: {}]   ;;  %s1342_s2 = inlined_call_operand.hbm [shape: bf16[32,128], index: 2, kind: output, shape index: {}]  }
   0x1   :  { %8 = vsyncpa [#allocation7], 0 }
   0x2   :  { %9 = vsyncpa [#allocation5], 0  ;;  %s1276_s9 = smov [#allocation3]   ;;  %s1204_s13 = scalar_lea.hbm %s1340_s0, 2048 }
   0x3   :  { %s15_s10 = sshll.u32 %s1276_s9, 4  ;;  %p1205_p0 = scmp.ne.s32.totalorder %s1340_s0, %s1204_s13  ;;  %s16_s10 = int_to_ptr.vmem [resolvable:$true] %s15_s10 }
   0x4   :  { %p1208_p1 = scmp.lt.u32.totalorder %s1204_s13, %s1340_s0 }
   0x6   :  { %p1210_p2 = pnand %p1208_p1, %p1205_p0 }
   0x8   :  { %1213 = shalt.err (!%p1210_p2)
}
   0x9   :  { %s1214_s18 = scalar_lea.vmem %s16_s10, 2048  ;;  %p1219_p4 = scmp.lt.s32.totalorder %s16_s10, %s16_s10 }
   0xa   :  { %p1215_p3 = scmp.ne.s32.totalorder %s16_s10, %s1214_s18  ;;  %p1220_p5 = scmp.lt.s32.totalorder %s1214_s18, %s1214_s18 }
   0xc   :  { %p1221_p6 = por %p1220_p5, %p1219_p4 }
   0xe   :  { %p1222_p7 = pnand %p1221_p6, %p1215_p3 }
  0x10   :  { %1225 = shalt.err (!%p1222_p7)
}
  0x11   :  { %s1277_s19 = smov 512   ;;  %s1278_s20 = smov 32  }
  0x12   :  { %21 = dma.hbm_to_vmem [thread:$0]  %s1340_s0, 2048, %s16_s10, [#allocation4], %s1277_s19, %s1277_s19, %s1278_s20  }
  0x13   :  { %s1279_s23 = smov [#allocation6]   ;;  %s1226_s27 = scalar_lea.hbm %s1341_s1, 8192 }
  0x14   :  { %s27_s24 = sshll.u32 %s1279_s23, 4  ;;  %p1227_p8 = scmp.ne.s32.totalorder %s1341_s1, %s1226_s27  ;;  %s28_s24 = int_to_ptr.vmem [resolvable:$true] %s27_s24 }
  0x15   :  { %p1230_p9 = scmp.lt.u32.totalorder %s1226_s27, %s1341_s1 }
  0x17   :  { %p1232_p10 = pnand %p1230_p9, %p1227_p8 }
  0x19   :  { %1235 = shalt.err (!%p1232_p10)
}
  0x1a   :  { %s1236_s4 = scalar_lea.vmem %s28_s24, 8192  ;;  %p1241_p12 = scmp.lt.s32.totalorder %s28_s24, %s28_s24 }
  0x1b   :  { %p1237_p11 = scmp.ne.s32.totalorder %s28_s24, %s1236_s4  ;;  %p1242_p13 = scmp.lt.s32.totalorder %s1236_s4, %s1236_s4 }
  0x1d   :  { %p1243_p0 = por %p1242_p13, %p1241_p12 }
  0x1f   :  { %p1244_p1 = pnand %p1243_p0, %p1237_p11 }
  0x21   :  { %1247 = shalt.err (!%p1244_p1)
}
  0x22   :  { %s1280_s0 = smov 64   ;;  %s1281_s5 = smov 4  }
  0x23   :  { %33 = dma.hbm_to_vmem [thread:$0]  %s1341_s1, 8192, %s28_s24, [#allocation7], %s1280_s0, %s1280_s0, %s1281_s5  }
  0x24   :  { %1270 = dma.done.wait [#allocation4], 2048  }
  0x25   :  { %1271 = vsyncadd [#allocation4], 4294965248 }
  0x26   :  { %1272 = dma.done.wait [#allocation7], 8192  }
  0x27   :  { %1273 = vsyncadd [#allocation7], 4294959104  ;;  %v1140_v0 = vld [vmem:[#allocation6 + $0x40] sm:$0xff]   ;;  %v1144_v4 = vld [vmem:[#allocation6 + $0x48] sm:$0xff]   ;;  %s1282_s1 = smov [#allocation8]  }
  0x28   :  { %v1141_v1 = vld [vmem:[#allocation6 + $0xc0] sm:$0xff]   ;;  %1021 = vmatprep.subr.bf16.mxu0 %v1140_v0  ;;  %v1145_v5 = vld [vmem:[#allocation6 + $0xc8] sm:$0xff]   ;;  %v1148_v8 = vld [vmem:[#allocation6 + $0x50] sm:$0xff]   ;;  %s909_s8 = sshll.u32 %s1282_s1, 4  ;;  %s910_s8 = int_to_ptr.vmem [resolvable:$true] %s909_s8 }
  0x29   :  { %v1142_v2 = vld [vmem:[#allocation6] sm:$0xff]   ;;  %1049 = vmatprep.subr.bf16.mxu1 %v1141_v1  ;;  %v1146_v6 = vld [vmem:[#allocation6 + $0x8] sm:$0xff]   ;;  %v1149_v9 = vld [vmem:[#allocation6 + $0xd0] sm:$0xff]   ;;  %s1248_s9 = scalar_lea.vmem %s910_s8, 256  ;;  %p1253_p3 = scmp.lt.s32.totalorder %s910_s8, %s910_s8 }
  0x2a   :  { %v1143_v3 = vld [vmem:[#allocation6 + $0x80] sm:$0xff]   ;;  %1022 = vmatpush3.bf16.msra.mxu0 %v1142_v2  ;;  %v1147_v7 = vld [vmem:[#allocation6 + $0x88] sm:$0xff]   ;;  %v1150_v10 = vld [vmem:[#allocation6 + $0x10] sm:$0xff]   ;;  %p1249_p2 = scmp.ne.s32.totalorder %s910_s8, %s1248_s9  ;;  %p1254_p4 = scmp.lt.s32.totalorder %s1248_s9, %s1248_s9 }
  0x2b   :  { %1050 = vmatpush3.bf16.msra.mxu1 %v1143_v3  ;;  %1023 = vmatprep.subr.bf16.mxu0 %v1144_v4  ;;  %v1151_v11 = vld [vmem:[#allocation6 + $0x90] sm:$0xff]   ;;  %v1152_v12 = vld [vmem:[#allocation6 + $0x58] sm:$0xff]   ;;  %v1156_v16 = vld [vmem:[#allocation6 + $0x60] sm:$0xff]  }
  0x2c   :  { %1051 = vmatprep.subr.bf16.mxu1 %v1145_v5  ;;  %v1153_v13 = vld [vmem:[#allocation6 + $0xd8] sm:$0xff]   ;;  %v1157_v17 = vld [vmem:[#allocation6 + $0xe0] sm:$0xff]   ;;  %v1160_v20 = vld [vmem:[#allocation6 + $0x68] sm:$0xff]   ;;  %p1255_p5 = por %p1254_p4, %p1253_p3 }
  0x2d   :  { %v1154_v14 = vld [vmem:[#allocation6 + $0x18] sm:$0xff]   ;;  %v1158_v18 = vld [vmem:[#allocation6 + $0x20] sm:$0xff]   ;;  %v1161_v21 = vld [vmem:[#allocation6 + $0xe8] sm:$0xff]  }
  0x2e   :  { %1024 = vmatpush3.bf16.msra.mxu0 %v1146_v6  ;;  %v1155_v15 = vld [vmem:[#allocation6 + $0x98] sm:$0xff]   ;;  %v1159_v19 = vld [vmem:[#allocation6 + $0xa0] sm:$0xff]   ;;  %v1162_v22 = vld [vmem:[#allocation6 + $0x28] sm:$0xff]   ;;  %p1256_p6 = pnand %p1255_p5, %p1249_p2 }
  0x2f   :  { %1052 = vmatpush3.bf16.msra.mxu1 %v1147_v7  ;;  %1025 = vmatprep.subr.bf16.mxu0 %v1148_v8  ;;  %v1163_v23 = vld [vmem:[#allocation6 + $0xa8] sm:$0xff]   ;;  %v1164_v24 = vld [vmem:[#allocation6 + $0x70] sm:$0xff]   ;;  %v1168_v28 = vld [vmem:[#allocation6 + $0x78] sm:$0xff]  }
  0x30   :  { %1053 = vmatprep.subr.bf16.mxu1 %v1149_v9  ;;  %v1165_v25 = vld [vmem:[#allocation6 + $0xf0] sm:$0xff]   ;;  %v1169_v29 = vld [vmem:[#allocation6 + $0xf8] sm:$0xff]   ;;  %v53_v32 = vld [vmem:[#allocation3] sm:$0xff] }
  0x31   :  { %v1166_v26 = vld [vmem:[#allocation6 + $0x30] sm:$0xff]   ;;  %v1170_v30 = vld [vmem:[#allocation6 + $0x38] sm:$0xff]   ;;  %v57_v33 = vld [vmem:[#allocation3 + $0x20] sm:$0xff] }
  0x32   :  { %1026 = vmatpush3.bf16.msra.mxu0 %v1150_v10  ;;  %v1167_v27 = vld [vmem:[#allocation6 + $0xb0] sm:$0xff]   ;;  %v1171_v31 = vld [vmem:[#allocation6 + $0xb8] sm:$0xff]   ;;  %v54_v34 = vld [vmem:[#allocation3 + $0x8] sm:$0xff]  ;;  %v922_v35 = vcombine.low %v53_v32, %v57_v33  ;;  %v923_v36 = vcombine.high %v53_v32, %v57_v33 }
  0x33   :  { %1054 = vmatpush3.bf16.msra.mxu1 %v1151_v11  ;;  %1027 = vmatprep.subr.bf16.mxu0 %v1152_v12  ;;  %v58_v37 = vld [vmem:[#allocation3 + $0x28] sm:$0xff]  ;;  %v1172_v40 = vld [vmem:[#allocation6 + $0x140] sm:$0xff]   ;;  %v1180_v48 = vld [vmem:[#allocation6 + $0x150] sm:$0xff]  }
  0x34   :  { %1055 = vmatprep.subr.bf16.mxu1 %v1153_v13  ;;  %v924_v38 = vcombine.low %v54_v34, %v58_v37  ;;  %v925_v39 = vcombine.high %v54_v34, %v58_v37  ;;  %693 = vmatprep.mubr.bf16.mxu0 %v923_v36  ;;  %v1173_v41 = vld [vmem:[#allocation6 + $0x1c0] sm:$0xff]   ;;  %v1176_v44 = vld [vmem:[#allocation6 + $0x148] sm:$0xff]   ;;  %v1181_v49 = vld [vmem:[#allocation6 + $0x1d0] sm:$0xff]  }
  0x35   :  { %v1174_v42 = vld [vmem:[#allocation6 + $0x100] sm:$0xff]   ;;  %v1177_v45 = vld [vmem:[#allocation6 + $0x1c8] sm:$0xff]   ;;  %v1182_v50 = vld [vmem:[#allocation6 + $0x110] sm:$0xff]  }
  0x36   :  { %1028 = vmatpush3.bf16.msra.mxu0 %v1154_v14  ;;  %742 = vmatprep.mubr.bf16.mxu1 %v925_v39  ;;  %v1175_v43 = vld [vmem:[#allocation6 + $0x180] sm:$0xff]   ;;  %v1178_v46 = vld [vmem:[#allocation6 + $0x108] sm:$0xff]   ;;  %v1183_v51 = vld [vmem:[#allocation6 + $0x190] sm:$0xff]  }
  0x37   :  { %1056 = vmatpush3.bf16.msra.mxu1 %v1155_v15  ;;  %1029 = vmatprep.subr.bf16.mxu0 %v1156_v16  ;;  %v1179_v47 = vld [vmem:[#allocation6 + $0x188] sm:$0xff]   ;;  %v1184_v52 = vld [vmem:[#allocation6 + $0x158] sm:$0xff]   ;;  %v1188_v56 = vld [vmem:[#allocation6 + $0x160] sm:$0xff]  }
  0x38   :  { %1057 = vmatprep.subr.bf16.mxu1 %v1157_v17  ;;  %v1185_v53 = vld [vmem:[#allocation6 + $0x1d8] sm:$0xff]   ;;  %v1189_v57 = vld [vmem:[#allocation6 + $0x1e0] sm:$0xff]   ;;  %v62_v63 = vld [vmem:[#allocation3 + $0x48] sm:$0xff] }
  0x39   :  { %v1186_v54 = vld [vmem:[#allocation6 + $0x118] sm:$0xff]   ;;  %v1190_v58 = vld [vmem:[#allocation6 + $0x120] sm:$0xff]   ;;  %v66_v0 = vld [vmem:[#allocation3 + $0x68] sm:$0xff] }
  0x3a   :  { %1030 = vmatpush3.bf16.msra.mxu0 %v1158_v18  ;;  %v1187_v55 = vld [vmem:[#allocation6 + $0x198] sm:$0xff]   ;;  %v1191_v59 = vld [vmem:[#allocation6 + $0x1a0] sm:$0xff]   ;;  %v933_v2 = vcombine.high %v62_v63, %v66_v0  ;;  %v1192_v3 = vld [vmem:[#allocation6 + $0x168] sm:$0xff]   ;;  %v932_v4 = vcombine.low %v62_v63, %v66_v0 }
  0x3b   :  { %1058 = vmatpush3.bf16.msra.mxu1 %v1159_v19  ;;  %1031 = vmatprep.subr.bf16.mxu0 %v1160_v20  ;;  %v61_v60 = vld [vmem:[#allocation3 + $0x40] sm:$0xff]  ;;  %v1193_v5 = vld [vmem:[#allocation6 + $0x1e8] sm:$0xff]   ;;  %v1196_v8 = vld [vmem:[#allocation6 + $0x170] sm:$0xff]  }
  0x3c   :  { %1059 = vmatprep.subr.bf16.mxu1 %v1161_v21  ;;  %v65_v61 = vld [vmem:[#allocation3 + $0x60] sm:$0xff]  ;;  %v1194_v6 = vld [vmem:[#allocation6 + $0x128] sm:$0xff]   ;;  %v1197_v9 = vld [vmem:[#allocation6 + $0x1f0] sm:$0xff]  }
  0x3d   :  { %v931_v62 = vcombine.high %v61_v60, %v65_v61  ;;  %v930_v1 = vcombine.low %v61_v60, %v65_v61  ;;  %v1195_v7 = vld [vmem:[#allocation6 + $0x1a8] sm:$0xff]   ;;  %v1198_v10 = vld [vmem:[#allocation6 + $0x130] sm:$0xff]   ;;  %v1200_v12 = vld [vmem:[#allocation6 + $0x178] sm:$0xff]  }
  0x3e   :  { %1032 = vmatpush3.bf16.msra.mxu0 %v1162_v22  ;;  %v1199_v11 = vld [vmem:[#allocation6 + $0x1b0] sm:$0xff]   ;;  %v1201_v13 = vld [vmem:[#allocation6 + $0x1f8] sm:$0xff]  }
  0x3f   :  { %1060 = vmatpush3.bf16.msra.mxu1 %v1163_v23  ;;  %1033 = vmatprep.subr.bf16.mxu0 %v1164_v24  ;;  %v1202_v14 = vld [vmem:[#allocation6 + $0x138] sm:$0xff]   ;;  %v55_v16 = vld [vmem:[#allocation3 + $0x10] sm:$0xff] }
  0x40   :  { %1061 = vmatprep.subr.bf16.mxu1 %v1165_v25  ;;  %v1203_v15 = vld [vmem:[#allocation6 + $0x1b8] sm:$0xff]   ;;  %v59_v17 = vld [vmem:[#allocation3 + $0x30] sm:$0xff] }
  0x41   :  { %v56_v18 = vld [vmem:[#allocation3 + $0x18] sm:$0xff]  ;;  %v926_v20 = vcombine.low %v55_v16, %v59_v17  ;;  %v927_v21 = vcombine.high %v55_v16, %v59_v17  ;;  %v63_v24 = vld [vmem:[#allocation3 + $0x50] sm:$0xff] }
  0x42   :  { %1034 = vmatpush3.bf16.msra.mxu0 %v1166_v26  ;;  %v60_v19 = vld [vmem:[#allocation3 + $0x38] sm:$0xff]  ;;  %v67_v25 = vld [vmem:[#allocation3 + $0x70] sm:$0xff] }
  0x43   :  { %1062 = vmatpush3.bf16.msra.mxu1 %v1167_v27  ;;  %1035 = vmatprep.subr.bf16.mxu0 %v1168_v28  ;;  %v928_v22 = vcombine.low %v56_v18, %v60_v19  ;;  %v929_v23 = vcombine.high %v56_v18, %v60_v19  ;;  %v64_v26 = vld [vmem:[#allocation3 + $0x58] sm:$0xff]  ;;  %v935_v27 = vcombine.high %v63_v24, %v67_v25 }
  0x44   :  { %1063 = vmatprep.subr.bf16.mxu1 %v1169_v29  ;;  %v68_v28 = vld [vmem:[#allocation3 + $0x78] sm:$0xff] }
  0x45   :  { %v937_v29 = vcombine.high %v64_v26, %v68_v28 }
  0x46   :  { %1036 = vmatpush3.bf16.msra.mxu0 %v1170_v30  ;;  %v934_v30 = vcombine.low %v63_v24, %v67_v25 }
  0x47   :  { %1064 = vmatpush3.bf16.msra.mxu1 %v1171_v31  ;;  %1077 = vmatprep.subr.bf16.mxu0 %v1172_v40  ;;  %v936_v31 = vcombine.low %v64_v26, %v68_v28 }
  0x48   :  { %1105 = vmatprep.subr.bf16.mxu1 %v1173_v41 }
  0x49   :  { %694 = vmatmul.mubr.bf16.vlgmr.msra.gmra.mrb[0].mxu0 %v922_v35 }
  0x4a   :  { %743 = vmatmul.mubr.bf16.vlgmr.msra.gmra.mrb[0].mxu1 %v924_v38  ;;  %1078 = vmatpush3.bf16.msra.mxu0 %v1174_v42 }
  0x4b   :  { %1106 = vmatpush3.bf16.msra.mxu1 %v1175_v43  ;;  %1079 = vmatprep.subr.bf16.mxu0 %v1176_v44 }
  0x4c   :  { %1107 = vmatprep.subr.bf16.mxu1 %v1177_v45  ;;  %701 = vmatprep.mubr.bf16.mxu0 %v931_v62 }
  0x4d   :  { %750 = vmatprep.mubr.bf16.mxu1 %v933_v2 }
  0x4e   :  { %1080 = vmatpush3.bf16.msra.mxu0 %v1178_v46 }
  0x4f   :  { %1108 = vmatpush3.bf16.msra.mxu1 %v1179_v47  ;;  %1081 = vmatprep.subr.bf16.mxu0 %v1180_v48 }
  0x50   :  { %1109 = vmatprep.subr.bf16.mxu1 %v1181_v49 }
  0x51   :  { %702 = vmatmul.mubr.bf16.gmra.mrb[4].mxu0 %v930_v1 }
  0x52   :  { %1082 = vmatpush3.bf16.msra.mxu0 %v1182_v50  ;;  %751 = vmatmul.mubr.bf16.gmra.mrb[4].mxu1 %v932_v4 }
  0x53   :  { %1110 = vmatpush3.bf16.msra.mxu1 %v1183_v51  ;;  %1083 = vmatprep.subr.bf16.mxu0 %v1184_v52 }
  0x54   :  { %1111 = vmatprep.subr.bf16.mxu1 %v1185_v53  ;;  %791 = vmatprep.mubr.bf16.mxu0 %v927_v21 }
  0x55   :  { %840 = vmatprep.mubr.bf16.mxu1 %v929_v23 }
  0x56   :  { %1084 = vmatpush3.bf16.msra.mxu0 %v1186_v54 }
  0x57   :  { %1112 = vmatpush3.bf16.msra.mxu1 %v1187_v55  ;;  %1085 = vmatprep.subr.bf16.mxu0 %v1188_v56 }
  0x58   :  { %1113 = vmatprep.subr.bf16.mxu1 %v1189_v57 }
  0x5a   :  { %1086 = vmatpush3.bf16.msra.mxu0 %v1190_v58 }
  0x5b   :  { %1114 = vmatpush3.bf16.msra.mxu1 %v1191_v59  ;;  %1087 = vmatprep.subr.bf16.mxu0 %v1192_v3 }
  0x5c   :  { %1115 = vmatprep.subr.bf16.mxu1 %v1193_v5 }
  0x5e   :  { %1088 = vmatpush3.bf16.msra.mxu0 %v1194_v6 }
  0x5f   :  { %1116 = vmatpush3.bf16.msra.mxu1 %v1195_v7  ;;  %1089 = vmatprep.subr.bf16.mxu0 %v1196_v8 }
  0x60   :  { %1117 = vmatprep.subr.bf16.mxu1 %v1197_v9 }
  0x62   :  { %1090 = vmatpush3.bf16.msra.mxu0 %v1198_v10 }
  0x63   :  { %1118 = vmatpush3.bf16.msra.mxu1 %v1199_v11  ;;  %1091 = vmatprep.subr.bf16.mxu0 %v1200_v12 }
  0x64   :  { %1119 = vmatprep.subr.bf16.mxu1 %v1201_v13 }
  0x66   :  { %1092 = vmatpush3.bf16.msra.mxu0 %v1202_v14 }
  0x67   :  { %1120 = vmatpush3.bf16.msra.mxu1 %v1203_v15 }
  0x69   :  { %792 = vmatmul.mubr.bf16.vlgmr.msra.gmra.mrb[8].mxu0 %v926_v20 }
  0x6a   :  { %841 = vmatmul.mubr.bf16.vlgmr.msra.gmra.mrb[8].mxu1 %v928_v22  ;;  %799 = vmatprep.mubr.bf16.mxu0 %v935_v27 }
  0x6b   :  { %848 = vmatprep.mubr.bf16.mxu1 %v937_v29 }
  0x71   :  { %800 = vmatmul.mubr.bf16.gmra.mrb[12].mxu0 %v934_v30 }
  0x72   :  { %849 = vmatmul.mubr.bf16.gmra.mrb[12].mxu1 %v936_v31 }
 0x11c   :  { %v1037_v32 = vpop.f32.mrb[0].mxu0 }
 0x11d   :  { %v1065_v33 = vpop.f32.mrb[0].mxu1  ;;  %v1038_v34 = vpop.f32.mrb[1].mxu0 }
 0x11e   :  { %v1039_v35 = vadd.f32 %v1038_v34, %v1037_v32  ;;  %v1066_v36 = vpop.f32.mrb[1].mxu1  ;;  %v1040_v37 = vpop.f32.mrb[2].mxu0 }
 0x11f   :  { %v1067_v38 = vadd.f32 %v1066_v36, %v1065_v33  ;;  %v1068_v39 = vpop.f32.mrb[2].mxu1  ;;  %v1041_v40 = vpop.f32.mrb[3].mxu0 }
 0x120   :  { %v1042_v41 = vadd.f32 %v1041_v40, %v1040_v37  ;;  %v1069_v42 = vpop.f32.mrb[3].mxu1 }
 0x121   :  { %v745_v43 = vadd.f32 %v1067_v38, %v1039_v35  ;;  %v1070_v44 = vadd.f32 %v1069_v42, %v1068_v39 }
 0x123   :  { %v748_v45 = vadd.f32 %v1070_v44, %v1042_v41 }
 0x124   :  { %v1043_v46 = vpop.f32.mrb[4].mxu0 }
 0x125   :  { %v1071_v47 = vpop.f32.mrb[4].mxu1  ;;  %v1044_v48 = vpop.f32.mrb[5].mxu0 }
 0x126   :  { %v1045_v49 = vadd.f32 %v1044_v48, %v1043_v46  ;;  %v1072_v50 = vpop.f32.mrb[5].mxu1  ;;  %v1046_v51 = vpop.f32.mrb[6].mxu0 }
 0x127   :  { %v1073_v52 = vadd.f32 %v1072_v50, %v1071_v47  ;;  %v1074_v53 = vpop.f32.mrb[6].mxu1  ;;  %v1047_v54 = vpop.f32.mrb[7].mxu0 }
 0x128   :  { %v1048_v55 = vadd.f32 %v1047_v54, %v1046_v51  ;;  %v1075_v56 = vpop.f32.mrb[7].mxu1 }
 0x129   :  { %v753_v57 = vadd.f32 %v1073_v52, %v1045_v49  ;;  %v1076_v58 = vadd.f32 %v1075_v56, %v1074_v53 }
 0x12b   :  { %v756_v59 = vadd.f32 %v1076_v58, %v1048_v55 }
 0x13c   :  { %v1093_v60 = vpop.f32.mrb[8].mxu0 }
 0x13d   :  { %v1121_v61 = vpop.f32.mrb[8].mxu1  ;;  %v1094_v62 = vpop.f32.mrb[9].mxu0 }
 0x13e   :  { %v1122_v63 = vpop.f32.mrb[9].mxu1  ;;  %v1095_v0 = vadd.f32 %v1094_v62, %v1093_v60  ;;  %v1096_v2 = vpop.f32.mrb[10].mxu0 }
 0x13f   :  { %v1123_v1 = vadd.f32 %v1122_v63, %v1121_v61  ;;  %v1124_v3 = vpop.f32.mrb[10].mxu1  ;;  %v1097_v4 = vpop.f32.mrb[11].mxu0 }
 0x140   :  { %v1125_v5 = vpop.f32.mrb[11].mxu1  ;;  %v794_v6 = vadd.f32 %v1095_v0, %v745_v43  ;;  %v1098_v7 = vadd.f32 %v1097_v4, %v1096_v2 }
 0x141   :  { %v1126_v8 = vadd.f32 %v1125_v5, %v1124_v3 }
 0x142   :  { %v843_v9 = vadd.f32 %v1123_v1, %v794_v6  ;;  %v797_v10 = vadd.f32 %v1098_v7, %v748_v45 }
 0x144   :  { %vm872_vm0 = vcmp.ge.f32.partialorder %v843_v9, 0.0  ;;  %v876_v11 = vmul.f32 0.2, %v843_v9  ;;  %v846_v12 = vadd.f32 %v1126_v8, %v797_v10  ;;  %v1099_v13 = vpop.f32.mrb[12].mxu0 }
 0x145   :  { %v1127_v14 = vpop.f32.mrb[12].mxu1  ;;  %v1100_v15 = vpop.f32.mrb[13].mxu0 }
 0x146   :  { %v1128_v16 = vpop.f32.mrb[13].mxu1  ;;  %vm873_vm1 = vcmp.ge.f32.partialorder %v846_v12, 0.0  ;;  %v877_v17 = vmul.f32 0.2, %v846_v12  ;;  %v1101_v18 = vadd.f32 %v1100_v15, %v1099_v13  ;;  %v1102_v20 = vpop.f32.mrb[14].mxu0  ;;  %v880_v24 = vsel %vm872_vm0, %v843_v9, %v876_v11 }
 0x147   :  { %v1129_v19 = vadd.f32 %v1128_v16, %v1127_v14  ;;  %v1130_v21 = vpop.f32.mrb[14].mxu1  ;;  %v1103_v22 = vpop.f32.mrb[15].mxu0 }
 0x148   :  { %v1131_v23 = vpop.f32.mrb[15].mxu1  ;;  %v802_v25 = vadd.f32 %v1101_v18, %v753_v57  ;;  %v1104_v26 = vadd.f32 %v1103_v22, %v1102_v20  ;;  %v881_v28 = vsel %vm873_vm1, %v846_v12, %v877_v17 }
 0x149   :  { %v1132_v27 = vadd.f32 %v1131_v23, %v1130_v21  ;;  %v1013_v29 = vpack.c.bf16 %v881_v28, %v880_v24 }
 0x14a   :  { %v851_v30 = vadd.f32 %v1129_v19, %v802_v25  ;;  %v805_v31 = vadd.f32 %v1104_v26, %v756_v59 }
 0x14b   :  { %1014 = vst [vmem:[#allocation8] sm:$0xff] %v1013_v29  }
 0x14c   :  { %v878_v32 = vmul.f32 0.2, %v851_v30  ;;  %v854_v33 = vadd.f32 %v1132_v27, %v805_v31  ;;  %vm874_vm2 = vcmp.ge.f32.partialorder %v851_v30, 0.0 }
 0x14e   :  { %vm875_vm3 = vcmp.ge.f32.partialorder %v854_v33, 0.0  ;;  %v879_v34 = vmul.f32 0.2, %v854_v33  ;;  %v882_v35 = vsel %vm874_vm2, %v851_v30, %v878_v32 }
 0x150   :  { %v883_v36 = vsel %vm875_vm3, %v854_v33, %v879_v34 }
 0x151   :  { %v1018_v37 = vpack.c.bf16 %v883_v36, %v882_v35 }
 0x153   :  { %1020 = vst [vmem:[#allocation8 + $0x8] sm:$0xff] %v1018_v37  }
 0x154   :  { %1259 = shalt.err (!%p1256_p6)
}
 0x155   :  { %s1260_s12 = scalar_lea.hbm %s1342_s2, 256 }
 0x156   :  { %p1261_p7 = scmp.ne.s32.totalorder %s1342_s2, %s1260_s12  ;;  %p1264_p8 = scmp.lt.u32.totalorder %s1260_s12, %s1342_s2 }
 0x158   :  { %p1266_p9 = pnand %p1264_p8, %p1261_p7 }
 0x15a   :  { %1269 = shalt.err (!%p1266_p9)
}
 0x15b   :  { %915 = dma.vmem_to_hbm [thread:$0]  %s910_s8, 256, %s1342_s2, [#allocation5], %s1280_s0, %s1280_s0, %s1281_s5  }
 0x15c   :  { %1274 = dma.done.wait [#allocation5], 256  }
 0x15d   :  { %1275 = vsyncadd [#allocation5], 4294967040 }
 0x15e   :  { %919 = vsyncpa [#allocation4], 1 }
 0x15f   :  { %920 = vsyncpa [#allocation7], 1 }
 0x160   :  { %921 = vsyncpa [#allocation5], 1 }

</bundles_post_ra>
